<compile_context>
chip_gen: v5e
topology: v5e:2x2
jax: 0.10.0
libtpu: 0.0.40
codegen_flags: <defaults>
</compile_context>

<pallas_src>
import math

import jax
import jax.numpy as jnp
from jax.experimental import pallas as pl
from jax.experimental.pallas import tpu as pltpu

DATA_SIZE = (3, 28, 28)
DATA_DIM = 3 * 28 * 28          # 2352
HIDDEN_DIM = 400
ETA = 1e-6                      # Constants.eta in the original repo

# hidden dim lane-aligned (400 -> 512); numerically inert zero padding.
HIDDEN_PAD = 512


def _round_up(x, m):
    return (x + m - 1) // m * m


def _dec_kernel(z_ref, w1_ref, b1_ref, w2_ref, b2_ref, out_ref):
    # h = ReLU(z @ W1 + b1)  -- bf16 operands, f32 MXU accumulation
    h = jnp.dot(z_ref[...], w1_ref[...], preferred_element_type=jnp.float32)
    h = jnp.maximum(h + b1_ref[...], 0.0)
    # p = h @ W2 + b2
    p = jnp.dot(h.astype(jnp.bfloat16), w2_ref[...],
                preferred_element_type=jnp.float32)
    p = p + b2_ref[...]
    # sigmoid(p) = 0.5 * (tanh(p/2) + 1): single EUP op per element.
    d = 0.5 * jnp.tanh(0.5 * p) + 0.5
    # d = clamp(sigmoid(p), eta, 1 - eta)
    out_ref[...] = jnp.clip(d, ETA, 1.0 - ETA)


def dec_forward(z, w1, b1, w2, b2, *, max_tile_b=512):
    """z: (B, latent_dim) f32; padded bf16 weights / f32 biases.
    Returns (d, scale) with d: (B, 3, 28, 28) f32."""
    B, latent_dim = z.shape

    # --- batch tiling: minimal padding, >= 2 grid steps when possible ------
    b_pad = _round_up(max(B, 8), 8)
    n_steps = max(2, pl.cdiv(b_pad, max_tile_b))
    tile_b = max(8, _round_up(pl.cdiv(b_pad, n_steps), 8))
    b_pad = _round_up(b_pad, tile_b)        # waste < tile_b rows, usually < 8
    grid = (b_pad // tile_b,)

    zb = z.astype(jnp.bfloat16)
    if b_pad != B:
        zb = jnp.pad(zb, ((0, b_pad - B), (0, 0)))

    flops = 2 * b_pad * (latent_dim * HIDDEN_PAD + HIDDEN_PAD * DATA_DIM)
    bytes_accessed = (zb.size * 2 + w1.size * 2 + b1.size * 4
                      + w2.size * 2 + b2.size * 4 + b_pad * DATA_DIM * 4)
    cost = pl.CostEstimate(flops=flops,
                           transcendentals=b_pad * DATA_DIM,  # 1 tanh / elem
                           bytes_accessed=bytes_accessed)

    d_flat = pl.pallas_call(
        _dec_kernel,
        out_shape=jax.ShapeDtypeStruct((b_pad, DATA_DIM), jnp.float32),
        grid=grid,
        in_specs=[
            pl.BlockSpec((tile_b, latent_dim), lambda i: (i, 0)),  # z tiled over batch
            pl.BlockSpec(w1.shape, lambda i: (0, 0)),              # weights VMEM-resident
            pl.BlockSpec(b1.shape, lambda i: (0, 0)),
            pl.BlockSpec(w2.shape, lambda i: (0, 0)),
            pl.BlockSpec(b2.shape, lambda i: (0, 0)),
        ],
        out_specs=pl.BlockSpec((tile_b, DATA_DIM), lambda i: (i, 0)),
        compiler_params=pltpu.CompilerParams(
            dimension_semantics=("parallel",),
            vmem_limit_bytes=48 * 1024 * 1024,
        ),
        cost_estimate=cost,
    )(zb, w1, b1, w2, b2)

    d = d_flat if b_pad == B else d_flat[:B]
    d = d.reshape(B, *DATA_SIZE)            # contiguous reshape: no copy
    return d, jnp.float32(0.75)


def init_params(key, latent_dim):
    """nn.Linear-style uniform init; hidden dim zero-padded to 512 (inert),
    weights cast to bf16 (biases stay f32)."""
    k1, k2, k3, k4 = jax.random.split(key, 4)
    bound1 = 1.0 / math.sqrt(latent_dim)
    bound2 = 1.0 / math.sqrt(HIDDEN_DIM)
    # stored transposed relative to torch: (in_features, out_features)
    w1 = jax.random.uniform(k1, (latent_dim, HIDDEN_DIM), jnp.float32, -bound1, bound1)
    b1 = jax.random.uniform(k2, (1, HIDDEN_DIM), jnp.float32, -bound1, bound1)
    w2 = jax.random.uniform(k3, (HIDDEN_DIM, DATA_DIM), jnp.float32, -bound2, bound2)
    b2 = jax.random.uniform(k4, (1, DATA_DIM), jnp.float32, -bound2, bound2)
    # zero-pad hidden dim (numerically inert) + bf16 weights
    w1p = jnp.pad(w1, ((0, 0), (0, HIDDEN_PAD - HIDDEN_DIM))).astype(jnp.bfloat16)
    b1p = jnp.pad(b1, ((0, 0), (0, HIDDEN_PAD - HIDDEN_DIM)))
    w2p = jnp.pad(w2, ((0, HIDDEN_PAD - HIDDEN_DIM), (0, 0))).astype(jnp.bfloat16)
    b2p = b2
    return w1p, b1p, w2p, b2p


if __name__ == "__main__":
    key = jax.random.PRNGKey(0)
    latent_dim = 16
    batch = 8

    pkey, zkey = jax.random.split(key)
    w1, b1, w2, b2 = init_params(pkey, latent_dim)
    z = jax.random.normal(zkey, (batch, latent_dim), jnp.float32)

    d, scale = dec_forward(z, w1, b1, w2, b2)
    d = jax.block_until_ready(d)

    assert d.shape == (batch, *DATA_SIZE)
    assert float(scale) == 0.75

    # reference #1: mirrors kernel numerics (bf16 inputs/weights, f32 acc)
    h_ref = jnp.maximum(
        jnp.dot(z.astype(jnp.bfloat16), w1, preferred_element_type=jnp.float32) + b1, 0.0)
    p_ref = jnp.dot(h_ref.astype(jnp.bfloat16), w2,
                    preferred_element_type=jnp.float32) + b2
    d_ref = jnp.clip(jax.nn.sigmoid(p_ref), ETA, 1.0 - ETA)
    d_ref = d_ref.reshape(batch, *DATA_SIZE)
    assert jnp.allclose(d, d_ref, atol=2e-3, rtol=2e-3)

    # reference #2: plain f32 math (original module semantics), loose tol for bf16 weights
    w1f = w1.astype(jnp.float32)[:, :HIDDEN_DIM]
    w2f = w2.astype(jnp.float32)[:HIDDEN_DIM, :]
    h_f = jnp.maximum(z @ w1f + b1[:, :HIDDEN_DIM], 0.0)
    p_f = h_f @ w2f + b2
    d_f = jnp.clip(jax.nn.sigmoid(p_f), ETA, 1.0 - ETA).reshape(batch, *DATA_SIZE)
    assert jnp.allclose(d, d_f, atol=5e-2)

    print("KERNEL_OK")
</pallas_src>

<mosaic_0001>
module attributes {stable_mosaic.version = 11 : i64} {
  func.func @_dec_kernel(%arg0: i32, %arg1: memref<8x16xbf16, #tpu.memory_space<vmem>>, %arg2: memref<16x512xbf16, #tpu.memory_space<vmem>>, %arg3: memref<1x512xf32, #tpu.memory_space<vmem>>, %arg4: memref<512x2352xbf16, #tpu.memory_space<vmem>>, %arg5: memref<1x2352xf32, #tpu.memory_space<vmem>>, %arg6: memref<8x2352xf32, #tpu.memory_space<vmem>>) attributes {dimension_semantics = [#tpu.dimension_semantics<parallel>], iteration_bounds = array<i64: 1>, scalar_prefetch = 0 : i64, scratch_operands = 0 : i64, tpu.core_type = #tpu.core_type<tc>, window_params = [{transform_indices = @transform_0, window_bounds = array<i64: 8, 16>}, {pipeline_mode = #tpu.pipeline_mode<synchronous>, transform_indices = @transform_1, window_bounds = array<i64: 16, 512>}, {pipeline_mode = #tpu.pipeline_mode<synchronous>, transform_indices = @transform_2, window_bounds = array<i64: 1, 512>}, {pipeline_mode = #tpu.pipeline_mode<synchronous>, transform_indices = @transform_3, window_bounds = array<i64: 512, 2352>}, {pipeline_mode = #tpu.pipeline_mode<synchronous>, transform_indices = @transform_4, window_bounds = array<i64: 1, 2352>}, {transform_indices = @transform_5, window_bounds = array<i64: 8, 2352>}]} {
    %c0 = arith.constant 0 : index
    %c0_0 = arith.constant 0 : index
    %0 = vector.load %arg1[%c0, %c0_0] : memref<8x16xbf16, #tpu.memory_space<vmem>>, vector<8x16xbf16>
    %c0_1 = arith.constant 0 : index
    %c0_2 = arith.constant 0 : index
    %1 = vector.load %arg2[%c0_1, %c0_2] : memref<16x512xbf16, #tpu.memory_space<vmem>>, vector<16x512xbf16>
    %cst = arith.constant dense<0.000000e+00> : vector<8x512xf32>
    %2 = tpu.matmul %0, %1, %cst {dimension_numbers = #tpu.dot_dimension_numbers<[1], [0], [0], [1], [0, 0, 1, 1], [], []>} : vector<8x16xbf16>, vector<16x512xbf16>, vector<8x512xf32> -> vector<8x512xf32>
    %c0_3 = arith.constant 0 : index
    %c0_4 = arith.constant 0 : index
    %3 = vector.load %arg3[%c0_3, %c0_4] : memref<1x512xf32, #tpu.memory_space<vmem>>, vector<1x512xf32>
    %4 = vector.broadcast %3 : vector<1x512xf32> to vector<8x512xf32>
    %5 = arith.addf %2, %4 : vector<8x512xf32>
    %cst_5 = arith.constant 0.000000e+00 : f32
    %6 = vector.broadcast %cst_5 : f32 to vector<8x512xf32>
    %7 = arith.maximumf %5, %6 : vector<8x512xf32>
    %8 = arith.truncf %7 : vector<8x512xf32> to vector<8x512xbf16>
    %c0_6 = arith.constant 0 : index
    %c0_7 = arith.constant 0 : index
    %9 = vector.load %arg4[%c0_6, %c0_7] : memref<512x2352xbf16, #tpu.memory_space<vmem>>, vector<512x2352xbf16>
    %cst_8 = arith.constant dense<0.000000e+00> : vector<8x2352xf32>
    %10 = tpu.matmul %8, %9, %cst_8 {dimension_numbers = #tpu.dot_dimension_numbers<[1], [0], [0], [1], [0, 0, 1, 1], [], []>} : vector<8x512xbf16>, vector<512x2352xbf16>, vector<8x2352xf32> -> vector<8x2352xf32>
    %c0_9 = arith.constant 0 : index
    %c0_10 = arith.constant 0 : index
    %11 = vector.load %arg5[%c0_9, %c0_10] : memref<1x2352xf32, #tpu.memory_space<vmem>>, vector<1x2352xf32>
    %12 = vector.broadcast %11 : vector<1x2352xf32> to vector<8x2352xf32>
    %13 = arith.addf %10, %12 : vector<8x2352xf32>
    %cst_11 = arith.constant 5.000000e-01 : f32
    %14 = vector.broadcast %cst_11 : f32 to vector<8x2352xf32>
    %15 = arith.mulf %14, %13 : vector<8x2352xf32>
    %16 = math.tanh %15 : vector<8x2352xf32>
    %cst_12 = arith.constant 5.000000e-01 : f32
    %17 = vector.broadcast %cst_12 : f32 to vector<8x2352xf32>
    %18 = arith.mulf %17, %16 : vector<8x2352xf32>
    %cst_13 = arith.constant 5.000000e-01 : f32
    %19 = vector.broadcast %cst_13 : f32 to vector<8x2352xf32>
    %20 = arith.addf %18, %19 : vector<8x2352xf32>
    %cst_14 = arith.constant 9.99999997E-7 : f32
    %cst_15 = arith.constant 0.999998986 : f32
    %21 = vector.broadcast %cst_14 : f32 to vector<8x2352xf32>
    %22 = arith.maximumf %21, %20 : vector<8x2352xf32>
    %23 = vector.broadcast %cst_15 : f32 to vector<8x2352xf32>
    %24 = arith.minimumf %23, %22 : vector<8x2352xf32>
    %c0_16 = arith.constant 0 : index
    %c0_17 = arith.constant 0 : index
    %25 = vector.load %arg6[%c0_16, %c0_17] : memref<8x2352xf32, #tpu.memory_space<vmem>>, vector<8x2352xf32>
    tpu.vector_store %arg6[%c0_16, %c0_17], %24 {strides = array<i32>} : memref<8x2352xf32, #tpu.memory_space<vmem>>, vector<8x2352xf32>,
    return
  }
  func.func @transform_0(%arg0: i32) -> (i32, i32) {
    %c0_i32 = arith.constant 0 : i32
    %c0_i32_0 = arith.constant 0 : i32
    return %arg0, %c0_i32 : i32, i32
  }
  func.func @transform_1(%arg0: i32) -> (i32, i32) {
    %c0_i32 = arith.constant 0 : i32
    %c0_i32_0 = arith.constant 0 : i32
    %c0_i32_1 = arith.constant 0 : i32
    return %c0_i32, %c0_i32_0 : i32, i32
  }
  func.func @transform_2(%arg0: i32) -> (i32, i32) {
    %c0_i32 = arith.constant 0 : i32
    %c0_i32_0 = arith.constant 0 : i32
    %c0_i32_1 = arith.constant 0 : i32
    return %c0_i32, %c0_i32_0 : i32, i32
  }
  func.func @transform_3(%arg0: i32) -> (i32, i32) {
    %c0_i32 = arith.constant 0 : i32
    %c0_i32_0 = arith.constant 0 : i32
    %c0_i32_1 = arith.constant 0 : i32
    return %c0_i32, %c0_i32_0 : i32, i32
  }
  func.func @transform_4(%arg0: i32) -> (i32, i32) {
    %c0_i32 = arith.constant 0 : i32
    %c0_i32_0 = arith.constant 0 : i32
    %c0_i32_1 = arith.constant 0 : i32
    return %c0_i32, %c0_i32_0 : i32, i32
  }
  func.func @transform_5(%arg0: i32) -> (i32, i32) {
    %c0_i32 = arith.constant 0 : i32
    %c0_i32_0 = arith.constant 0 : i32
    return %arg0, %c0_i32 : i32, i32
  }
}

</mosaic_0001>

<bundles_post_ra>
// kernel: tpu_custom_call.1
= control target key start
LH: loop header
LB: loop body
LE: loop exit
PB: predicated region body
PF: predicated region fallthrough
CT: control target
= control target key end

     0   :  { %vm57_vm0 = vcmask 130048   ;;  %s11988_s0 = inlined_call_operand.vmem [shape: bf16[8,16], index: 0, kind: input, shape index: {}]   ;;  %s11989_s1 = inlined_call_operand.vmem [shape: bf16[16,512], index: 1, kind: input, shape index: {}]   ;;  %s11990_s2 = inlined_call_operand.vmem [shape: f32[1,512], index: 2, kind: input, shape index: {}]   ;;  %s11991_s3 = inlined_call_operand.vmem [shape: bf16[512,2352], index: 3, kind: input, shape index: {}]   ;;  %s11992_s4 = inlined_call_operand.vmem [shape: f32[1,2352], index: 4, kind: input, shape index: {}]   ;;  %s11993_s5 = inlined_call_operand.hbm [shape: f32[8,2352], index: 5, kind: output, shape index: {}]  }
   0x1   :  { %v5017_v0 = vld [vmem:[%s11989_s1] sm:$0xf]  ;;  %v7469_v1 = vld [vmem:[%s11989_s1 + $0xc] sm:$0xf0]  ;;  %v7467_v2 = vld [vmem:[%s11989_s1 + $0x4] sm:$0xf] }
   0x2   :  { %v5018_v3 = vor.u32 %v7469_v1, %v5017_v0  ;;  %v5019_v4 = vld [vmem:[%s11989_s1 + $0x10] sm:$0xf0]  ;;  %v5025_v5 = vld [vmem:[%s11989_s1 + $0x8] sm:$0xf]  ;;  %v7470_v6 = vld [vmem:[%s11989_s1 + $0x14] sm:$0xf0] }
   0x3   :  { %v5022_v7 = vor.u32 %v7467_v2, %v5019_v4  ;;  %v5026_v8 = vor.u32 %v7470_v6, %v5025_v5  ;;  %v7468_v9 = vld [vmem:[%s11989_s1 + $0xc] sm:$0xf]  ;;  %v5027_v10 = vld [vmem:[%s11989_s1 + $0x18] sm:$0xf0]  ;;  %v22_v11 = vld [vmem:[%s11988_s0] sm:$0xf] }
   0x4   :  { %68 = vmatpush.bf16.msra.mxu0 %v5018_v3  ;;  %v5030_v12 = vor.u32 %v7468_v9, %v5027_v10  ;;  %v5569_v13 = vld [vmem:[%s11991_s3 + $0x428] sm:$0xf]  ;;  %v7613_v14 = vld [vmem:[%s11991_s3 + $0x470] sm:$0xf0]  ;;  %v5493_v18 = vld [vmem:[%s11991_s3 + $0x390] sm:$0xf] }
   0x5   :  { %81 = vmatpush.bf16.msra.mxu1 %v5022_v7  ;;  %94 = vmatpush.bf16.msra.mxu2 %v5026_v8  ;;  %v5570_v15 = vor.u32 %v7613_v14, %v5569_v13  ;;  %v6177_v16 = vld [vmem:[%s11991_s3 + $0x8e8] sm:$0xf]  ;;  %v7765_v17 = vld [vmem:[%s11991_s3 + $0x930] sm:$0xf0]  ;;  %v7594_v20 = vld [vmem:[%s11991_s3 + $0x3d8] sm:$0xf0] }
   0x6   :  { %107 = vmatpush.bf16.msra.mxu3 %v5030_v12  ;;  %v6178_v19 = vor.u32 %v7765_v17, %v6177_v16  ;;  %v6101_v21 = vld [vmem:[%s11991_s3 + $0x850] sm:$0xf]  ;;  %v7746_v22 = vld [vmem:[%s11991_s3 + $0x898] sm:$0xf0]  ;;  %v6785_v23 = vld [vmem:[%s11991_s3 + $0xda8] sm:$0xf]  ;;  %v5494_v28 = vor.u32 %v7594_v20, %v5493_v18 }
   0x7   :  { %5031 = vmatmul.msk.bf16.vlgmr.msra.gmra.mxu0 %vm57_vm0, %v22_v11  ;;  %v7917_v24 = vld [vmem:[%s11991_s3 + $0xdf0] sm:$0xf0]  ;;  %v7393_v25 = vld [vmem:[%s11991_s3 + $0x1268] sm:$0xf]  ;;  %v5417_v30 = vld [vmem:[%s11991_s3 + $0x2f8] sm:$0xf]  ;;  %v6102_v33 = vor.u32 %v7746_v22, %v6101_v21 }
   0x8   :  { %5032 = vmatmul.msk.bf16.vlgmr.msra.gmra.mxu1 %vm57_vm0, %v22_v11  ;;  %5033 = vmatmul.msk.bf16.vlgmr.msra.gmra.mxu2 %vm57_vm0, %v22_v11  ;;  %v6786_v26 = vor.u32 %v7917_v24, %v6785_v23  ;;  %v8069_v27 = vld [vmem:[%s11991_s3 + $0x12b0] sm:$0xf0]  ;;  %v7575_v31 = vld [vmem:[%s11991_s3 + $0x340] sm:$0xf0]  ;;  %v6709_v32 = vld [vmem:[%s11991_s3 + $0xd10] sm:$0xf] }
   0x9   :  { %5034 = vmatmul.msk.bf16.vlgmr.msra.gmra.mxu3 %vm57_vm0, %v22_v11  ;;  %3877 = vmatpush.bf16.msrb.mxu0 %v5570_v15  ;;  %v7394_v29 = vor.u32 %v8069_v27, %v7393_v25  ;;  %v7898_v34 = vld [vmem:[%s11991_s3 + $0xd58] sm:$0xf0]  ;;  %v7317_v35 = vld [vmem:[%s11991_s3 + $0x11d0] sm:$0xf]  ;;  %v6025_v37 = vld [vmem:[%s11991_s3 + $0x7b8] sm:$0xf]  ;;  %v5418_v43 = vor.u32 %v7575_v31, %v5417_v30 }
   0xa   :  { %3890 = vmatpush.bf16.msrb.mxu1 %v6178_v19  ;;  %3903 = vmatpush.bf16.msrb.mxu2 %v6786_v26  ;;  %v8050_v36 = vld [vmem:[%s11991_s3 + $0x1218] sm:$0xf0]  ;;  %v7727_v38 = vld [vmem:[%s11991_s3 + $0x800] sm:$0xf0]  ;;  %v6710_v39 = vor.u32 %v7898_v34, %v6709_v32  ;;  %v6633_v41 = vld [vmem:[%s11991_s3 + $0xc78] sm:$0xf] }
   0xb   :  { %3916 = vmatpush.bf16.msrb.mxu3 %v7394_v29  ;;  %v7318_v40 = vor.u32 %v8050_v36, %v7317_v35  ;;  %v7879_v42 = vld [vmem:[%s11991_s3 + $0xcc0] sm:$0xf0]  ;;  %v7241_v44 = vld [vmem:[%s11991_s3 + $0x1138] sm:$0xf]  ;;  %v6026_v46 = vor.u32 %v7727_v38, %v6025_v37  ;;  %v5341_v47 = vld [vmem:[%s11991_s3 + $0x260] sm:$0xf] }
   0xc   :  { %v8031_v45 = vld [vmem:[%s11991_s3 + $0x1180] sm:$0xf0]  ;;  %v7556_v48 = vld [vmem:[%s11991_s3 + $0x2a8] sm:$0xf0]  ;;  %v5949_v49 = vld [vmem:[%s11991_s3 + $0x720] sm:$0xf]  ;;  %v6634_v50 = vor.u32 %v7879_v42, %v6633_v41 }
   0xd   :  { %3878 = vmatpush.bf16.msrb.mxu0 %v5494_v28  ;;  %v7708_v51 = vld [vmem:[%s11991_s3 + $0x768] sm:$0xf0]  ;;  %v7242_v52 = vor.u32 %v8031_v45, %v7241_v44  ;;  %v6557_v53 = vld [vmem:[%s11991_s3 + $0xbe0] sm:$0xf]  ;;  %v5342_v57 = vor.u32 %v7556_v48, %v5341_v47  ;;  %v5265_v59 = vld [vmem:[%s11991_s3 + $0x1c8] sm:$0xf] }
   0xe   :  { %3891 = vmatpush.bf16.msrb.mxu1 %v6102_v33  ;;  %3904 = vmatpush.bf16.msrb.mxu2 %v6710_v39  ;;  %v7860_v54 = vld [vmem:[%s11991_s3 + $0xc28] sm:$0xf0]  ;;  %v7165_v55 = vld [vmem:[%s11991_s3 + $0x10a0] sm:$0xf]  ;;  %v5950_v58 = vor.u32 %v7708_v51, %v5949_v49  ;;  %v7537_v60 = vld [vmem:[%s11991_s3 + $0x210] sm:$0xf0] }
   0xf   :  { %3917 = vmatpush.bf16.msrb.mxu3 %v7318_v40  ;;  %v8012_v56 = vld [vmem:[%s11991_s3 + $0x10e8] sm:$0xf0]  ;;  %v5873_v61 = vld [vmem:[%s11991_s3 + $0x688] sm:$0xf]  ;;  %v6558_v62 = vor.u32 %v7860_v54, %v6557_v53  ;;  %v7689_v63 = vld [vmem:[%s11991_s3 + $0x6d0] sm:$0xf0]  ;;  %v5266_v5 = vor.u32 %v7537_v60, %v5265_v59 }
  0x10   :  { %v7166_v0 = vor.u32 %v8012_v56, %v7165_v55  ;;  %v6481_v1 = vld [vmem:[%s11991_s3 + $0xb48] sm:$0xf]  ;;  %v7841_v2 = vld [vmem:[%s11991_s3 + $0xb90] sm:$0xf0]  ;;  %v5874_v6 = vor.u32 %v7689_v63, %v5873_v61  ;;  %v5189_v7 = vld [vmem:[%s11991_s3 + $0x130] sm:$0xf] }
  0x11   :  { %3879 = vmatpush.bf16.msrb.mxu0 %v5418_v43  ;;  %v7089_v3 = vld [vmem:[%s11991_s3 + $0x1008] sm:$0xf]  ;;  %v7993_v4 = vld [vmem:[%s11991_s3 + $0x1050] sm:$0xf0]  ;;  %v7518_v8 = vld [vmem:[%s11991_s3 + $0x178] sm:$0xf0]  ;;  %v6482_v10 = vor.u32 %v7841_v2, %v6481_v1 }
  0x12   :  { %3892 = vmatpush.bf16.msrb.mxu1 %v6026_v46  ;;  %3905 = vmatpush.bf16.msrb.mxu2 %v6634_v50  ;;  %v5797_v9 = vld [vmem:[%s11991_s3 + $0x5f0] sm:$0xf]  ;;  %v7670_v11 = vld [vmem:[%s11991_s3 + $0x638] sm:$0xf0]  ;;  %v7090_v12 = vor.u32 %v7993_v4, %v7089_v3  ;;  %v5190_v17 = vor.u32 %v7518_v8, %v5189_v7  ;;  %v5113_v19 = vld [vmem:[%s11991_s3 + $0x98] sm:$0xf] }
  0x13   :  { %3918 = vmatpush.bf16.msrb.mxu3 %v7242_v52  ;;  %v6405_v13 = vld [vmem:[%s11991_s3 + $0xab0] sm:$0xf]  ;;  %v7822_v14 = vld [vmem:[%s11991_s3 + $0xaf8] sm:$0xf0]  ;;  %v5798_v18 = vor.u32 %v7670_v11, %v5797_v9  ;;  %v7499_v20 = vld [vmem:[%s11991_s3 + $0xe0] sm:$0xf0] }
  0x14   :  { %v7013_v15 = vld [vmem:[%s11991_s3 + $0xf70] sm:$0xf]  ;;  %v7974_v16 = vld [vmem:[%s11991_s3 + $0xfb8] sm:$0xf0]  ;;  %v5721_v21 = vld [vmem:[%s11991_s3 + $0x558] sm:$0xf]  ;;  %v6406_v22 = vor.u32 %v7822_v14, %v6405_v13  ;;  %v5114_v29 = vor.u32 %v7499_v20, %v5113_v19 }
  0x15   :  { %3880 = vmatpush.bf16.msrb.mxu0 %v5342_v57  ;;  %v7651_v23 = vld [vmem:[%s11991_s3 + $0x5a0] sm:$0xf0]  ;;  %v7014_v24 = vor.u32 %v7974_v16, %v7013_v15  ;;  %v6329_v25 = vld [vmem:[%s11991_s3 + $0xa18] sm:$0xf]  ;;  %v5037_v30 = vld [vmem:[%s11991_s3] sm:$0xf] }
  0x16   :  { %3893 = vmatpush.bf16.msrb.mxu1 %v5950_v58  ;;  %3906 = vmatpush.bf16.msrb.mxu2 %v6558_v62  ;;  %v7803_v26 = vld [vmem:[%s11991_s3 + $0xa60] sm:$0xf0]  ;;  %v6937_v27 = vld [vmem:[%s11991_s3 + $0xed8] sm:$0xf]  ;;  %v7480_v31 = vld [vmem:[%s11991_s3 + $0x48] sm:$0xf0]  ;;  %v5722_v32 = vor.u32 %v7651_v23, %v5721_v21 }
  0x17   :  { %3919 = vmatpush.bf16.msrb.mxu3 %v7166_v0  ;;  %v7955_v28 = vld [vmem:[%s11991_s3 + $0xf20] sm:$0xf0]  ;;  %v5645_v33 = vld [vmem:[%s11991_s3 + $0x4c0] sm:$0xf]  ;;  %v7632_v34 = vld [vmem:[%s11991_s3 + $0x508] sm:$0xf0]  ;;  %v6330_v36 = vor.u32 %v7803_v26, %v6329_v25  ;;  %v5038_v44 = vor.u32 %v7480_v31, %v5037_v30 }
  0x18   :  { %v7604_v35 = vld [vmem:[%s11991_s3 + $0x42c] sm:$0xf]  ;;  %v5571_v37 = vld [vmem:[%s11991_s3 + $0x474] sm:$0xf0]  ;;  %v6938_v40 = vor.u32 %v7955_v28, %v6937_v27  ;;  %v6253_v41 = vld [vmem:[%s11991_s3 + $0x980] sm:$0xf]  ;;  %v5646_v48 = vor.u32 %v7632_v34, %v5645_v33 }
  0x19   :  { %3881 = vmatpush.bf16.msrb.mxu0 %v5266_v5  ;;  %v7756_v38 = vld [vmem:[%s11991_s3 + $0x8ec] sm:$0xf]  ;;  %v6179_v39 = vld [vmem:[%s11991_s3 + $0x934] sm:$0xf0]  ;;  %v6861_v43 = vld [vmem:[%s11991_s3 + $0xe40] sm:$0xf]  ;;  %v5574_v49 = vor.u32 %v7604_v35, %v5571_v37 }
  0x1a   :  { %3894 = vmatpush.bf16.msrb.mxu1 %v5874_v6  ;;  %3907 = vmatpush.bf16.msrb.mxu2 %v6482_v10  ;;  %v7784_v42 = vld [vmem:[%s11991_s3 + $0x9c8] sm:$0xf0]  ;;  %v6787_v47 = vld [vmem:[%s11991_s3 + $0xdf4] sm:$0xf0]  ;;  %v6182_v52 = vor.u32 %v7756_v38, %v6179_v39  ;;  %v7585_v53 = vld [vmem:[%s11991_s3 + $0x394] sm:$0xf] }
  0x1b   :  { %3920 = vmatpush.bf16.msrb.mxu3 %v7090_v12  ;;  %v7936_v45 = vld [vmem:[%s11991_s3 + $0xe88] sm:$0xf0]  ;;  %v7395_v51 = vld [vmem:[%s11991_s3 + $0x12b4] sm:$0xf0]  ;;  %v5495_v54 = vld [vmem:[%s11991_s3 + $0x3dc] sm:$0xf0]  ;;  %v6254_v55 = vor.u32 %v7784_v42, %v6253_v41 }
  0x1c   :  { %v7908_v46 = vld [vmem:[%s11991_s3 + $0xdac] sm:$0xf]  ;;  %v7737_v56 = vld [vmem:[%s11991_s3 + $0x854] sm:$0xf]  ;;  %v6103_v57 = vld [vmem:[%s11991_s3 + $0x89c] sm:$0xf0]  ;;  %v6862_v58 = vor.u32 %v7936_v45, %v6861_v43  ;;  %v5498_v63 = vor.u32 %v7585_v53, %v5495_v54 }
  0x1d   :  { %3882 = vmatpush.bf16.msrb.mxu0 %v5190_v17  ;;  %v8060_v50 = vld [vmem:[%s11991_s3 + $0x126c] sm:$0xf]  ;;  %v6790_v59 = vor.u32 %v7908_v46, %v6787_v47  ;;  %v7889_v61 = vld [vmem:[%s11991_s3 + $0xd14] sm:$0xf]  ;;  %v6711_v62 = vld [vmem:[%s11991_s3 + $0xd5c] sm:$0xf0]  ;;  %v6106_v2 = vor.u32 %v7737_v56, %v6103_v57 }
  0x1e   :  { %3895 = vmatpush.bf16.msrb.mxu1 %v5798_v18  ;;  %3908 = vmatpush.bf16.msrb.mxu2 %v6406_v22  ;;  %v7398_v60 = vor.u32 %v8060_v50, %v7395_v51  ;;  %v8041_v0 = vld [vmem:[%s11991_s3 + $0x11d4] sm:$0xf]  ;;  %v7319_v1 = vld [vmem:[%s11991_s3 + $0x121c] sm:$0xf0]  ;;  %v7566_v3 = vld [vmem:[%s11991_s3 + $0x2fc] sm:$0xf] }
  0x1f   :  { %3921 = vmatpush.bf16.msrb.mxu3 %v7014_v24  ;;  %v5419_v4 = vld [vmem:[%s11991_s3 + $0x344] sm:$0xf0] }
  0x21   :  { %3883 = vmatpush.bf16.msrb.mxu0 %v5114_v29 }
  0x22   :  { %3896 = vmatpush.bf16.msrb.mxu1 %v5722_v32  ;;  %3909 = vmatpush.bf16.msrb.mxu2 %v6330_v36 }
  0x23   :  { %3922 = vmatpush.bf16.msrb.mxu3 %v6938_v40 }
  0x25   :  { %3884 = vmatpush.bf16.msrb.mxu0 %v5038_v44 }
  0x26   :  { %3897 = vmatpush.bf16.msrb.mxu1 %v5646_v48  ;;  %3910 = vmatpush.bf16.msrb.mxu2 %v6254_v55 }
  0x29   :  { %3929 = vmatpush.bf16.msra.mxu0 %v5574_v49 }
  0x2a   :  { %3942 = vmatpush.bf16.msra.mxu1 %v6182_v52 }
  0x2b   :  { %10 = vsyncpa [#allocation3], 0  ;;  %3923 = vmatpush.bf16.msrb.mxu3 %v6862_v58  ;;  %3955 = vmatpush.bf16.msra.mxu2 %v6790_v59  ;;  %v7718_v5 = vld [vmem:[%s11991_s3 + $0x7bc] sm:$0xf]  ;;  %v6027_v6 = vld [vmem:[%s11991_s3 + $0x804] sm:$0xf0]  ;;  %v6714_v7 = vor.u32 %v7889_v61, %v6711_v62  ;;  %v7322_v8 = vor.u32 %v8041_v0, %v7319_v1  ;;  %v5422_v11 = vor.u32 %v7566_v3, %v5419_v4 }
  0x2c   :  { %v7870_v9 = vld [vmem:[%s11991_s3 + $0xc7c] sm:$0xf]  ;;  %v6635_v10 = vld [vmem:[%s11991_s3 + $0xcc4] sm:$0xf0]  ;;  %v6030_v14 = vor.u32 %v7718_v5, %v6027_v6  ;;  %v7547_v15 = vld [vmem:[%s11991_s3 + $0x264] sm:$0xf] }
  0x2d   :  { %3930 = vmatpush.bf16.msra.mxu0 %v5498_v63  ;;  %v8022_v12 = vld [vmem:[%s11991_s3 + $0x113c] sm:$0xf]  ;;  %v7243_v13 = vld [vmem:[%s11991_s3 + $0x1184] sm:$0xf0]  ;;  %v5343_v16 = vld [vmem:[%s11991_s3 + $0x2ac] sm:$0xf0]  ;;  %v6638_v19 = vor.u32 %v7870_v9, %v6635_v10 }
  0x2e   :  { %3943 = vmatpush.bf16.msra.mxu1 %v6106_v2  ;;  %v7699_v17 = vld [vmem:[%s11991_s3 + $0x724] sm:$0xf]  ;;  %v5951_v18 = vld [vmem:[%s11991_s3 + $0x76c] sm:$0xf0]  ;;  %v7246_v20 = vor.u32 %v8022_v12, %v7243_v13  ;;  %v5346_v23 = vor.u32 %v7547_v15, %v5343_v16  ;;  %v7528_v27 = vld [vmem:[%s11991_s3 + $0x1cc] sm:$0xf] }
  0x2f   :  { %3968 = vmatpush.bf16.msra.mxu3 %v7398_v60  ;;  %3956 = vmatpush.bf16.msra.mxu2 %v6714_v7  ;;  %v7851_v21 = vld [vmem:[%s11991_s3 + $0xbe4] sm:$0xf]  ;;  %v6559_v22 = vld [vmem:[%s11991_s3 + $0xc2c] sm:$0xf0]  ;;  %v5954_v26 = vor.u32 %v7699_v17, %v5951_v18  ;;  %v5267_v28 = vld [vmem:[%s11991_s3 + $0x214] sm:$0xf0] }
  0x30   :  { %v8003_v24 = vld [vmem:[%s11991_s3 + $0x10a4] sm:$0xf]  ;;  %v7167_v25 = vld [vmem:[%s11991_s3 + $0x10ec] sm:$0xf0]  ;;  %v7680_v29 = vld [vmem:[%s11991_s3 + $0x68c] sm:$0xf]  ;;  %v6562_v31 = vor.u32 %v7851_v21, %v6559_v22  ;;  %v5270_v33 = vor.u32 %v7528_v27, %v5267_v28 }
  0x31   :  { %3931 = vmatpush.bf16.msra.mxu0 %v5422_v11  ;;  %v5875_v30 = vld [vmem:[%s11991_s3 + $0x6d4] sm:$0xf0]  ;;  %v7170_v32 = vor.u32 %v8003_v24, %v7167_v25  ;;  %v7509_v35 = vld [vmem:[%s11991_s3 + $0x134] sm:$0xf]  ;;  %v5191_v36 = vld [vmem:[%s11991_s3 + $0x17c] sm:$0xf0] }
  0x32   :  { %3944 = vmatpush.bf16.msra.mxu1 %v6030_v14  ;;  %v5878_v34 = vor.u32 %v7680_v29, %v5875_v30  ;;  %v7661_v37 = vld [vmem:[%s11991_s3 + $0x5f4] sm:$0xf]  ;;  %v5799_v38 = vld [vmem:[%s11991_s3 + $0x63c] sm:$0xf0]  ;;  %v5194_v39 = vor.u32 %v7509_v35, %v5191_v36  ;;  %v7832_v41 = vld [vmem:[%s11991_s3 + $0xb4c] sm:$0xf] }
  0x33   :  { %3969 = vmatpush.bf16.msra.mxu3 %v7322_v8  ;;  %3957 = vmatpush.bf16.msra.mxu2 %v6638_v19  ;;  %v5802_v40 = vor.u32 %v7661_v37, %v5799_v38  ;;  %v6483_v42 = vld [vmem:[%s11991_s3 + $0xb94] sm:$0xf0]  ;;  %v7984_v43 = vld [vmem:[%s11991_s3 + $0x100c] sm:$0xf]  ;;  %v7490_v47 = vld [vmem:[%s11991_s3 + $0x9c] sm:$0xf] }
  0x34   :  { %v6486_v44 = vor.u32 %v7832_v41, %v6483_v42  ;;  %v7091_v45 = vld [vmem:[%s11991_s3 + $0x1054] sm:$0xf0]  ;;  %v5115_v48 = vld [vmem:[%s11991_s3 + $0xe4] sm:$0xf0]  ;;  %v7642_v50 = vld [vmem:[%s11991_s3 + $0x55c] sm:$0xf] }
  0x35   :  { %3932 = vmatpush.bf16.msra.mxu0 %v5346_v23  ;;  %v7094_v46 = vor.u32 %v7984_v43, %v7091_v45  ;;  %v5118_v49 = vor.u32 %v7490_v47, %v5115_v48  ;;  %v5723_v51 = vld [vmem:[%s11991_s3 + $0x5a4] sm:$0xf0]  ;;  %v7813_v53 = vld [vmem:[%s11991_s3 + $0xab4] sm:$0xf]  ;;  %v6407_v54 = vld [vmem:[%s11991_s3 + $0xafc] sm:$0xf0] }
  0x36   :  { %3945 = vmatpush.bf16.msra.mxu1 %v5954_v26  ;;  %v5726_v52 = vor.u32 %v7642_v50, %v5723_v51  ;;  %v7965_v55 = vld [vmem:[%s11991_s3 + $0xf74] sm:$0xf]  ;;  %v6410_v56 = vor.u32 %v7813_v53, %v6407_v54  ;;  %v7015_v57 = vld [vmem:[%s11991_s3 + $0xfbc] sm:$0xf0]  ;;  %v7471_v59 = vld [vmem:[%s11991_s3 + $0x4] sm:$0xf] }
  0x37   :  { %3970 = vmatpush.bf16.msra.mxu3 %v7246_v20  ;;  %3958 = vmatpush.bf16.msra.mxu2 %v6562_v31  ;;  %v7018_v58 = vor.u32 %v7965_v55, %v7015_v57  ;;  %v5039_v60 = vld [vmem:[%s11991_s3 + $0x4c] sm:$0xf0]  ;;  %v7623_v61 = vld [vmem:[%s11991_s3 + $0x4c4] sm:$0xf]  ;;  %v7794_v1 = vld [vmem:[%s11991_s3 + $0xa1c] sm:$0xf] }
  0x38   :  { %v5042_v62 = vor.u32 %v7471_v59, %v5039_v60  ;;  %v5647_v63 = vld [vmem:[%s11991_s3 + $0x50c] sm:$0xf0]  ;;  %v6331_v2 = vld [vmem:[%s11991_s3 + $0xa64] sm:$0xf0]  ;;  %v7946_v4 = vld [vmem:[%s11991_s3 + $0xedc] sm:$0xf] }
  0x39   :  { %3933 = vmatpush.bf16.msra.mxu0 %v5270_v33  ;;  %v5650_v0 = vor.u32 %v7623_v61, %v5647_v63  ;;  %v6334_v3 = vor.u32 %v7794_v1, %v6331_v2  ;;  %v6939_v5 = vld [vmem:[%s11991_s3 + $0xf24] sm:$0xf0]  ;;  %v7775_v7 = vld [vmem:[%s11991_s3 + $0x984] sm:$0xf]  ;;  %v6255_v8 = vld [vmem:[%s11991_s3 + $0x9cc] sm:$0xf0] }
  0x3a   :  { %3946 = vmatpush.bf16.msra.mxu1 %v5878_v34  ;;  %v6942_v6 = vor.u32 %v7946_v4, %v6939_v5  ;;  %v6258_v9 = vor.u32 %v7775_v7, %v6255_v8  ;;  %v7927_v10 = vld [vmem:[%s11991_s3 + $0xe44] sm:$0xf]  ;;  %v6863_v11 = vld [vmem:[%s11991_s3 + $0xe8c] sm:$0xf0]  ;;  %v27_v13 = vld [vmem:[%s11990_s2] sm:$0xf] }
  0x3b   :  { %3971 = vmatpush.bf16.msra.mxu3 %v7170_v32  ;;  %3959 = vmatpush.bf16.msra.mxu2 %v6486_v44  ;;  %v6866_v12 = vor.u32 %v7927_v10, %v6863_v11  ;;  %v29_v14 = vperm.slane %v27_v13, 0  ;;  %v30_v15 = vperm.slane %v27_v13, 1  ;;  %v5577_v19 = vld [vmem:[%s11991_s3 + $0x430] sm:$0xf]  ;;  %v7614_v20 = vld [vmem:[%s11991_s3 + $0x478] sm:$0xf0] }
  0x3c   :  { %v6185_v22 = vld [vmem:[%s11991_s3 + $0x8f0] sm:$0xf]  ;;  %v7766_v23 = vld [vmem:[%s11991_s3 + $0x938] sm:$0xf0]  ;;  %v31_v26 = vperm.slane %v27_v13, 2  ;;  %v5578_v27 = vor.u32 %v7614_v20, %v5577_v19  ;;  %v32_v29 = vperm.slane %v27_v13, 3 }
  0x3d   :  { %3934 = vmatpush.bf16.msra.mxu0 %v5194_v39  ;;  %v6186_v30 = vor.u32 %v7766_v23, %v6185_v22  ;;  %v5501_v31 = vld [vmem:[%s11991_s3 + $0x398] sm:$0xf]  ;;  %v7595_v32 = vld [vmem:[%s11991_s3 + $0x3e0] sm:$0xf0]  ;;  %v6793_v41 = vld [vmem:[%s11991_s3 + $0xdb0] sm:$0xf] }
  0x3e   :  { %3947 = vmatpush.bf16.msra.mxu1 %v5802_v40  ;;  %v6109_v34 = vld [vmem:[%s11991_s3 + $0x858] sm:$0xf]  ;;  %v7747_v35 = vld [vmem:[%s11991_s3 + $0x8a0] sm:$0xf0]  ;;  %v5502_v40 = vor.u32 %v7595_v32, %v5501_v31  ;;  %v7918_v42 = vld [vmem:[%s11991_s3 + $0xdf8] sm:$0xf0] }
  0x3f   :  { %3972 = vmatpush.bf16.msra.mxu3 %v7094_v46  ;;  %3960 = vmatpush.bf16.msra.mxu2 %v6410_v56  ;;  %v7401_v43 = vld [vmem:[%s11991_s3 + $0x1270] sm:$0xf]  ;;  %v6110_v46 = vor.u32 %v7747_v35, %v6109_v34  ;;  %v8070_v47 = vld [vmem:[%s11991_s3 + $0x12b8] sm:$0xf0]  ;;  %v5425_v48 = vld [vmem:[%s11991_s3 + $0x300] sm:$0xf]  ;;  %v6794_v54 = vor.u32 %v7918_v42, %v6793_v41 }
  0x40   :  { %v6033_v51 = vld [vmem:[%s11991_s3 + $0x7c0] sm:$0xf]  ;;  %v7402_v56 = vor.u32 %v8070_v47, %v7401_v43  ;;  %v7899_v59 = vld [vmem:[%s11991_s3 + $0xd60] sm:$0xf0]  ;;  %v7325_v60 = vld [vmem:[%s11991_s3 + $0x11d8] sm:$0xf] }
  0x41   :  { %3935 = vmatpush.bf16.msra.mxu0 %v5118_v49  ;;  %v7576_v49 = vld [vmem:[%s11991_s3 + $0x348] sm:$0xf0]  ;;  %v8051_v63 = vld [vmem:[%s11991_s3 + $0x1220] sm:$0xf0]  ;;  %v7557_v1 = vld [vmem:[%s11991_s3 + $0x2b0] sm:$0xf0] }
  0x42   :  { %3948 = vmatpush.bf16.msra.mxu1 %v5726_v52  ;;  %v7728_v52 = vld [vmem:[%s11991_s3 + $0x808] sm:$0xf0]  ;;  %v5426_v57 = vor.u32 %v7576_v49, %v5425_v48  ;;  %v5957_v2 = vld [vmem:[%s11991_s3 + $0x728] sm:$0xf]  ;;  %v7326_v7 = vor.u32 %v8051_v63, %v7325_v60  ;;  %v6489_v34 = vld [vmem:[%s11991_s3 + $0xb50] sm:$0xf] }
  0x43   :  { %3973 = vmatpush.bf16.msra.mxu3 %v7018_v58  ;;  %3961 = vmatpush.bf16.msra.mxu2 %v6334_v3  ;;  %v6717_v58 = vld [vmem:[%s11991_s3 + $0xd18] sm:$0xf]  ;;  %v7709_v3 = vld [vmem:[%s11991_s3 + $0x770] sm:$0xf0]  ;;  %v7880_v10 = vld [vmem:[%s11991_s3 + $0xcc8] sm:$0xf0] }
  0x44   :  { %v6718_v5 = vor.u32 %v7899_v59, %v6717_v58  ;;  %v5958_v11 = vor.u32 %v7709_v3, %v5957_v2  ;;  %v8032_v13 = vld [vmem:[%s11991_s3 + $0x1188] sm:$0xf0]  ;;  %v6565_v20 = vld [vmem:[%s11991_s3 + $0xbe8] sm:$0xf]  ;;  %v7842_v35 = vld [vmem:[%s11991_s3 + $0xb98] sm:$0xf0] }
  0x45   :  { %3936 = vmatpush.bf16.msra.mxu0 %v5042_v62  ;;  %v6034_v62 = vor.u32 %v7728_v52, %v6033_v51  ;;  %v7500_v41 = vld [vmem:[%s11991_s3 + $0xe8] sm:$0xf0]  ;;  %v5729_v42 = vld [vmem:[%s11991_s3 + $0x560] sm:$0xf]  ;;  %v7823_v47 = vld [vmem:[%s11991_s3 + $0xb00] sm:$0xf0] }
  0x46   :  { %3949 = vmatpush.bf16.msra.mxu1 %v5650_v0  ;;  %v5349_v0 = vld [vmem:[%s11991_s3 + $0x268] sm:$0xf]  ;;  %v7652_v43 = vld [vmem:[%s11991_s3 + $0x5a8] sm:$0xf0]  ;;  %v7021_v48 = vld [vmem:[%s11991_s3 + $0xf78] sm:$0xf] }
  0x47   :  { %3974 = vmatpush.bf16.msra.mxu3 %v6942_v6  ;;  %3962 = vmatpush.bf16.msra.mxu2 %v6258_v9  ;;  %v5350_v8 = vor.u32 %v7557_v1, %v5349_v0  ;;  %v6641_v9 = vld [vmem:[%s11991_s3 + $0xc80] sm:$0xf]  ;;  %v7975_v51 = vld [vmem:[%s11991_s3 + $0xfc0] sm:$0xf0]  ;;  %v5045_v52 = vld [vmem:[%s11991_s3 + $0x8] sm:$0xf] }
  0x48   :  { %v5579_v59 = vld [vmem:[%s11991_s3 + $0x47c] sm:$0xf0]  ;;  %v7757_v60 = vld [vmem:[%s11991_s3 + $0x8f4] sm:$0xf]  ;;  %v7022_v63 = vor.u32 %v7975_v51, %v7021_v48  ;;  %v7804_v1 = vld [vmem:[%s11991_s3 + $0xa68] sm:$0xf0] }
  0x49   :  { %v6337_v0 = vld [vmem:[%s11991_s3 + $0xa20] sm:$0xf]  ;;  %v7251_v51 = vld [vmem:[%s11991_s3 + $0x118c] sm:$0xf0]  ;;  %s5006_s28 = sshll.u32 %s11993_s5, 4  ;;  %vm4997_vm1 = vcmask 392192   ;;  %s5007_s28 = int_to_ptr.hbm [resolvable:$true] %s5006_s28 }
  0x4b   :  { %3975 = vmatpush.bf16.msra.mxu3 %v6866_v12  ;;  %v7249_v12 = vld [vmem:[%s11991_s3 + $0x1140] sm:$0xf] }
  0x4c   :  { %v7250_v19 = vor.u32 %v8032_v13, %v7249_v12  ;;  %v6111_v12 = vld [vmem:[%s11991_s3 + $0x8a4] sm:$0xf0] }
  0x84   :  { %v70_v16 = vpop.f32.mrf.mxu0 }
  0x85   :  { %v71_v17 = vadd.f32 %v70_v16, %v29_v14  ;;  %v83_v18 = vpop.f32.mrf.mxu1  ;;  %v5273_v14 = vld [vmem:[%s11991_s3 + $0x1d0] sm:$0xf] }
  0x86   :  { %v84_v21 = vadd.f32 %v83_v18, %v30_v15  ;;  %v7538_v15 = vld [vmem:[%s11991_s3 + $0x218] sm:$0xf0]  ;;  %v5881_v16 = vld [vmem:[%s11991_s3 + $0x690] sm:$0xf]  ;;  %v6642_v18 = vor.u32 %v7880_v10, %v6641_v9  ;;  %v6338_v9 = vor.u32 %v7804_v1, %v6337_v0  ;;  %v5503_v10 = vld [vmem:[%s11991_s3 + $0x3e4] sm:$0xf0] }
  0x87   :  { %v113_v24 = vmax.f32 %v71_v17, 0.0  ;;  %v7690_v17 = vld [vmem:[%s11991_s3 + $0x6d8] sm:$0xf0]  ;;  %v5274_v22 = vor.u32 %v7538_v15, %v5273_v14  ;;  %v6261_v14 = vld [vmem:[%s11991_s3 + $0x988] sm:$0xf] }
  0x88   :  { %v114_v25 = vmax.f32 %v84_v21, 0.0  ;;  %v7861_v21 = vld [vmem:[%s11991_s3 + $0xc30] sm:$0xf0]  ;;  %v5882_v23 = vor.u32 %v7690_v17, %v5881_v16  ;;  %v6869_v16 = vld [vmem:[%s11991_s3 + $0xe48] sm:$0xf] }
  0x89   :  { %v8607_v28 = vpack.c.bf16 %v113_v24, %v113_v24  ;;  %v7173_v24 = vld [vmem:[%s11991_s3 + $0x10a8] sm:$0xf]  ;;  %v6566_v31 = vor.u32 %v7861_v21, %v6565_v20  ;;  %v7785_v15 = vld [vmem:[%s11991_s3 + $0x9d0] sm:$0xf0]  ;;  %v8004_v0 = vld [vmem:[%s11991_s3 + $0x10ac] sm:$0xf] }
  0x8a   :  { %v8615_v33 = vpack.c.bf16 %v114_v25, %v114_v25  ;;  %v8013_v25 = vld [vmem:[%s11991_s3 + $0x10f0] sm:$0xf0]  ;;  %v7175_v1 = vld [vmem:[%s11991_s3 + $0x10f4] sm:$0xf0] }
  0x8b   :  { %v96_v36 = vpop.f32.mrf.mxu2  ;;  %3885 = vmatmul.bf16.vlgmr.msrb.gmra.mxu0 %v8607_v28  ;;  %v7174_v32 = vor.u32 %v8013_v25, %v7173_v24  ;;  %v7937_v17 = vld [vmem:[%s11991_s3 + $0xe90] sm:$0xf0]  ;;  %v7567_v24 = vld [vmem:[%s11991_s3 + $0x304] sm:$0xf]  ;;  %v6262_v25 = vor.u32 %v7785_v15, %v6261_v14  ;;  %v5123_v15 = vld [vmem:[%s11991_s3 + $0xec] sm:$0xf0] }
  0x8c   :  { %v97_v37 = vadd.f32 %v96_v36, %v31_v26  ;;  %v109_v38 = vpop.f32.mrf.mxu3  ;;  %3898 = vmatmul.bf16.vlgmr.msrb.gmra.mxu1 %v8615_v33  ;;  %3981 = vmatpush.bf16.msrb.mxu0 %v5578_v27  ;;  %v72_v39 = vpop.f32.mrf.mxu0  ;;  %v5197_v26 = vld [vmem:[%s11991_s3 + $0x138] sm:$0xf]  ;;  %v7519_v27 = vld [vmem:[%s11991_s3 + $0x180] sm:$0xf0] }
  0x8d   :  { %v110_v44 = vadd.f32 %v109_v38, %v32_v29  ;;  %3994 = vmatpush.bf16.msrb.mxu1 %v6186_v30  ;;  %v85_v45 = vpop.f32.mrf.mxu1  ;;  %v5805_v29 = vld [vmem:[%s11991_s3 + $0x5f8] sm:$0xf]  ;;  %v7671_v30 = vld [vmem:[%s11991_s3 + $0x640] sm:$0xf0]  ;;  %v5198_v36 = vor.u32 %v7519_v27, %v5197_v26  ;;  %v7097_v38 = vld [vmem:[%s11991_s3 + $0x1010] sm:$0xf] }
  0x8e   :  { %v115_v50 = vmax.f32 %v97_v37, 0.0  ;;  %v5806_v37 = vor.u32 %v7671_v30, %v5805_v29  ;;  %v7994_v39 = vld [vmem:[%s11991_s3 + $0x1058] sm:$0xf0]  ;;  %v5427_v26 = vld [vmem:[%s11991_s3 + $0x34c] sm:$0xf0]  ;;  %v6870_v30 = vor.u32 %v7937_v17, %v6869_v16 }
  0x8f   :  { %v116_v53 = vmax.f32 %v110_v44, 0.0  ;;  %v6490_v44 = vor.u32 %v7842_v35, %v6489_v34  ;;  %v7098_v45 = vor.u32 %v7994_v39, %v7097_v38  ;;  %v7719_v27 = vld [vmem:[%s11991_s3 + $0x7c4] sm:$0xf]  ;;  %v6035_v29 = vld [vmem:[%s11991_s3 + $0x80c] sm:$0xf0] }
  0x90   :  { %v8649_v55 = vpack.c.bf16 %v115_v50, %v115_v50  ;;  %3982 = vmatpush.bf16.msrb.mxu0 %v5502_v40  ;;  %v5121_v40 = vld [vmem:[%s11991_s3 + $0xa0] sm:$0xf]  ;;  %v5730_v50 = vor.u32 %v7652_v43, %v5729_v42  ;;  %v7890_v34 = vld [vmem:[%s11991_s3 + $0xd1c] sm:$0xf]  ;;  %v6719_v35 = vld [vmem:[%s11991_s3 + $0xd64] sm:$0xf0] }
  0x91   :  { %v8660_v61 = vpack.c.bf16 %v116_v53, %v116_v53  ;;  %3995 = vmatpush.bf16.msrb.mxu1 %v6110_v46  ;;  %v6413_v46 = vld [vmem:[%s11991_s3 + $0xab8] sm:$0xf]  ;;  %v5122_v49 = vor.u32 %v7500_v41, %v5121_v40  ;;  %v7481_v53 = vld [vmem:[%s11991_s3 + $0x50] sm:$0xf0]  ;;  %v8042_v38 = vld [vmem:[%s11991_s3 + $0x11dc] sm:$0xf] }
  0x92   :  { %3911 = vmatmul.bf16.vlgmr.msrb.gmra.mxu2 %v8649_v55  ;;  %v6414_v58 = vor.u32 %v7823_v47, %v6413_v46  ;;  %v5046_v2 = vor.u32 %v7481_v53, %v5045_v52  ;;  %v7327_v39 = vld [vmem:[%s11991_s3 + $0x1224] sm:$0xf0]  ;;  %v7548_v40 = vld [vmem:[%s11991_s3 + $0x26c] sm:$0xf]  ;;  %v5351_v41 = vld [vmem:[%s11991_s3 + $0x2b4] sm:$0xf0] }
  0x93   :  { %3924 = vmatmul.bf16.vlgmr.msrb.gmra.mxu3 %v8660_v61  ;;  %4007 = vmatpush.bf16.msrb.mxu2 %v6794_v54  ;;  %v98_v4 = vpop.f32.mrf.mxu2  ;;  %v5653_v54 = vld [vmem:[%s11991_s3 + $0x4c8] sm:$0xf]  ;;  %v7700_v42 = vld [vmem:[%s11991_s3 + $0x72c] sm:$0xf]  ;;  %v5959_v43 = vld [vmem:[%s11991_s3 + $0x774] sm:$0xf0]  ;;  %v5354_v48 = vor.u32 %v7548_v40, %v5351_v41 }
  0x94   :  { %4020 = vmatpush.bf16.msrb.mxu3 %v7402_v56  ;;  %v111_v6 = vpop.f32.mrf.mxu3  ;;  %3983 = vmatpush.bf16.msrb.mxu0 %v5426_v57  ;;  %v7633_v56 = vld [vmem:[%s11991_s3 + $0x510] sm:$0xf0]  ;;  %v6945_v4 = vld [vmem:[%s11991_s3 + $0xee0] sm:$0xf]  ;;  %v7871_v46 = vld [vmem:[%s11991_s3 + $0xc84] sm:$0xf] }
  0x95   :  { %3996 = vmatpush.bf16.msrb.mxu1 %v6034_v62  ;;  %v7605_v57 = vld [vmem:[%s11991_s3 + $0x434] sm:$0xf]  ;;  %v6187_v62 = vld [vmem:[%s11991_s3 + $0x93c] sm:$0xf0]  ;;  %v5654_v3 = vor.u32 %v7633_v56, %v5653_v54  ;;  %v6643_v47 = vld [vmem:[%s11991_s3 + $0xccc] sm:$0xf0] }
  0x96   :  { %v5582_v6 = vor.u32 %v7605_v57, %v5579_v59  ;;  %v7529_v52 = vld [vmem:[%s11991_s3 + $0x1d4] sm:$0xf]  ;;  %v5275_v53 = vld [vmem:[%s11991_s3 + $0x21c] sm:$0xf0]  ;;  %v6646_v57 = vor.u32 %v7871_v46, %v6643_v47  ;;  %v7852_v59 = vld [vmem:[%s11991_s3 + $0xbec] sm:$0xf] }
  0x97   :  { %4008 = vmatpush.bf16.msrb.mxu2 %v6718_v5  ;;  %v7956_v5 = vld [vmem:[%s11991_s3 + $0xf28] sm:$0xf0]  ;;  %v7681_v54 = vld [vmem:[%s11991_s3 + $0x694] sm:$0xf]  ;;  %v5883_v56 = vld [vmem:[%s11991_s3 + $0x6dc] sm:$0xf0] }
  0x98   :  { %4021 = vmatpush.bf16.msrb.mxu3 %v7326_v7  ;;  %3984 = vmatpush.bf16.msrb.mxu0 %v5350_v8  ;;  %v6190_v7 = vor.u32 %v7757_v60, %v6187_v62  ;;  %v7586_v8 = vld [vmem:[%s11991_s3 + $0x39c] sm:$0xf]  ;;  %v6946_v13 = vor.u32 %v7956_v5, %v6945_v4  ;;  %v6567_v60 = vld [vmem:[%s11991_s3 + $0xc34] sm:$0xf0]  ;;  %v5278_v62 = vor.u32 %v7529_v52, %v5275_v53  ;;  %v5807_v5 = vld [vmem:[%s11991_s3 + $0x644] sm:$0xf0] }
  0x99   :  { %3997 = vmatpush.bf16.msrb.mxu1 %v5958_v11  ;;  %v7738_v11 = vld [vmem:[%s11991_s3 + $0x85c] sm:$0xf]  ;;  %v5506_v20 = vor.u32 %v7586_v8, %v5503_v10  ;;  %v7833_v8 = vld [vmem:[%s11991_s3 + $0xb54] sm:$0xf]  ;;  %v7491_v14 = vld [vmem:[%s11991_s3 + $0xa4] sm:$0xf] }
  0x9a   :  { %v6114_v21 = vor.u32 %v7738_v11, %v6111_v12  ;;  %v7662_v4 = vld [vmem:[%s11991_s3 + $0x5fc] sm:$0xf]  ;;  %v7985_v12 = vld [vmem:[%s11991_s3 + $0x1014] sm:$0xf]  ;;  %v7643_v16 = vld [vmem:[%s11991_s3 + $0x564] sm:$0xf] }
  0x9b   :  { %4009 = vmatpush.bf16.msrb.mxu2 %v6642_v18  ;;  %3937 = vmatmul.bf16.vlgmr.msra.gmra.mxu0 %v8607_v28  ;;  %v7909_v18 = vld [vmem:[%s11991_s3 + $0xdb4] sm:$0xf]  ;;  %v5810_v11 = vor.u32 %v7662_v4, %v5807_v5  ;;  %v5731_v17 = vld [vmem:[%s11991_s3 + $0x5ac] sm:$0xf0]  ;;  %v5509_v46 = vld [vmem:[%s11991_s3 + $0x3a0] sm:$0xf] }
  0x9c   :  { %4022 = vmatpush.bf16.msrb.mxu3 %v7250_v19  ;;  %3950 = vmatmul.bf16.vlgmr.msra.gmra.mxu1 %v8615_v33  ;;  %v6795_v19 = vld [vmem:[%s11991_s3 + $0xdfc] sm:$0xf0]  ;;  %v7776_v52 = vld [vmem:[%s11991_s3 + $0x98c] sm:$0xf]  ;;  %v6263_v53 = vld [vmem:[%s11991_s3 + $0x9d4] sm:$0xf0] }
  0x9d   :  { %3985 = vmatpush.bf16.msrb.mxu0 %v5274_v22  ;;  %3998 = vmatpush.bf16.msrb.mxu1 %v5882_v23  ;;  %v8061_v22 = vld [vmem:[%s11991_s3 + $0x1274] sm:$0xf]  ;;  %v7403_v23 = vld [vmem:[%s11991_s3 + $0x12bc] sm:$0xf0]  ;;  %v6041_v5 = vld [vmem:[%s11991_s3 + $0x7c8] sm:$0xf] }
  0x9f   :  { %4010 = vmatpush.bf16.msrb.mxu2 %v6566_v31  ;;  %v6798_v31 = vor.u32 %v7909_v18, %v6795_v19 }
  0xa0   :  { %4023 = vmatpush.bf16.msrb.mxu3 %v7174_v32  ;;  %v7406_v32 = vor.u32 %v8061_v22, %v7403_v23  ;;  %v7966_v22 = vld [vmem:[%s11991_s3 + $0xf7c] sm:$0xf]  ;;  %v5126_v23 = vor.u32 %v7491_v14, %v5123_v15  ;;  %v5357_v14 = vld [vmem:[%s11991_s3 + $0x270] sm:$0xf] }
  0xa1   :  { %3986 = vmatpush.bf16.msrb.mxu0 %v5198_v36  ;;  %3999 = vmatpush.bf16.msrb.mxu1 %v5806_v37  ;;  %v5430_v36 = vor.u32 %v7567_v24, %v5427_v26  ;;  %v6038_v37 = vor.u32 %v7719_v27, %v6035_v29  ;;  %v5734_v24 = vor.u32 %v7643_v16, %v5731_v17  ;;  %v7472_v26 = vld [vmem:[%s11991_s3 + $0xc] sm:$0xf]  ;;  %v5047_v27 = vld [vmem:[%s11991_s3 + $0x54] sm:$0xf0]  ;;  %v7558_v15 = vld [vmem:[%s11991_s3 + $0x2b8] sm:$0xf0] }
  0xa2   :  { %3963 = vmatmul.bf16.vlgmr.msra.gmra.mxu2 %v8649_v55  ;;  %v7624_v29 = vld [vmem:[%s11991_s3 + $0x4cc] sm:$0xf]  ;;  %v5050_v40 = vor.u32 %v7472_v26, %v5047_v27  ;;  %v5965_v17 = vld [vmem:[%s11991_s3 + $0x730] sm:$0xf]  ;;  %v5281_v26 = vld [vmem:[%s11991_s3 + $0x1d8] sm:$0xf] }
  0xa3   :  { %3976 = vmatmul.bf16.vlgmr.msra.gmra.mxu3 %v8660_v61  ;;  %4011 = vmatpush.bf16.msrb.mxu2 %v6490_v44  ;;  %v6722_v44 = vor.u32 %v7890_v34, %v6719_v35  ;;  %v7615_v34 = vld [vmem:[%s11991_s3 + $0x480] sm:$0xf0]  ;;  %v6193_v35 = vld [vmem:[%s11991_s3 + $0x8f8] sm:$0xf] }
  0xa4   :  { %4024 = vmatpush.bf16.msrb.mxu3 %v7098_v45  ;;  %v7330_v45 = vor.u32 %v8042_v38, %v7327_v39  ;;  %v7795_v38 = vld [vmem:[%s11991_s3 + $0xa24] sm:$0xf]  ;;  %v6339_v39 = vld [vmem:[%s11991_s3 + $0xa6c] sm:$0xf0] }
  0xa5   :  { %3987 = vmatpush.bf16.msrb.mxu0 %v5122_v49  ;;  %4000 = vmatpush.bf16.msrb.mxu1 %v5730_v50  ;;  %v5962_v49 = vor.u32 %v7700_v42, %v5959_v43  ;;  %v8023_v50 = vld [vmem:[%s11991_s3 + $0x1144] sm:$0xf]  ;;  %v6947_v43 = vld [vmem:[%s11991_s3 + $0xf2c] sm:$0xf0]  ;;  %v6342_v47 = vor.u32 %v7795_v38, %v6339_v39  ;;  %v8014_v38 = vld [vmem:[%s11991_s3 + $0x10f8] sm:$0xf0] }
  0xa6   :  { %v7947_v42 = vld [vmem:[%s11991_s3 + $0xee4] sm:$0xf] }
  0xa7   :  { %4012 = vmatpush.bf16.msrb.mxu2 %v6414_v58  ;;  %v7254_v58 = vor.u32 %v8023_v50, %v7251_v51  ;;  %v7748_v50 = vld [vmem:[%s11991_s3 + $0x8a8] sm:$0xf0]  ;;  %v6950_v51 = vor.u32 %v7947_v42, %v6947_v43  ;;  %v7539_v27 = vld [vmem:[%s11991_s3 + $0x220] sm:$0xf0]  ;;  %v5813_v43 = vld [vmem:[%s11991_s3 + $0x600] sm:$0xf] }
  0xa8   :  { %4025 = vmatpush.bf16.msrb.mxu3 %v7022_v63  ;;  %v5886_v63 = vor.u32 %v7681_v54, %v5883_v56  ;;  %v7928_v54 = vld [vmem:[%s11991_s3 + $0xe4c] sm:$0xf]  ;;  %v6871_v56 = vld [vmem:[%s11991_s3 + $0xe94] sm:$0xf0] }
  0xa9   :  { %3988 = vmatpush.bf16.msrb.mxu0 %v5046_v2  ;;  %4001 = vmatpush.bf16.msrb.mxu1 %v5654_v3  ;;  %v7510_v2 = vld [vmem:[%s11991_s3 + $0x13c] sm:$0xf]  ;;  %v5199_v3 = vld [vmem:[%s11991_s3 + $0x184] sm:$0xf0] }
  0xaa   :  { %v5202_v10 = vor.u32 %v7510_v2, %v5199_v3  ;;  %v7577_v2 = vld [vmem:[%s11991_s3 + $0x350] sm:$0xf0]  ;;  %v6874_v3 = vor.u32 %v7928_v54, %v6871_v56  ;;  %v5737_v56 = vld [vmem:[%s11991_s3 + $0x568] sm:$0xf] }
  0xab   :  { %4013 = vmatpush.bf16.msrb.mxu2 %v6338_v9  ;;  %v6491_v9 = vld [vmem:[%s11991_s3 + $0xb9c] sm:$0xf0] }
  0xac   :  { %4026 = vmatpush.bf16.msrb.mxu3 %v6946_v13  ;;  %3989 = vmatmul.bf16.vlgmr.msrb.gmra.mxu0 %v8607_v28  ;;  %v7099_v13 = vld [vmem:[%s11991_s3 + $0x105c] sm:$0xf0]  ;;  %v6494_v18 = vor.u32 %v7833_v8, %v6491_v9  ;;  %v7900_v9 = vld [vmem:[%s11991_s3 + $0xd68] sm:$0xf0] }
  0xad   :  { %4033 = vmatpush.bf16.msra.mxu0 %v5582_v6  ;;  %4046 = vmatpush.bf16.msra.mxu1 %v6190_v7  ;;  %v6570_v6 = vor.u32 %v7852_v59, %v6567_v60  ;;  %v7178_v7 = vor.u32 %v8004_v0, %v7175_v1  ;;  %v7102_v19 = vor.u32 %v7985_v12, %v7099_v13  ;;  %v5433_v1 = vld [vmem:[%s11991_s3 + $0x308] sm:$0xf]  ;;  %v6725_v8 = vld [vmem:[%s11991_s3 + $0xd20] sm:$0xf]  ;;  %v8052_v12 = vld [vmem:[%s11991_s3 + $0x1228] sm:$0xf0] }
  0xae   :  { %4002 = vmatmul.bf16.vlgmr.msrb.gmra.mxu1 %v8615_v33  ;;  %v6266_v0 = vor.u32 %v7776_v52, %v6263_v53  ;;  %v6726_v16 = vor.u32 %v7900_v9, %v6725_v8  ;;  %v5129_v52 = vld [vmem:[%s11991_s3 + $0xa8] sm:$0xf]  ;;  %v7501_v53 = vld [vmem:[%s11991_s3 + $0xf0] sm:$0xf0]  ;;  %v7758_v9 = vld [vmem:[%s11991_s3 + $0x8fc] sm:$0xf] }
  0xaf   :  { %4014 = vmatpush.bf16.msrb.mxu2 %v6262_v25  ;;  %v7023_v25 = vld [vmem:[%s11991_s3 + $0xfc4] sm:$0xf0] }
  0xb0   :  { %4027 = vmatpush.bf16.msrb.mxu3 %v6870_v30  ;;  %v5655_v30 = vld [vmem:[%s11991_s3 + $0x514] sm:$0xf0]  ;;  %v5587_v8 = vld [vmem:[%s11991_s3 + $0x484] sm:$0xf0] }
  0xb1   :  { %4034 = vmatpush.bf16.msra.mxu0 %v5506_v20  ;;  %4047 = vmatpush.bf16.msra.mxu1 %v6114_v21  ;;  %v7814_v20 = vld [vmem:[%s11991_s3 + $0xabc] sm:$0xf]  ;;  %v6415_v21 = vld [vmem:[%s11991_s3 + $0xb04] sm:$0xf0]  ;;  %v5658_v41 = vor.u32 %v7624_v29, %v5655_v30  ;;  %v5889_v30 = vld [vmem:[%s11991_s3 + $0x698] sm:$0xf] }
  0xb2   :  { %4015 = vmatmul.bf16.vlgmr.msrb.gmra.mxu2 %v8649_v55 }
  0xb3   :  { %4059 = vmatpush.bf16.msra.mxu2 %v6798_v31  ;;  %4028 = vmatmul.bf16.vlgmr.msrb.gmra.mxu3 %v8660_v61  ;;  %v5585_v31 = vld [vmem:[%s11991_s3 + $0x438] sm:$0xf] }
  0xb4   :  { %4072 = vmatpush.bf16.msra.mxu3 %v7406_v32  ;;  %v6418_v32 = vor.u32 %v7814_v20, %v6415_v21  ;;  %v6649_v20 = vld [vmem:[%s11991_s3 + $0xc88] sm:$0xf]  ;;  %v7881_v21 = vld [vmem:[%s11991_s3 + $0xcd0] sm:$0xf0] }
  0xb5   :  { %4035 = vmatpush.bf16.msra.mxu0 %v5430_v36  ;;  %4048 = vmatpush.bf16.msra.mxu1 %v6038_v37  ;;  %v7767_v36 = vld [vmem:[%s11991_s3 + $0x940] sm:$0xf0]  ;;  %v7026_v37 = vor.u32 %v7966_v22, %v7023_v25  ;;  %v5358_v22 = vor.u32 %v7558_v15, %v5357_v14  ;;  %v6650_v29 = vor.u32 %v7881_v21, %v6649_v20  ;;  %v6953_v15 = vld [vmem:[%s11991_s3 + $0xee8] sm:$0xf] }
  0xb7   :  { %4060 = vmatpush.bf16.msra.mxu2 %v6722_v44  ;;  %v5586_v44 = vor.u32 %v7615_v34, %v5585_v31  ;;  %v7691_v31 = vld [vmem:[%s11991_s3 + $0x6e0] sm:$0xf0]  ;;  %v6573_v34 = vld [vmem:[%s11991_s3 + $0xbf0] sm:$0xf] }
  0xb8   :  { %4073 = vmatpush.bf16.msra.mxu3 %v7330_v45  ;;  %v6194_v45 = vor.u32 %v7767_v36, %v6193_v35  ;;  %v7862_v35 = vld [vmem:[%s11991_s3 + $0xc38] sm:$0xf0]  ;;  %v5282_v36 = vor.u32 %v7539_v27, %v5281_v26  ;;  %v5890_v39 = vor.u32 %v7691_v31, %v5889_v30  ;;  %v6269_v26 = vld [vmem:[%s11991_s3 + $0x990] sm:$0xf] }
  0xb9   :  { %4036 = vmatpush.bf16.msra.mxu0 %v5354_v48  ;;  %4049 = vmatpush.bf16.msra.mxu1 %v5962_v49  ;;  %v7596_v48 = vld [vmem:[%s11991_s3 + $0x3e8] sm:$0xf0]  ;;  %v6117_v49 = vld [vmem:[%s11991_s3 + $0x860] sm:$0xf]  ;;  %v6574_v42 = vor.u32 %v7862_v35, %v6573_v34  ;;  %v7786_v27 = vld [vmem:[%s11991_s3 + $0x9d8] sm:$0xf0] }
  0xba   :  { %v5510_v59 = vor.u32 %v7596_v48, %v5509_v46  ;;  %v6118_v60 = vor.u32 %v7748_v50, %v6117_v49  ;;  %v6497_v46 = vld [vmem:[%s11991_s3 + $0xb58] sm:$0xf]  ;;  %v7995_v50 = vld [vmem:[%s11991_s3 + $0x1060] sm:$0xf0]  ;;  %v7938_v30 = vld [vmem:[%s11991_s3 + $0xe98] sm:$0xf0] }
  0xbb   :  { %4061 = vmatpush.bf16.msra.mxu2 %v6646_v57  ;;  %v6801_v57 = vld [vmem:[%s11991_s3 + $0xdb8] sm:$0xf]  ;;  %v7910_v31 = vld [vmem:[%s11991_s3 + $0xdbc] sm:$0xf] }
  0xbc   :  { %4074 = vmatpush.bf16.msra.mxu3 %v7254_v58  ;;  %v7919_v58 = vld [vmem:[%s11991_s3 + $0xe00] sm:$0xf0]  ;;  %v7105_v49 = vld [vmem:[%s11991_s3 + $0x1018] sm:$0xf]  ;;  %v8062_v35 = vld [vmem:[%s11991_s3 + $0x127c] sm:$0xf] }
  0xbd   :  { %4037 = vmatpush.bf16.msra.mxu0 %v5278_v62  ;;  %4050 = vmatpush.bf16.msra.mxu1 %v5886_v63  ;;  %v7409_v62 = vld [vmem:[%s11991_s3 + $0x1278] sm:$0xf]  ;;  %v8071_v63 = vld [vmem:[%s11991_s3 + $0x12c0] sm:$0xf0]  ;;  %v6802_v4 = vor.u32 %v7919_v58, %v6801_v57  ;;  %v7653_v57 = vld [vmem:[%s11991_s3 + $0x5b0] sm:$0xf0]  ;;  %v7106_v58 = vor.u32 %v7995_v50, %v7105_v49 }
  0xbe   :  { %v8043_v49 = vld [vmem:[%s11991_s3 + $0x11e4] sm:$0xf]  ;;  %v7335_v50 = vld [vmem:[%s11991_s3 + $0x122c] sm:$0xf0] }
  0xbf   :  { %4062 = vmatpush.bf16.msra.mxu2 %v6570_v6  ;;  %v7729_v6 = vld [vmem:[%s11991_s3 + $0x810] sm:$0xf0] }
  0xc0   :  { %4075 = vmatpush.bf16.msra.mxu3 %v7178_v7  ;;  %v7410_v7 = vor.u32 %v8071_v63, %v7409_v62  ;;  %v6042_v13 = vor.u32 %v7729_v6, %v6041_v5  ;;  %v5130_v62 = vor.u32 %v7501_v53, %v5129_v52  ;;  %v7029_v63 = vld [vmem:[%s11991_s3 + $0xf80] sm:$0xf]  ;;  %v7634_v5 = vld [vmem:[%s11991_s3 + $0x518] sm:$0xf0]  ;;  %v7549_v52 = vld [vmem:[%s11991_s3 + $0x274] sm:$0xf] }
  0xc1   :  { %4038 = vmatpush.bf16.msra.mxu0 %v5202_v10  ;;  %4051 = vmatpush.bf16.msra.mxu1 %v5810_v11  ;;  %v5434_v10 = vor.u32 %v7577_v2, %v5433_v1  ;;  %v7333_v11 = vld [vmem:[%s11991_s3 + $0x11e0] sm:$0xf]  ;;  %v5053_v1 = vld [vmem:[%s11991_s3 + $0x10] sm:$0xf]  ;;  %v5738_v2 = vor.u32 %v7653_v57, %v5737_v56  ;;  %v7701_v56 = vld [vmem:[%s11991_s3 + $0x734] sm:$0xf] }
  0xc2   :  { %v5359_v53 = vld [vmem:[%s11991_s3 + $0x2bc] sm:$0xf0] }
  0xc3   :  { %4063 = vmatpush.bf16.msra.mxu2 %v6494_v18  ;;  %v7710_v18 = vld [vmem:[%s11991_s3 + $0x778] sm:$0xf0]  ;;  %v5967_v57 = vld [vmem:[%s11991_s3 + $0x77c] sm:$0xf0] }
  0xc4   :  { %4076 = vmatpush.bf16.msra.mxu3 %v7102_v19  ;;  %v7334_v19 = vor.u32 %v8052_v12, %v7333_v11  ;;  %v5966_v25 = vor.u32 %v7710_v18, %v5965_v17  ;;  %v6195_v11 = vld [vmem:[%s11991_s3 + $0x944] sm:$0xf0] }
  0xc5   :  { %4039 = vmatpush.bf16.msra.mxu0 %v5126_v23  ;;  %4052 = vmatpush.bf16.msra.mxu1 %v5734_v24  ;;  %v7257_v23 = vld [vmem:[%s11991_s3 + $0x1148] sm:$0xf]  ;;  %v8033_v24 = vld [vmem:[%s11991_s3 + $0x1190] sm:$0xf0]  ;;  %v6198_v20 = vor.u32 %v7758_v9, %v6195_v11  ;;  %v6575_v9 = vld [vmem:[%s11991_s3 + $0xc3c] sm:$0xf0] }
  0xc6   :  { %v6345_v12 = vld [vmem:[%s11991_s3 + $0xa28] sm:$0xf]  ;;  %v8005_v11 = vld [vmem:[%s11991_s3 + $0x10b4] sm:$0xf] }
  0xc7   :  { %4064 = vmatpush.bf16.msra.mxu2 %v6418_v32  ;;  %v7258_v32 = vor.u32 %v8033_v24, %v7257_v23  ;;  %v7739_v23 = vld [vmem:[%s11991_s3 + $0x864] sm:$0xf]  ;;  %v6119_v24 = vld [vmem:[%s11991_s3 + $0x8ac] sm:$0xf0] }
  0xc8   :  { %4077 = vmatpush.bf16.msra.mxu3 %v7026_v37  ;;  %v7181_v37 = vld [vmem:[%s11991_s3 + $0x10b0] sm:$0xf] }
  0xc9   :  { %4040 = vmatpush.bf16.msra.mxu0 %v5050_v40  ;;  %4053 = vmatpush.bf16.msra.mxu1 %v5658_v41  ;;  %v5205_v40 = vld [vmem:[%s11991_s3 + $0x140] sm:$0xf]  ;;  %v7520_v41 = vld [vmem:[%s11991_s3 + $0x188] sm:$0xf0] }
  0xca   :  { %v5206_v48 = vor.u32 %v7520_v41, %v5205_v40  ;;  %v5435_v40 = vld [vmem:[%s11991_s3 + $0x354] sm:$0xf0] }
  0xcb   :  { %4065 = vmatpush.bf16.msra.mxu2 %v6342_v47  ;;  %v7843_v47 = vld [vmem:[%s11991_s3 + $0xba0] sm:$0xf0] }
  0xcc   :  { %4078 = vmatpush.bf16.msra.mxu3 %v6950_v51  ;;  %4041 = vmatmul.bf16.vlgmr.msra.gmra.mxu0 %v8607_v28  ;;  %v6498_v54 = vor.u32 %v7843_v47, %v6497_v46  ;;  %v7891_v46 = vld [vmem:[%s11991_s3 + $0xd24] sm:$0xf]  ;;  %v6727_v47 = vld [vmem:[%s11991_s3 + $0xd6c] sm:$0xf0] }
  0xcd   :  { %4085 = vmatpush.bf16.msrb.mxu0 %v5586_v44  ;;  %4098 = vmatpush.bf16.msrb.mxu1 %v6194_v45  ;;  %v7672_v44 = vld [vmem:[%s11991_s3 + $0x648] sm:$0xf0]  ;;  %v7182_v45 = vor.u32 %v8014_v38, %v7181_v37  ;;  %v6122_v37 = vor.u32 %v7739_v23, %v6119_v24  ;;  %v6270_v38 = vor.u32 %v7786_v27, %v6269_v26  ;;  %v7986_v23 = vld [vmem:[%s11991_s3 + $0x101c] sm:$0xf]  ;;  %v7107_v24 = vld [vmem:[%s11991_s3 + $0x1064] sm:$0xf0] }
  0xce   :  { %4054 = vmatmul.bf16.vlgmr.msra.gmra.mxu1 %v8615_v33  ;;  %v5814_v51 = vor.u32 %v7672_v44, %v5813_v43  ;;  %v7720_v43 = vld [vmem:[%s11991_s3 + $0x7cc] sm:$0xf]  ;;  %v6043_v44 = vld [vmem:[%s11991_s3 + $0x814] sm:$0xf0] }
  0xcf   :  { %4066 = vmatpush.bf16.msra.mxu2 %v6266_v0  ;;  %v7976_v0 = vld [vmem:[%s11991_s3 + $0xfc8] sm:$0xf0]  ;;  %v5131_v27 = vld [vmem:[%s11991_s3 + $0xf4] sm:$0xf0] }
  0xd0   :  { %4079 = vmatpush.bf16.msra.mxu3 %v6874_v3  ;;  %v7482_v3 = vld [vmem:[%s11991_s3 + $0x58] sm:$0xf0]  ;;  %v7492_v26 = vld [vmem:[%s11991_s3 + $0xac] sm:$0xf] }
  0xd1   :  { %4086 = vmatpush.bf16.msrb.mxu0 %v5510_v59  ;;  %4099 = vmatpush.bf16.msrb.mxu1 %v6118_v60  ;;  %v6421_v59 = vld [vmem:[%s11991_s3 + $0xac0] sm:$0xf]  ;;  %v7824_v60 = vld [vmem:[%s11991_s3 + $0xb08] sm:$0xf0]  ;;  %v5054_v14 = vor.u32 %v7482_v3, %v5053_v1  ;;  %v5970_v1 = vor.u32 %v7701_v56, %v5967_v57  ;;  %v5283_v3 = vld [vmem:[%s11991_s3 + $0x224] sm:$0xf0] }
  0xd2   :  { %4067 = vmatmul.bf16.vlgmr.msra.gmra.mxu2 %v8649_v55  ;;  %v6422_v6 = vor.u32 %v7824_v60, %v6421_v59  ;;  %v7872_v59 = vld [vmem:[%s11991_s3 + $0xc8c] sm:$0xf]  ;;  %v6651_v60 = vld [vmem:[%s11991_s3 + $0xcd4] sm:$0xf0] }
  0xd3   :  { %4111 = vmatpush.bf16.msrb.mxu2 %v6802_v4  ;;  %4080 = vmatmul.bf16.vlgmr.msra.gmra.mxu3 %v8660_v61  ;;  %v5661_v4 = vld [vmem:[%s11991_s3 + $0x4d0] sm:$0xf] }
  0xd4   :  { %4124 = vmatpush.bf16.msrb.mxu3 %v7410_v7  ;;  %v7606_v7 = vld [vmem:[%s11991_s3 + $0x43c] sm:$0xf]  ;;  %v5662_v17 = vor.u32 %v7634_v5, %v5661_v4  ;;  %v6654_v4 = vor.u32 %v7872_v59, %v6651_v60 }
  0xd5   :  { %4087 = vmatpush.bf16.msrb.mxu0 %v5434_v10  ;;  %4100 = vmatpush.bf16.msrb.mxu1 %v6042_v13  ;;  %v7030_v10 = vor.u32 %v7976_v0, %v7029_v63  ;;  %v7805_v13 = vld [vmem:[%s11991_s3 + $0xa70] sm:$0xf0]  ;;  %v5590_v18 = vor.u32 %v7606_v7, %v5587_v8  ;;  %v8024_v63 = vld [vmem:[%s11991_s3 + $0x114c] sm:$0xf]  ;;  %v7259_v0 = vld [vmem:[%s11991_s3 + $0x1194] sm:$0xf0] }
  0xd6   :  { %v6346_v21 = vor.u32 %v7805_v13, %v6345_v12  ;;  %v7682_v5 = vld [vmem:[%s11991_s3 + $0x69c] sm:$0xf]  ;;  %v7262_v7 = vor.u32 %v8024_v63, %v7259_v0  ;;  %v7853_v8 = vld [vmem:[%s11991_s3 + $0xbf4] sm:$0xf]  ;;  %v7183_v12 = vld [vmem:[%s11991_s3 + $0x10fc] sm:$0xf0] }
  0xd7   :  { %4112 = vmatpush.bf16.msrb.mxu2 %v6726_v16  ;;  %v7957_v16 = vld [vmem:[%s11991_s3 + $0xf30] sm:$0xf0]  ;;  %v6125_v63 = vld [vmem:[%s11991_s3 + $0x868] sm:$0xf] }
  0xd8   :  { %4125 = vmatpush.bf16.msrb.mxu3 %v7334_v19  ;;  %v7587_v19 = vld [vmem:[%s11991_s3 + $0x3a4] sm:$0xf]  ;;  %v7749_v0 = vld [vmem:[%s11991_s3 + $0x8b0] sm:$0xf0] }
  0xd9   :  { %4088 = vmatpush.bf16.msrb.mxu0 %v5358_v22  ;;  %4101 = vmatpush.bf16.msrb.mxu1 %v5966_v25  ;;  %v5511_v22 = vld [vmem:[%s11991_s3 + $0x3ec] sm:$0xf0]  ;;  %v6954_v25 = vor.u32 %v7957_v16, %v6953_v15  ;;  %v6578_v16 = vor.u32 %v7853_v8, %v6575_v9  ;;  %v7417_v9 = vld [vmem:[%s11991_s3 + $0x1280] sm:$0xf] }
  0xda   :  { %v5514_v34 = vor.u32 %v7587_v19, %v5511_v22  ;;  %v5207_v15 = vld [vmem:[%s11991_s3 + $0x18c] sm:$0xf0]  ;;  %v7186_v19 = vor.u32 %v8005_v11, %v7183_v12  ;;  %v6126_v11 = vor.u32 %v7749_v0, %v6125_v63  ;;  %v7673_v63 = vld [vmem:[%s11991_s3 + $0x650] sm:$0xf0] }
  0xdb   :  { %4113 = vmatpush.bf16.msrb.mxu2 %v6650_v29  ;;  %v6877_v29 = vld [vmem:[%s11991_s3 + $0xe50] sm:$0xf] }
  0xdc   :  { %4126 = vmatpush.bf16.msrb.mxu3 %v7258_v32  ;;  %v6803_v32 = vld [vmem:[%s11991_s3 + $0xe04] sm:$0xf0]  ;;  %v6878_v41 = vor.u32 %v7938_v30, %v6877_v29  ;;  %v7644_v30 = vld [vmem:[%s11991_s3 + $0x56c] sm:$0xf] }
  0xdd   :  { %4089 = vmatpush.bf16.msrb.mxu0 %v5282_v36  ;;  %4102 = vmatpush.bf16.msrb.mxu1 %v5890_v39  ;;  %v7411_v36 = vld [vmem:[%s11991_s3 + $0x12c4] sm:$0xf0]  ;;  %v7568_v39 = vld [vmem:[%s11991_s3 + $0x30c] sm:$0xf] }
  0xdf   :  { %4114 = vmatpush.bf16.msrb.mxu2 %v6574_v42  ;;  %v6806_v42 = vor.u32 %v7910_v31, %v6803_v32  ;;  %v5739_v31 = vld [vmem:[%s11991_s3 + $0x5b4] sm:$0xf0]  ;;  %v7110_v32 = vor.u32 %v7986_v23, %v7107_v24  ;;  %v7341_v23 = vld [vmem:[%s11991_s3 + $0x11e8] sm:$0xf]  ;;  %v8053_v24 = vld [vmem:[%s11991_s3 + $0x1230] sm:$0xf0] }
  0xe0   :  { %4127 = vmatpush.bf16.msrb.mxu3 %v7182_v45  ;;  %v7414_v45 = vor.u32 %v8062_v35, %v7411_v36  ;;  %v6423_v35 = vld [vmem:[%s11991_s3 + $0xb0c] sm:$0xf0]  ;;  %v5134_v36 = vor.u32 %v7492_v26, %v5131_v27  ;;  %v5365_v26 = vld [vmem:[%s11991_s3 + $0x278] sm:$0xf]  ;;  %v7559_v27 = vld [vmem:[%s11991_s3 + $0x2c0] sm:$0xf0] }
  0xe1   :  { %4090 = vmatpush.bf16.msrb.mxu0 %v5206_v48  ;;  %4103 = vmatpush.bf16.msrb.mxu1 %v5814_v51  ;;  %v5438_v48 = vor.u32 %v7568_v39, %v5435_v40  ;;  %v6046_v51 = vor.u32 %v7720_v43, %v6043_v44  ;;  %v7473_v39 = vld [vmem:[%s11991_s3 + $0x14] sm:$0xf]  ;;  %v5742_v40 = vor.u32 %v7644_v30, %v5739_v31  ;;  %v5663_v43 = vld [vmem:[%s11991_s3 + $0x51c] sm:$0xf0]  ;;  %v5973_v31 = vld [vmem:[%s11991_s3 + $0x738] sm:$0xf] }
  0xe3   :  { %4115 = vmatpush.bf16.msrb.mxu2 %v6498_v54  ;;  %v6730_v54 = vor.u32 %v7891_v46, %v6727_v47  ;;  %v7616_v46 = vld [vmem:[%s11991_s3 + $0x488] sm:$0xf0]  ;;  %v6201_v47 = vld [vmem:[%s11991_s3 + $0x900] sm:$0xf] }
  0xe4   :  { %4128 = vmatpush.bf16.msrb.mxu3 %v7106_v58  ;;  %v7338_v58 = vor.u32 %v8043_v49, %v7335_v50  ;;  %v7768_v49 = vld [vmem:[%s11991_s3 + $0x948] sm:$0xf0] }
  0xe5   :  { %4091 = vmatpush.bf16.msrb.mxu0 %v5130_v62  ;;  %4104 = vmatpush.bf16.msrb.mxu1 %v5738_v2  ;;  %v5362_v62 = vor.u32 %v7549_v52, %v5359_v53  ;;  %v7530_v2 = vld [vmem:[%s11991_s3 + $0x1dc] sm:$0xf]  ;;  %v7796_v50 = vld [vmem:[%s11991_s3 + $0xa2c] sm:$0xf]  ;;  %v6202_v59 = vor.u32 %v7768_v49, %v6201_v47  ;;  %v5897_v47 = vld [vmem:[%s11991_s3 + $0x6a0] sm:$0xf] }
  0xe6   :  { %v7948_v53 = vld [vmem:[%s11991_s3 + $0xeec] sm:$0xf] }
  0xe7   :  { %4116 = vmatpush.bf16.msrb.mxu2 %v6422_v6  ;;  %v5891_v6 = vld [vmem:[%s11991_s3 + $0x6e4] sm:$0xf0] }
  0xe8   :  { %4129 = vmatpush.bf16.msrb.mxu3 %v7030_v10  ;;  %v5286_v10 = vor.u32 %v7530_v2, %v5283_v3  ;;  %v5894_v13 = vor.u32 %v7682_v5, %v5891_v6  ;;  %v7777_v2 = vld [vmem:[%s11991_s3 + $0x994] sm:$0xf]  ;;  %v6271_v3 = vld [vmem:[%s11991_s3 + $0x9dc] sm:$0xf0] }
  0xe9   :  { %4092 = vmatpush.bf16.msrb.mxu0 %v5054_v14  ;;  %4105 = vmatpush.bf16.msrb.mxu1 %v5662_v17  ;;  %v7511_v14 = vld [vmem:[%s11991_s3 + $0x144] sm:$0xf]  ;;  %v6879_v5 = vld [vmem:[%s11991_s3 + $0xe9c] sm:$0xf0]  ;;  %v6274_v12 = vor.u32 %v7777_v2, %v6271_v3  ;;  %v7844_v3 = vld [vmem:[%s11991_s3 + $0xba8] sm:$0xf0] }
  0xea   :  { %v7663_v17 = vld [vmem:[%s11991_s3 + $0x604] sm:$0xf]  ;;  %v5210_v22 = vor.u32 %v7511_v14, %v5207_v15  ;;  %v6809_v6 = vld [vmem:[%s11991_s3 + $0xdc0] sm:$0xf]  ;;  %v7578_v14 = vld [vmem:[%s11991_s3 + $0x358] sm:$0xf0] }
  0xeb   :  { %4117 = vmatpush.bf16.msrb.mxu2 %v6346_v21  ;;  %v6499_v21 = vld [vmem:[%s11991_s3 + $0xba4] sm:$0xf0]  ;;  %v6505_v2 = vld [vmem:[%s11991_s3 + $0xb60] sm:$0xf] }
  0xec   :  { %4130 = vmatpush.bf16.msrb.mxu3 %v6954_v25  ;;  %4093 = vmatmul.bf16.vlgmr.msrb.gmra.mxu0 %v8607_v28 }
  0xed   :  { %4137 = vmatpush.bf16.msra.mxu0 %v5590_v18  ;;  %4150 = vmatpush.bf16.msra.mxu1 %v6198_v20  ;;  %v5815_v18 = vld [vmem:[%s11991_s3 + $0x64c] sm:$0xf0]  ;;  %v7834_v20 = vld [vmem:[%s11991_s3 + $0xb5c] sm:$0xf] }
  0xee   :  { %4106 = vmatmul.bf16.vlgmr.msrb.gmra.mxu1 %v8615_v33  ;;  %v5818_v25 = vor.u32 %v7663_v17, %v5815_v18  ;;  %v6502_v29 = vor.u32 %v7834_v20, %v6499_v21  ;;  %v6049_v17 = vld [vmem:[%s11991_s3 + $0x7d0] sm:$0xf]  ;;  %v7730_v18 = vld [vmem:[%s11991_s3 + $0x818] sm:$0xf0]  ;;  %v6733_v20 = vld [vmem:[%s11991_s3 + $0xd28] sm:$0xf] }
  0xef   :  { %4118 = vmatpush.bf16.msrb.mxu2 %v6270_v38  ;;  %v7031_v38 = vld [vmem:[%s11991_s3 + $0xfcc] sm:$0xf0]  ;;  %v7901_v21 = vld [vmem:[%s11991_s3 + $0xd70] sm:$0xf0] }
  0xf0   :  { %4131 = vmatpush.bf16.msrb.mxu3 %v6878_v41  ;;  %v5055_v41 = vld [vmem:[%s11991_s3 + $0x5c] sm:$0xf0]  ;;  %v6734_v30 = vor.u32 %v7901_v21, %v6733_v20  ;;  %v7037_v20 = vld [vmem:[%s11991_s3 + $0xf88] sm:$0xf]  ;;  %v7977_v21 = vld [vmem:[%s11991_s3 + $0xfd0] sm:$0xf0] }
  0xf1   :  { %4138 = vmatpush.bf16.msra.mxu0 %v5514_v34  ;;  %4151 = vmatpush.bf16.msra.mxu1 %v6122_v37  ;;  %v7815_v34 = vld [vmem:[%s11991_s3 + $0xac4] sm:$0xf]  ;;  %v5058_v52 = vor.u32 %v7473_v39, %v5055_v41  ;;  %v5366_v39 = vor.u32 %v7559_v27, %v5365_v26  ;;  %v8034_v41 = vld [vmem:[%s11991_s3 + $0x1198] sm:$0xf0]  ;;  %v5669_v27 = vld [vmem:[%s11991_s3 + $0x4d8] sm:$0xf] }
  0xf2   :  { %4119 = vmatmul.bf16.vlgmr.msrb.gmra.mxu2 %v8649_v55  ;;  %v7967_v37 = vld [vmem:[%s11991_s3 + $0xf84] sm:$0xf]  ;;  %v6426_v44 = vor.u32 %v7815_v34, %v6423_v35  ;;  %v7342_v35 = vor.u32 %v8053_v24, %v7341_v23 }
  0xf3   :  { %4163 = vmatpush.bf16.msra.mxu2 %v6806_v42  ;;  %4132 = vmatmul.bf16.vlgmr.msrb.gmra.mxu3 %v8660_v61  ;;  %v7625_v42 = vld [vmem:[%s11991_s3 + $0x4d4] sm:$0xf]  ;;  %v7483_v26 = vld [vmem:[%s11991_s3 + $0x60] sm:$0xf0] }
  0xf4   :  { %4176 = vmatpush.bf16.msra.mxu3 %v7414_v45  ;;  %v5593_v45 = vld [vmem:[%s11991_s3 + $0x440] sm:$0xf]  ;;  %v5666_v56 = vor.u32 %v7625_v42, %v5663_v43 }
  0xf5   :  { %4139 = vmatpush.bf16.msra.mxu0 %v5438_v48  ;;  %4152 = vmatpush.bf16.msra.mxu1 %v6046_v51  ;;  %v7034_v48 = vor.u32 %v7967_v37, %v7031_v38  ;;  %v6347_v51 = vld [vmem:[%s11991_s3 + $0xa74] sm:$0xf0]  ;;  %v5594_v57 = vor.u32 %v7616_v46, %v5593_v45  ;;  %v7882_v37 = vld [vmem:[%s11991_s3 + $0xcd8] sm:$0xf0]  ;;  %v7540_v45 = vld [vmem:[%s11991_s3 + $0x228] sm:$0xf0] }
  0xf6   :  { %v6350_v60 = vor.u32 %v7796_v50, %v6347_v51  ;;  %v6581_v50 = vld [vmem:[%s11991_s3 + $0xbf8] sm:$0xf]  ;;  %v7863_v51 = vld [vmem:[%s11991_s3 + $0xc40] sm:$0xf0] }
  0xf7   :  { %4164 = vmatpush.bf16.msra.mxu2 %v6730_v54  ;;  %v6955_v54 = vld [vmem:[%s11991_s3 + $0xf34] sm:$0xf0] }
  0xf8   :  { %4177 = vmatpush.bf16.msra.mxu3 %v7338_v58  ;;  %v5517_v58 = vld [vmem:[%s11991_s3 + $0x3a8] sm:$0xf] }
  0xf9   :  { %4140 = vmatpush.bf16.msra.mxu0 %v5362_v62  ;;  %4153 = vmatpush.bf16.msra.mxu1 %v5970_v1  ;;  %v7597_v62 = vld [vmem:[%s11991_s3 + $0x3f0] sm:$0xf0]  ;;  %v6958_v1 = vor.u32 %v7948_v53, %v6955_v54  ;;  %v7189_v53 = vld [vmem:[%s11991_s3 + $0x10b8] sm:$0xf]  ;;  %v8015_v54 = vld [vmem:[%s11991_s3 + $0x1100] sm:$0xf0] }
  0xfa   :  { %v5518_v8 = vor.u32 %v7597_v62, %v5517_v58  ;;  %v5213_v58 = vld [vmem:[%s11991_s3 + $0x148] sm:$0xf] }
  0xfb   :  { %4165 = vmatpush.bf16.msra.mxu2 %v6654_v4  ;;  %v7929_v4 = vld [vmem:[%s11991_s3 + $0xe54] sm:$0xf]  ;;  %v5821_v62 = vld [vmem:[%s11991_s3 + $0x608] sm:$0xf] }
  0xfc   :  { %4178 = vmatpush.bf16.msra.mxu3 %v7262_v7  ;;  %v7920_v7 = vld [vmem:[%s11991_s3 + $0xe08] sm:$0xf0]  ;;  %v6882_v15 = vor.u32 %v7929_v4, %v6879_v5 }
  0xfd   :  { %4141 = vmatpush.bf16.msra.mxu0 %v5286_v10  ;;  %4154 = vmatpush.bf16.msra.mxu1 %v5894_v13  ;;  %v8072_v10 = vld [vmem:[%s11991_s3 + $0x12c8] sm:$0xf0]  ;;  %v5441_v13 = vld [vmem:[%s11991_s3 + $0x310] sm:$0xf] }
  0xff   :  { %4166 = vmatpush.bf16.msra.mxu2 %v6578_v16  ;;  %v6810_v16 = vor.u32 %v7920_v7, %v6809_v6  ;;  %v7113_v6 = vld [vmem:[%s11991_s3 + $0x1020] sm:$0xf]  ;;  %v7996_v7 = vld [vmem:[%s11991_s3 + $0x1068] sm:$0xf0] }
 0x100   :  { %4179 = vmatpush.bf16.msra.mxu3 %v7186_v19  ;;  %v7418_v19 = vor.u32 %v8072_v10, %v7417_v9  ;;  %v5822_v9 = vor.u32 %v7673_v63, %v5821_v62  ;;  %v5137_v10 = vld [vmem:[%s11991_s3 + $0xb0] sm:$0xf]  ;;  %v7939_v63 = vld [vmem:[%s11991_s3 + $0xea0] sm:$0xf0] }
 0x101   :  { %4142 = vmatpush.bf16.msra.mxu0 %v5210_v22  ;;  %4155 = vmatpush.bf16.msra.mxu1 %v5818_v25  ;;  %v5442_v22 = vor.u32 %v7578_v14, %v5441_v13  ;;  %v6050_v25 = vor.u32 %v7730_v18, %v6049_v17  ;;  %v5745_v13 = vld [vmem:[%s11991_s3 + $0x570] sm:$0xf]  ;;  %v7654_v14 = vld [vmem:[%s11991_s3 + $0x5b8] sm:$0xf0]  ;;  %v7825_v17 = vld [vmem:[%s11991_s3 + $0xb10] sm:$0xf0] }
 0x103   :  { %4167 = vmatpush.bf16.msra.mxu2 %v6502_v29  ;;  %v9462_v29 = vld [vmem:[%s11992_s4] sm:$0xff] }
 0x104   :  { %4180 = vmatpush.bf16.msra.mxu3 %v7110_v32  ;;  %v7711_v32 = vld [vmem:[%s11991_s3 + $0x780] sm:$0xf0]  ;;  %v767_v42 = vperm.slane %v9462_v29, 0 }
 0x105   :  { %4143 = vmatpush.bf16.msra.mxu0 %v5134_v36  ;;  %4156 = vmatpush.bf16.msra.mxu1 %v5742_v40  ;;  %v6657_v36 = vld [vmem:[%s11991_s3 + $0xc90] sm:$0xf]  ;;  %v5974_v43 = vor.u32 %v7711_v32, %v5973_v31  ;;  %v7607_v32 = vld [vmem:[%s11991_s3 + $0x444] sm:$0xf] }
 0x106   :  { %v7265_v40 = vld [vmem:[%s11991_s3 + $0x1150] sm:$0xf]  ;;  %v6658_v46 = vor.u32 %v7882_v37, %v6657_v36 }
 0x107   :  { %4168 = vmatpush.bf16.msra.mxu2 %v6426_v44  ;;  %v5289_v44 = vld [vmem:[%s11991_s3 + $0x1e0] sm:$0xf]  ;;  %v7266_v49 = vor.u32 %v8034_v41, %v7265_v40  ;;  %v6353_v40 = vld [vmem:[%s11991_s3 + $0xa30] sm:$0xf]  ;;  %v7806_v41 = vld [vmem:[%s11991_s3 + $0xa78] sm:$0xf0] }
 0x108   :  { %4181 = vmatpush.bf16.msra.mxu3 %v7034_v48  ;;  %v3886_v34 = vpop.f32.mrf.mxu0  ;;  %v7692_v48 = vld [vmem:[%s11991_s3 + $0x6e8] sm:$0xf0] }
 0x109   :  { %4144 = vmatpush.bf16.msra.mxu0 %v5058_v52  ;;  %4157 = vmatpush.bf16.msra.mxu1 %v5666_v56  ;;  %v3899_v38 = vpop.f32.mrf.mxu1  ;;  %v5290_v52 = vor.u32 %v7540_v45, %v5289_v44  ;;  %v3887_v56 = vadd.f32 %v3886_v34, %v767_v42  ;;  %v5595_v34 = vld [vmem:[%s11991_s3 + $0x48c] sm:$0xf0]  ;;  %v7958_v45 = vld [vmem:[%s11991_s3 + $0xf38] sm:$0xf0] }
 0x10a   :  { %v6961_v44 = vld [vmem:[%s11991_s3 + $0xef0] sm:$0xf] }
 0x10b   :  { %4169 = vmatpush.bf16.msra.mxu2 %v6350_v60  ;;  %v6582_v60 = vor.u32 %v7863_v51, %v6581_v50  ;;  %v7588_v50 = vld [vmem:[%s11991_s3 + $0x3ac] sm:$0xf] }
 0x10c   :  { %4182 = vmatpush.bf16.msra.mxu3 %v6958_v1  ;;  %4145 = vmatmul.bf16.vlgmr.msra.gmra.mxu0 %v8607_v28  ;;  %v7190_v1 = vor.u32 %v8015_v54, %v7189_v53  ;;  %v5519_v53 = vld [vmem:[%s11991_s3 + $0x3f4] sm:$0xf0]  ;;  %v7740_v54 = vld [vmem:[%s11991_s3 + $0x86c] sm:$0xf] }
 0x10d   :  { %4189 = vmatpush.bf16.msrb.mxu0 %v5594_v57  ;;  %4202 = vmatpush.bf16.msrb.mxu1 %v6202_v59  ;;  %v5898_v57 = vor.u32 %v7692_v48, %v5897_v47  ;;  %v7521_v59 = vld [vmem:[%s11991_s3 + $0x190] sm:$0xf0]  ;;  %v768_v47 = vperm.slane %v9462_v29, 1 }
 0x10e   :  { %4158 = vmatmul.bf16.vlgmr.msra.gmra.mxu1 %v8615_v33  ;;  %v5214_v5 = vor.u32 %v7521_v59, %v5213_v58  ;;  %v6277_v58 = vld [vmem:[%s11991_s3 + $0x998] sm:$0xf]  ;;  %v7787_v59 = vld [vmem:[%s11991_s3 + $0x9e0] sm:$0xf0] }
 0x10f   :  { %4170 = vmatpush.bf16.msra.mxu2 %v6274_v12  ;;  %v6506_v12 = vor.u32 %v7844_v3, %v6505_v2  ;;  %v5522_v3 = vor.u32 %v7588_v50, %v5519_v53 }
 0x110   :  { %4183 = vmatpush.bf16.msra.mxu3 %v6882_v15  ;;  %v3888_v0 = vpop.f32.mrf.mxu0  ;;  %v7114_v15 = vor.u32 %v7996_v7, %v7113_v6  ;;  %v6278_v7 = vor.u32 %v7787_v59, %v6277_v58  ;;  %v6583_v58 = vld [vmem:[%s11991_s3 + $0xc44] sm:$0xf0] }
 0x111   :  { %4190 = vmatpush.bf16.msrb.mxu0 %v5518_v8  ;;  %4203 = vmatpush.bf16.msrb.mxu1 %v6126_v11  ;;  %v3901_v4 = vpop.f32.mrf.mxu1  ;;  %v3900_v8 = vadd.f32 %v3899_v38, %v3887_v56  ;;  %v7502_v11 = vld [vmem:[%s11991_s3 + $0xf8] sm:$0xf0]  ;;  %v7038_v38 = vor.u32 %v7977_v21, %v7037_v20  ;;  %v6127_v56 = vld [vmem:[%s11991_s3 + $0x8b4] sm:$0xf0]  ;;  %v7911_v0 = vld [vmem:[%s11991_s3 + $0xdc4] sm:$0xf] }
 0x112   :  { %4171 = vmatmul.bf16.vlgmr.msra.gmra.mxu2 %v8649_v55  ;;  %v8063_v4 = vld [vmem:[%s11991_s3 + $0x1284] sm:$0xf]  ;;  %v6130_v6 = vor.u32 %v7740_v54, %v6127_v56 }
 0x113   :  { %4215 = vmatpush.bf16.msrb.mxu2 %v6810_v16  ;;  %4184 = vmatmul.bf16.vlgmr.msra.gmra.mxu3 %v8660_v61  ;;  %v6429_v16 = vld [vmem:[%s11991_s3 + $0xac8] sm:$0xf] }
 0x114   :  { %4228 = vmatpush.bf16.msrb.mxu3 %v7418_v19  ;;  %v5138_v19 = vor.u32 %v7502_v11, %v5137_v10  ;;  %v6430_v31 = vor.u32 %v7825_v17, %v6429_v16 }
 0x115   :  { %4191 = vmatpush.bf16.msrb.mxu0 %v5442_v22  ;;  %4204 = vmatpush.bf16.msrb.mxu1 %v6050_v25  ;;  %v3912_v18 = vpop.f32.mrf.mxu2  ;;  %v5061_v22 = vld [vmem:[%s11991_s3 + $0x18] sm:$0xf]  ;;  %v5746_v25 = vor.u32 %v7654_v14, %v5745_v13  ;;  %v7721_v14 = vld [vmem:[%s11991_s3 + $0x7d4] sm:$0xf] }
 0x116   :  { %v3913_v23 = vadd.f32 %v3912_v18, %v3900_v8  ;;  %v3925_v24 = vpop.f32.mrf.mxu3  ;;  %v7569_v8 = vld [vmem:[%s11991_s3 + $0x314] sm:$0xf]  ;;  %v7892_v18 = vld [vmem:[%s11991_s3 + $0xd2c] sm:$0xf] }
 0x117   :  { %4216 = vmatpush.bf16.msrb.mxu2 %v6734_v30  ;;  %v7635_v30 = vld [vmem:[%s11991_s3 + $0x520] sm:$0xf0] }
 0x118   :  { %4229 = vmatpush.bf16.msrb.mxu3 %v7342_v35  ;;  %v7759_v35 = vld [vmem:[%s11991_s3 + $0x904] sm:$0xf]  ;;  %v3926_v36 = vadd.f32 %v3925_v24, %v3913_v23  ;;  %v3938_v37 = vpop.f32.mrf.mxu0  ;;  %v5670_v48 = vor.u32 %v7635_v30, %v5669_v27  ;;  %v7343_v23 = vld [vmem:[%s11991_s3 + $0x1234] sm:$0xf0]  ;;  %v5367_v27 = vld [vmem:[%s11991_s3 + $0x2c4] sm:$0xf0] }
 0x119   :  { %4192 = vmatpush.bf16.msrb.mxu0 %v5366_v39  ;;  %4205 = vmatpush.bf16.msrb.mxu1 %v5974_v43  ;;  %v6203_v39 = vld [vmem:[%s11991_s3 + $0x94c] sm:$0xf0]  ;;  %v9587_v42 = vpop.f32.mrf.mxu1  ;;  %v5062_v43 = vor.u32 %v7483_v26, %v5061_v22  ;;  %v3939_v10 = vadd.f32 %v3938_v37, %v768_v47  ;;  %v8044_v22 = vld [vmem:[%s11991_s3 + $0x11ec] sm:$0xf]  ;;  %v7550_v26 = vld [vmem:[%s11991_s3 + $0x27c] sm:$0xf] }
 0x11a   :  { %v6206_v51 = vor.u32 %v7759_v35, %v6203_v39  ;;  %v7346_v37 = vor.u32 %v8044_v22, %v7343_v23  ;;  %v6659_v39 = vld [vmem:[%s11991_s3 + $0xcdc] sm:$0xf0]  ;;  %v7531_v47 = vld [vmem:[%s11991_s3 + $0x1e4] sm:$0xf]  ;;  %v7816_v22 = vld [vmem:[%s11991_s3 + $0xacc] sm:$0xf] }
 0x11b   :  { %4217 = vmatpush.bf16.msrb.mxu2 %v6658_v46  ;;  %v4865_v46 = vmul.f32 0.5, %v3926_v36  ;;  %v3952_v30 = vadd.f32 %v9587_v42, %v3939_v10  ;;  %v5370_v42 = vor.u32 %v7550_v26, %v5367_v27  ;;  %v7835_v10 = vld [vmem:[%s11991_s3 + $0xb64] sm:$0xf]  ;;  %v6431_v26 = vld [vmem:[%s11991_s3 + $0xb14] sm:$0xf0] }
 0x11c   :  { %4230 = vmatpush.bf16.msrb.mxu3 %v7266_v49  ;;  %v5598_v49 = vor.u32 %v7607_v32, %v5595_v34  ;;  %v7702_v32 = vld [vmem:[%s11991_s3 + $0x73c] sm:$0xf]  ;;  %v5975_v34 = vld [vmem:[%s11991_s3 + $0x784] sm:$0xf0]  ;;  %v7968_v27 = vld [vmem:[%s11991_s3 + $0xf8c] sm:$0xf] }
 0x11d   :  { %4193 = vmatpush.bf16.msrb.mxu0 %v5290_v52  ;;  %4206 = vmatpush.bf16.msrb.mxu1 %v5898_v57  ;;  %v6354_v52 = vor.u32 %v7806_v41, %v6353_v40  ;;  %8080 = vtanh.f32 %v4865_v46  ;;  %v6962_v57 = vor.u32 %v7958_v45, %v6961_v44  ;;  %v3914_v62 = vpop.f32.mrf.mxu2  ;;  %v7267_v44 = vld [vmem:[%s11991_s3 + $0x119c] sm:$0xf0]  ;;  %v5978_v46 = vor.u32 %v7702_v32, %v5975_v34 }
 0x11e   :  { %v3927_v2 = vpop.f32.mrf.mxu3 }
 0x11f   :  { %4218 = vmatpush.bf16.msrb.mxu2 %v6582_v60  ;;  %v6885_v60 = vld [vmem:[%s11991_s3 + $0xe58] sm:$0xf]  ;;  %v7512_v2 = vld [vmem:[%s11991_s3 + $0x14c] sm:$0xf] }
 0x120   :  { %4231 = vmatpush.bf16.msrb.mxu3 %v7190_v1  ;;  %v6811_v1 = vld [vmem:[%s11991_s3 + $0xe0c] sm:$0xf0]  ;;  %v3940_v11 = vpop.f32.mrf.mxu0 }
 0x121   :  { %4194 = vmatpush.bf16.msrb.mxu0 %v5214_v5  ;;  %4207 = vmatpush.bf16.msrb.mxu1 %v5822_v9  ;;  %v7419_v5 = vld [vmem:[%s11991_s3 + $0x12cc] sm:$0xf0]  ;;  %v5443_v9 = vld [vmem:[%s11991_s3 + $0x35c] sm:$0xf0]  ;;  %v6814_v13 = vor.u32 %v7911_v0, %v6811_v1  ;;  %v3953_v16 = vpop.f32.mrf.mxu1  ;;  %v7191_v0 = vld [vmem:[%s11991_s3 + $0x1104] sm:$0xf0] }
 0x122   :  { %v7422_v17 = vor.u32 %v8063_v4, %v7419_v5  ;;  %v5446_v21 = vor.u32 %v7569_v8, %v5443_v9  ;;  %v7664_v5 = vld [vmem:[%s11991_s3 + $0x60c] sm:$0xf]  ;;  %v6507_v11 = vld [vmem:[%s11991_s3 + $0xbac] sm:$0xf0] }
 0x123   :  { %4219 = vmatpush.bf16.msrb.mxu2 %v6506_v12  ;;  %v6886_v12 = vor.u32 %v7939_v63, %v6885_v60  ;;  %v8081_v20 = vpop.eup %8080  ;;  %v8006_v63 = vld [vmem:[%s11991_s3 + $0x10bc] sm:$0xf] }
 0x124   :  { %4232 = vmatpush.bf16.msrb.mxu3 %v7114_v15  ;;  %v6051_v15 = vld [vmem:[%s11991_s3 + $0x81c] sm:$0xf0]  ;;  %v4903_v24 = vmul.f32 0.5, %v8081_v20  ;;  %v7194_v9 = vor.u32 %v8006_v63, %v7191_v0  ;;  %v7645_v20 = vld [vmem:[%s11991_s3 + $0x574] sm:$0xf] }
 0x125   :  { %4195 = vmatpush.bf16.msrb.mxu0 %v5138_v19  ;;  %4208 = vmatpush.bf16.msrb.mxu1 %v5746_v25  ;;  %v6735_v19 = vld [vmem:[%s11991_s3 + $0xd74] sm:$0xf0]  ;;  %v6054_v25 = vor.u32 %v7721_v14, %v6051_v15  ;;  %v3964_v36 = vpop.f32.mrf.mxu2  ;;  %v7987_v14 = vld [vmem:[%s11991_s3 + $0x1024] sm:$0xf]  ;;  %v7115_v15 = vld [vmem:[%s11991_s3 + $0x106c] sm:$0xf0] }
 0x126   :  { %v4922_v35 = vadd.f32 0.5, %v4903_v24  ;;  %v3965_v40 = vadd.f32 %v3964_v36, %v3952_v30  ;;  %v3977_v41 = vpop.f32.mrf.mxu3  ;;  %v7039_v30 = vld [vmem:[%s11991_s3 + $0xfd4] sm:$0xf0]  ;;  %v5063_v36 = vld [vmem:[%s11991_s3 + $0x64] sm:$0xf0] }
 0x127   :  { %4220 = vmatpush.bf16.msrb.mxu2 %v6430_v31  ;;  %v6738_v31 = vor.u32 %v7892_v18, %v6735_v19  ;;  %v5139_v18 = vld [vmem:[%s11991_s3 + $0xfc] sm:$0xf0]  ;;  %v6510_v19 = vor.u32 %v7835_v10, %v6507_v11  ;;  %v7598_v63 = vld [vmem:[%s11991_s3 + $0x3f8] sm:$0xf0]  ;;  %v6887_v10 = vld [vmem:[%s11991_s3 + $0xea4] sm:$0xf0] }
 0x128   :  { %4233 = vmatpush.bf16.msrb.mxu3 %v7038_v38  ;;  %v7873_v38 = vld [vmem:[%s11991_s3 + $0xc94] sm:$0xf]  ;;  %v4941_v45 = vmax.f32 %v4922_v35, 1e-06  ;;  %v7474_v35 = vld [vmem:[%s11991_s3 + $0x1c] sm:$0xf] }
 0x129   :  { %4196 = vmatpush.bf16.msrb.mxu0 %v5062_v43  ;;  %4209 = vmatpush.bf16.msrb.mxu1 %v5670_v48  ;;  %v8025_v43 = vld [vmem:[%s11991_s3 + $0x1154] sm:$0xf]  ;;  %v5291_v48 = vld [vmem:[%s11991_s3 + $0x22c] sm:$0xf0]  ;;  %v6662_v50 = vor.u32 %v7873_v38, %v6659_v39  ;;  %v3990_v54 = vpop.f32.mrf.mxu0  ;;  %v6817_v11 = vld [vmem:[%s11991_s3 + $0xdc8] sm:$0xf] }
 0x12a   :  { %v4960_v53 = vmin.f32 %v4941_v45, 0.999999  ;;  %v7270_v56 = vor.u32 %v8025_v43, %v7267_v44  ;;  %v5294_v62 = vor.u32 %v7531_v47, %v5291_v48  ;;  %v7617_v43 = vld [vmem:[%s11991_s3 + $0x490] sm:$0xf0]  ;;  %v6209_v44 = vld [vmem:[%s11991_s3 + $0x908] sm:$0xf]  ;;  %v7042_v48 = vor.u32 %v7968_v27, %v7039_v30 }
 0x12b   :  { %4221 = vmatpush.bf16.msrb.mxu2 %v6354_v52  ;;  %v5899_v52 = vld [vmem:[%s11991_s3 + $0x6ec] sm:$0xf0]  ;;  %v4003_v60 = vpop.f32.mrf.mxu1  ;;  %v7769_v45 = vld [vmem:[%s11991_s3 + $0x950] sm:$0xf0] }
 0x12c   :  { %4234 = vmatpush.bf16.msrb.mxu3 %v6962_v57  ;;  %4197 = vmatmul.bf16.vlgmr.msrb.gmra.mxu0 %v8607_v28  ;;  %v7854_v57 = vld [vmem:[%s11991_s3 + $0xbfc] sm:$0xf]  ;;  %4979 = vst [vmem:[#allocation2] sm:$0xff] %v4960_v53  ;;  %v5066_v53 = vor.u32 %v7474_v35, %v5063_v36  ;;  %v6210_v0 = vor.u32 %v7769_v45, %v6209_v44  ;;  %v6741_v30 = vld [vmem:[%s11991_s3 + $0xd30] sm:$0xf] }
 0x12d   :  { %4241 = vmatpush.bf16.msra.mxu0 %v5598_v49  ;;  %4254 = vmatpush.bf16.msra.mxu1 %v6206_v51  ;;  %v3978_v49 = vadd.f32 %v3977_v41, %v3965_v40  ;;  %v7683_v51 = vld [vmem:[%s11991_s3 + $0x6a4] sm:$0xf]  ;;  %v6586_v4 = vor.u32 %v7854_v57, %v6583_v58  ;;  %v3966_v8 = vpop.f32.mrf.mxu2  ;;  %v5671_v40 = vld [vmem:[%s11991_s3 + $0x524] sm:$0xf0]  ;;  %v8054_v35 = vld [vmem:[%s11991_s3 + $0x1238] sm:$0xf0] }
 0x12e   :  { %4210 = vmatmul.bf16.vlgmr.msrb.gmra.mxu1 %v8615_v33  ;;  %v5902_v1 = vor.u32 %v7683_v51, %v5899_v52  ;;  %v5601_v41 = vld [vmem:[%s11991_s3 + $0x448] sm:$0xf]  ;;  %v7883_v44 = vld [vmem:[%s11991_s3 + $0xce0] sm:$0xf0] }
 0x12f   :  { %4222 = vmatpush.bf16.msrb.mxu2 %v6278_v7  ;;  %v4866_v59 = vmul.f32 0.5, %v3978_v49  ;;  %v769_v7 = vperm.slane %v9462_v29, 2  ;;  %v7797_v49 = vld [vmem:[%s11991_s3 + $0xa34] sm:$0xf]  ;;  %v6279_v8 = vld [vmem:[%s11991_s3 + $0x9e4] sm:$0xf0] }
 0x130   :  { %4235 = vmatpush.bf16.msrb.mxu3 %v6886_v12  ;;  %v3979_v12 = vpop.f32.mrf.mxu3 }
 0x131   :  { %4242 = vmatpush.bf16.msra.mxu0 %v5522_v3  ;;  %4255 = vmatpush.bf16.msra.mxu1 %v6130_v6  ;;  %v5215_v3 = vld [vmem:[%s11991_s3 + $0x194] sm:$0xf0]  ;;  %8082 = vtanh.f32 %v4866_v59  ;;  %v3991_v23 = vadd.f32 %v3990_v54, %v769_v7  ;;  %v3992_v24 = vpop.f32.mrf.mxu0  ;;  %v7949_v54 = vld [vmem:[%s11991_s3 + $0xef4] sm:$0xf] }
 0x132   :  { %4223 = vmatmul.bf16.vlgmr.msrb.gmra.mxu2 %v8649_v55  ;;  %v5823_v6 = vld [vmem:[%s11991_s3 + $0x654] sm:$0xf0]  ;;  %v7921_v12 = vld [vmem:[%s11991_s3 + $0xe10] sm:$0xf0]  ;;  %v7731_v24 = vld [vmem:[%s11991_s3 + $0x820] sm:$0xf0] }
 0x133   :  { %4267 = vmatpush.bf16.msra.mxu2 %v6814_v13  ;;  %4236 = vmatmul.bf16.vlgmr.msrb.gmra.mxu3 %v8660_v61  ;;  %v5218_v13 = vor.u32 %v7512_v2, %v5215_v3  ;;  %v5826_v16 = vor.u32 %v7664_v5, %v5823_v6  ;;  %v4005_v32 = vpop.f32.mrf.mxu1  ;;  %v4004_v47 = vadd.f32 %v4003_v60, %v3991_v23  ;;  %v6133_v2 = vld [vmem:[%s11991_s3 + $0x870] sm:$0xf]  ;;  %v7750_v3 = vld [vmem:[%s11991_s3 + $0x8b8] sm:$0xf0]  ;;  %v6057_v23 = vld [vmem:[%s11991_s3 + $0x7d8] sm:$0xf] }
 0x134   :  { %4280 = vmatpush.bf16.msra.mxu3 %v7422_v17  ;;  %v7493_v17 = vld [vmem:[%s11991_s3 + $0xb4] sm:$0xf]  ;;  %v5602_v60 = vor.u32 %v7617_v43, %v5601_v41  ;;  %v6058_v36 = vor.u32 %v7731_v24, %v6057_v23  ;;  %v7712_v41 = vld [vmem:[%s11991_s3 + $0x788] sm:$0xf0]  ;;  %v6665_v43 = vld [vmem:[%s11991_s3 + $0xc98] sm:$0xf] }
 0x135   :  { %4243 = vmatpush.bf16.msra.mxu0 %v5446_v21  ;;  %4256 = vmatpush.bf16.msra.mxu1 %v6054_v25  ;;  %v5747_v21 = vld [vmem:[%s11991_s3 + $0x5bc] sm:$0xf0]  ;;  %v7118_v25 = vor.u32 %v7987_v14, %v7115_v15  ;;  %v5142_v34 = vor.u32 %v7493_v17, %v5139_v18  ;;  %v4016_v51 = vpop.f32.mrf.mxu2  ;;  %v7425_v15 = vld [vmem:[%s11991_s3 + $0x1288] sm:$0xf]  ;;  %v6134_v17 = vor.u32 %v7750_v3, %v6133_v2  ;;  %v8016_v2 = vld [vmem:[%s11991_s3 + $0x1108] sm:$0xf0] }
 0x136   :  { %v5750_v39 = vor.u32 %v7645_v20, %v5747_v21  ;;  %v4017_v58 = vadd.f32 %v4016_v51, %v4004_v47  ;;  %v7579_v20 = vld [vmem:[%s11991_s3 + $0x360] sm:$0xf0]  ;;  %v7273_v47 = vld [vmem:[%s11991_s3 + $0x1158] sm:$0xf]  ;;  %v5297_v51 = vld [vmem:[%s11991_s3 + $0x1e8] sm:$0xf] }
 0x137   :  { %4268 = vmatpush.bf16.msra.mxu2 %v6738_v31  ;;  %v8083_v31 = vpop.eup %8082  ;;  %v5753_v23 = vld [vmem:[%s11991_s3 + $0x578] sm:$0xf]  ;;  %v7655_v24 = vld [vmem:[%s11991_s3 + $0x5c0] sm:$0xf0] }
 0x138   :  { %4281 = vmatpush.bf16.msra.mxu3 %v7346_v37  ;;  %v7626_v37 = vld [vmem:[%s11991_s3 + $0x4dc] sm:$0xf]  ;;  %v4904_v38 = vmul.f32 0.5, %v8083_v31  ;;  %v4029_v52 = vpop.f32.mrf.mxu3 }
 0x139   :  { %4244 = vmatpush.bf16.msra.mxu0 %v5370_v42  ;;  %4257 = vmatpush.bf16.msra.mxu1 %v5978_v46  ;;  %v6434_v42 = vor.u32 %v7816_v22, %v6431_v26  ;;  %v5674_v59 = vor.u32 %v7626_v37, %v5671_v40  ;;  %v4030_v6 = vadd.f32 %v4029_v52, %v4017_v58  ;;  %v7902_v31 = vld [vmem:[%s11991_s3 + $0xd78] sm:$0xf0]  ;;  %v5373_v37 = vld [vmem:[%s11991_s3 + $0x280] sm:$0xf]  ;;  %v7541_v52 = vld [vmem:[%s11991_s3 + $0x230] sm:$0xf0] }
 0x13a   :  { %v4923_v46 = vadd.f32 0.5, %v4904_v38  ;;  %v6818_v22 = vor.u32 %v7921_v12, %v6817_v11  ;;  %v7560_v38 = vld [vmem:[%s11991_s3 + $0x2c8] sm:$0xf0]  ;;  %v5981_v40 = vld [vmem:[%s11991_s3 + $0x740] sm:$0xf] }
 0x13b   :  { %4269 = vmatpush.bf16.msra.mxu2 %v6662_v50  ;;  %v6355_v50 = vld [vmem:[%s11991_s3 + $0xa7c] sm:$0xf0] }
 0x13c   :  { %4282 = vmatpush.bf16.msra.mxu3 %v7270_v56  ;;  %v6963_v56 = vld [vmem:[%s11991_s3 + $0xf3c] sm:$0xf0]  ;;  %v4942_v57 = vmax.f32 %v4923_v46, 1e-06  ;;  %v5374_v46 = vor.u32 %v7560_v38, %v5373_v37  ;;  %v5754_v37 = vor.u32 %v7655_v24, %v5753_v23  ;;  %v7484_v38 = vld [vmem:[%s11991_s3 + $0x68] sm:$0xf0] }
 0x13d   :  { %4245 = vmatpush.bf16.msra.mxu0 %v5294_v62  ;;  %4258 = vmatpush.bf16.msra.mxu1 %v5902_v1  ;;  %v5525_v62 = vld [vmem:[%s11991_s3 + $0x3b0] sm:$0xf]  ;;  %v6358_v1 = vor.u32 %v7797_v49, %v6355_v50  ;;  %v6966_v7 = vor.u32 %v7949_v54, %v6963_v56  ;;  %v5982_v50 = vor.u32 %v7712_v41, %v5981_v40  ;;  %v5905_v54 = vld [vmem:[%s11991_s3 + $0x6a8] sm:$0xf]  ;;  %v7693_v56 = vld [vmem:[%s11991_s3 + $0x6f0] sm:$0xf0] }
 0x13e   :  { %v4961_v5 = vmin.f32 %v4942_v57, 0.999999  ;;  %v5526_v14 = vor.u32 %v7598_v63, %v5525_v62  ;;  %v7864_v62 = vld [vmem:[%s11991_s3 + $0xc48] sm:$0xf0] }
 0x13f   :  { %4270 = vmatpush.bf16.msra.mxu2 %v6586_v4  ;;  %v7778_v4 = vld [vmem:[%s11991_s3 + $0x99c] sm:$0xf]  ;;  %v7636_v40 = vld [vmem:[%s11991_s3 + $0x528] sm:$0xf0] }
 0x140   :  { %4283 = vmatpush.bf16.msra.mxu3 %v7194_v9  ;;  %v7930_v9 = vld [vmem:[%s11991_s3 + $0xe5c] sm:$0xf]  ;;  %4980 = vst [vmem:[#allocation2 + $0x8] sm:$0xff] %v4961_v5  ;;  %v6282_v18 = vor.u32 %v7778_v4, %v6279_v8  ;;  %v4031_v26 = vpop.f32.mrf.mxu3  ;;  %v5906_v4 = vor.u32 %v7693_v56, %v5905_v54  ;;  %v5221_v5 = vld [vmem:[%s11991_s3 + $0x150] sm:$0xf] }
 0x141   :  { %4246 = vmatpush.bf16.msra.mxu0 %v5218_v13  ;;  %4259 = vmatpush.bf16.msra.mxu1 %v5826_v16  ;;  %v4867_v13 = vmul.f32 0.5, %v4030_v6  ;;  %v8073_v16 = vld [vmem:[%s11991_s3 + $0x12d0] sm:$0xf0]  ;;  %v6890_v21 = vor.u32 %v7930_v9, %v6887_v10  ;;  %v7522_v6 = vld [vmem:[%s11991_s3 + $0x198] sm:$0xf0] }
 0x142   :  { %v7426_v27 = vor.u32 %v8073_v16, %v7425_v15  ;;  %v5829_v9 = vld [vmem:[%s11991_s3 + $0x610] sm:$0xf]  ;;  %v7674_v10 = vld [vmem:[%s11991_s3 + $0x658] sm:$0xf0]  ;;  %v5222_v15 = vor.u32 %v7522_v6, %v5221_v5  ;;  %v7121_v16 = vld [vmem:[%s11991_s3 + $0x1028] sm:$0xf] }
 0x143   :  { %4271 = vmatpush.bf16.msra.mxu2 %v6510_v19  ;;  %v5449_v19 = vld [vmem:[%s11991_s3 + $0x318] sm:$0xf]  ;;  %8084 = vtanh.f32 %v4867_v13  ;;  %v6513_v13 = vld [vmem:[%s11991_s3 + $0xb68] sm:$0xf]  ;;  %v7959_v56 = vld [vmem:[%s11991_s3 + $0xf40] sm:$0xf0] }
 0x144   :  { %4284 = vmatpush.bf16.msra.mxu3 %v7118_v25  ;;  %v4018_v25 = vpop.f32.mrf.mxu2  ;;  %v5450_v32 = vor.u32 %v7579_v20, %v5449_v19  ;;  %v5145_v19 = vld [vmem:[%s11991_s3 + $0xb8] sm:$0xf]  ;;  %v7503_v20 = vld [vmem:[%s11991_s3 + $0x100] sm:$0xf0]  ;;  %v7788_v5 = vld [vmem:[%s11991_s3 + $0x9e8] sm:$0xf0] }
 0x145   :  { %4247 = vmatpush.bf16.msra.mxu0 %v5142_v34  ;;  %4260 = vmatpush.bf16.msra.mxu1 %v5750_v39  ;;  %v7349_v34 = vld [vmem:[%s11991_s3 + $0x11f0] sm:$0xf]  ;;  %v6742_v39 = vor.u32 %v7902_v31, %v6741_v30  ;;  %v7826_v30 = vld [vmem:[%s11991_s3 + $0xb18] sm:$0xf0]  ;;  %v6969_v54 = vld [vmem:[%s11991_s3 + $0xef8] sm:$0xf] }
 0x146   :  { %v6893_v6 = vld [vmem:[%s11991_s3 + $0xe60] sm:$0xf] }
 0x147   :  { %4272 = vmatpush.bf16.msra.mxu2 %v6434_v42  ;;  %v7350_v42 = vor.u32 %v8054_v35, %v7349_v34  ;;  %v7045_v34 = vld [vmem:[%s11991_s3 + $0xf90] sm:$0xf]  ;;  %v7978_v35 = vld [vmem:[%s11991_s3 + $0xfd8] sm:$0xf0] }
 0x148   :  { %4285 = vmatpush.bf16.msra.mxu3 %v7042_v48  ;;  %v8035_v48 = vld [vmem:[%s11991_s3 + $0x11a0] sm:$0xf0] }
 0x149   :  { %4248 = vmatpush.bf16.msra.mxu0 %v5066_v53  ;;  %4261 = vmatpush.bf16.msra.mxu1 %v5674_v59  ;;  %v8085_v45 = vpop.eup %8084  ;;  %v6666_v53 = vor.u32 %v7883_v44, %v6665_v43  ;;  %v4042_v58 = vpop.f32.mrf.mxu0  ;;  %v7274_v59 = vor.u32 %v8035_v48, %v7273_v47  ;;  %v7608_v43 = vld [vmem:[%s11991_s3 + $0x44c] sm:$0xf]  ;;  %v5603_v44 = vld [vmem:[%s11991_s3 + $0x494] sm:$0xf0]  ;;  %v7046_v47 = vor.u32 %v7978_v35, %v7045_v34  ;;  %v7551_v34 = vld [vmem:[%s11991_s3 + $0x284] sm:$0xf] }
 0x14a   :  { %v4905_v49 = vmul.f32 0.5, %v8085_v45  ;;  %v7760_v45 = vld [vmem:[%s11991_s3 + $0x90c] sm:$0xf]  ;;  %v6211_v48 = vld [vmem:[%s11991_s3 + $0x954] sm:$0xf0] }
 0x14b   :  { %4273 = vmatpush.bf16.msra.mxu2 %v6358_v1  ;;  %v4055_v63 = vpop.f32.mrf.mxu1  ;;  %v7197_v1 = vld [vmem:[%s11991_s3 + $0x10c0] sm:$0xf]  ;;  %v5375_v35 = vld [vmem:[%s11991_s3 + $0x2cc] sm:$0xf0] }
 0x14c   :  { %4286 = vmatpush.bf16.msra.mxu3 %v6966_v7  ;;  %4249 = vmatmul.bf16.vlgmr.msra.gmra.mxu0 %v8607_v28  ;;  %v4924_v57 = vadd.f32 0.5, %v4905_v49  ;;  %v770_v7 = vperm.slane %v9462_v29, 3  ;;  %v7198_v12 = vor.u32 %v8016_v2, %v7197_v1  ;;  %v6361_v49 = vld [vmem:[%s11991_s3 + $0xa38] sm:$0xf]  ;;  %v7741_v1 = vld [vmem:[%s11991_s3 + $0x874] sm:$0xf] }
 0x14d   :  { %4293 = vmatpush.bf16.msrb.mxu0 %v5602_v60  ;;  %4306 = vmatpush.bf16.msrb.mxu1 %v6210_v0  ;;  %v6589_v60 = vld [vmem:[%s11991_s3 + $0xc00] sm:$0xf]  ;;  %v5298_v0 = vor.u32 %v7541_v52, %v5297_v51 }
 0x14e   :  { %4262 = vmatmul.bf16.vlgmr.msra.gmra.mxu1 %v8615_v33  ;;  %v4943_v3 = vmax.f32 %v4924_v57, 1e-06  ;;  %v6590_v8 = vor.u32 %v7864_v62, %v6589_v60  ;;  %v5527_v60 = vld [vmem:[%s11991_s3 + $0x3fc] sm:$0xf0] }
 0x14f   :  { %4274 = vmatpush.bf16.msra.mxu2 %v6282_v18  ;;  %v5830_v18 = vor.u32 %v7674_v10, %v5829_v9  ;;  %v6135_v2 = vld [vmem:[%s11991_s3 + $0x8bc] sm:$0xf0]  ;;  %v7912_v9 = vld [vmem:[%s11991_s3 + $0xdcc] sm:$0xf]  ;;  %v6819_v10 = vld [vmem:[%s11991_s3 + $0xe14] sm:$0xf0] }
 0x150   :  { %4287 = vmatpush.bf16.msra.mxu3 %v6890_v21  ;;  %v4962_v11 = vmin.f32 %v4943_v3, 0.999999  ;;  %v4043_v21 = vadd.f32 %v4042_v58, %v770_v7  ;;  %v5606_v58 = vor.u32 %v7608_v43, %v5603_v44  ;;  %v6285_v3 = vld [vmem:[%s11991_s3 + $0x9a0] sm:$0xf]  ;;  %v7940_v7 = vld [vmem:[%s11991_s3 + $0xea8] sm:$0xf0]  ;;  %v5378_v44 = vor.u32 %v7551_v34, %v5375_v35 }
 0x151   :  { %4294 = vmatpush.bf16.msrb.mxu0 %v5526_v14  ;;  %4307 = vmatpush.bf16.msrb.mxu1 %v6134_v17  ;;  %v7845_v14 = vld [vmem:[%s11991_s3 + $0xbb0] sm:$0xf0]  ;;  %v4044_v25 = vpop.f32.mrf.mxu0  ;;  %v5071_v34 = vld [vmem:[%s11991_s3 + $0x6c] sm:$0xf0]  ;;  %v7627_v35 = vld [vmem:[%s11991_s3 + $0x4e4] sm:$0xf] }
 0x152   :  { %4275 = vmatmul.bf16.vlgmr.msra.gmra.mxu2 %v8649_v55  ;;  %v7997_v17 = vld [vmem:[%s11991_s3 + $0x1070] sm:$0xf0]  ;;  %4981 = vst [vmem:[#allocation2 + $0x10] sm:$0xff] %v4962_v11  ;;  %v4056_v41 = vadd.f32 %v4055_v63, %v4043_v21  ;;  %v6214_v63 = vor.u32 %v7760_v45, %v6211_v48  ;;  %v7722_v21 = vld [vmem:[%s11991_s3 + $0x7dc] sm:$0xf] }
 0x153   :  { %4319 = vmatpush.bf16.msrb.mxu2 %v6818_v22  ;;  %4288 = vmatmul.bf16.vlgmr.msra.gmra.mxu3 %v8660_v61  ;;  %v6514_v22 = vor.u32 %v7845_v14, %v6513_v13  ;;  %v7122_v26 = vor.u32 %v7997_v17, %v7121_v16  ;;  %v4057_v31 = vpop.f32.mrf.mxu1  ;;  %v7427_v13 = vld [vmem:[%s11991_s3 + $0x12d4] sm:$0xf0]  ;;  %v6138_v14 = vor.u32 %v7741_v1, %v6135_v2  ;;  %v7570_v16 = vld [vmem:[%s11991_s3 + $0x31c] sm:$0xf]  ;;  %v5451_v17 = vld [vmem:[%s11991_s3 + $0x364] sm:$0xf0] }
 0x154   :  { %4332 = vmatpush.bf16.msrb.mxu3 %v7426_v27  ;;  %v6437_v27 = vld [vmem:[%s11991_s3 + $0xad0] sm:$0xf]  ;;  %v7893_v25 = vld [vmem:[%s11991_s3 + $0xd34] sm:$0xf]  ;;  %v7351_v31 = vld [vmem:[%s11991_s3 + $0x123c] sm:$0xf0] }
 0x155   :  { %4295 = vmatpush.bf16.msrb.mxu0 %v5450_v32  ;;  %4308 = vmatpush.bf16.msrb.mxu1 %v6058_v36  ;;  %v5146_v32 = vor.u32 %v7503_v20, %v5145_v19  ;;  %v5069_v36 = vld [vmem:[%s11991_s3 + $0x20] sm:$0xf]  ;;  %v6894_v19 = vor.u32 %v7940_v7, %v6893_v6  ;;  %v6822_v20 = vor.u32 %v7912_v9, %v6819_v10  ;;  %v8026_v45 = vld [vmem:[%s11991_s3 + $0x115c] sm:$0xf]  ;;  %v7532_v48 = vld [vmem:[%s11991_s3 + $0x1ec] sm:$0xf] }
 0x156   :  { %v4081_v52 = vpop.f32.mrf.mxu3  ;;  %v771_v1 = vperm.slane %v9462_v29, 4  ;;  %v7665_v7 = vld [vmem:[%s11991_s3 + $0x614] sm:$0xf]  ;;  %v5831_v29 = vld [vmem:[%s11991_s3 + $0x65c] sm:$0xf0] }
 0x157   :  { %4320 = vmatpush.bf16.msrb.mxu2 %v6742_v39  ;;  %v5677_v39 = vld [vmem:[%s11991_s3 + $0x4e0] sm:$0xf]  ;;  %v7836_v9 = vld [vmem:[%s11991_s3 + $0xb6c] sm:$0xf]  ;;  %v6515_v10 = vld [vmem:[%s11991_s3 + $0xbb4] sm:$0xf0] }
 0x158   :  { %4333 = vmatpush.bf16.msrb.mxu3 %v7350_v42  ;;  %v6438_v42 = vor.u32 %v7826_v30, %v6437_v27  ;;  %v5678_v57 = vor.u32 %v7636_v40, %v5677_v39  ;;  %v5454_v27 = vor.u32 %v7570_v16, %v5451_v17  ;;  %v8045_v30 = vld [vmem:[%s11991_s3 + $0x11f4] sm:$0xf]  ;;  %v5147_v16 = vld [vmem:[%s11991_s3 + $0x104] sm:$0xf0] }
 0x159   :  { %4296 = vmatpush.bf16.msrb.mxu0 %v5374_v46  ;;  %4309 = vmatpush.bf16.msrb.mxu1 %v5982_v50  ;;  %v4068_v46 = vpop.f32.mrf.mxu2  ;;  %v7807_v50 = vld [vmem:[%s11991_s3 + $0xa80] sm:$0xf0]  ;;  %v7354_v40 = vor.u32 %v8045_v30, %v7351_v31  ;;  %v7047_v30 = vld [vmem:[%s11991_s3 + $0xfdc] sm:$0xf0] }
 0x15a   :  { %v4069_v51 = vadd.f32 %v4068_v46, %v4056_v41  ;;  %v7874_v41 = vld [vmem:[%s11991_s3 + $0xc9c] sm:$0xf]  ;;  %v7275_v46 = vld [vmem:[%s11991_s3 + $0x11a4] sm:$0xf0]  ;;  %v7475_v31 = vld [vmem:[%s11991_s3 + $0x24] sm:$0xf] }
 0x15b   :  { %4321 = vmatpush.bf16.msrb.mxu2 %v6666_v53  ;;  %v5070_v53 = vor.u32 %v7484_v38, %v5069_v36  ;;  %v5983_v38 = vld [vmem:[%s11991_s3 + $0x78c] sm:$0xf0] }
 0x15c   :  { %4334 = vmatpush.bf16.msrb.mxu3 %v7274_v59  ;;  %v7589_v59 = vld [vmem:[%s11991_s3 + $0x3b4] sm:$0xf]  ;;  %v4082_v62 = vadd.f32 %v4081_v52, %v4069_v51  ;;  %v7684_v52 = vld [vmem:[%s11991_s3 + $0x6ac] sm:$0xf] }
 0x15d   :  { %4297 = vmatpush.bf16.msrb.mxu0 %v5298_v0  ;;  %4310 = vmatpush.bf16.msrb.mxu1 %v5906_v4  ;;  %v6362_v0 = vor.u32 %v7807_v50, %v6361_v49  ;;  %v6970_v4 = vor.u32 %v7959_v56, %v6969_v54  ;;  %v5530_v11 = vor.u32 %v7589_v59, %v5527_v60  ;;  %v5299_v49 = vld [vmem:[%s11991_s3 + $0x234] sm:$0xf0] }
 0x15e   :  { %v4083_v23 = vpop.f32.mrf.mxu3  ;;  %v7278_v56 = vor.u32 %v8026_v45, %v7275_v46  ;;  %v7798_v45 = vld [vmem:[%s11991_s3 + $0xa3c] sm:$0xf]  ;;  %v6363_v46 = vld [vmem:[%s11991_s3 + $0xa84] sm:$0xf0] }
 0x15f   :  { %4322 = vmatpush.bf16.msrb.mxu2 %v6590_v8  ;;  %v4868_v8 = vmul.f32 0.5, %v4082_v62  ;;  %v5302_v62 = vor.u32 %v7532_v48, %v5299_v49  ;;  %v7817_v23 = vld [vmem:[%s11991_s3 + $0xad4] sm:$0xf]  ;;  %v5074_v49 = vor.u32 %v7475_v31, %v5071_v34  ;;  %v5989_v31 = vld [vmem:[%s11991_s3 + $0x748] sm:$0xf] }
 0x160   :  { %4335 = vmatpush.bf16.msrb.mxu3 %v7198_v12  ;;  %v8064_v12 = vld [vmem:[%s11991_s3 + $0x128c] sm:$0xf] }
 0x161   :  { %4298 = vmatpush.bf16.msrb.mxu0 %v5222_v15  ;;  %4311 = vmatpush.bf16.msrb.mxu1 %v5830_v18  ;;  %8086 = vtanh.f32 %v4868_v8  ;;  %v6286_v15 = vor.u32 %v7788_v5, %v6285_v3  ;;  %v4070_v18 = vpop.f32.mrf.mxu2  ;;  %v7430_v24 = vor.u32 %v8064_v12, %v7427_v13  ;;  %v7513_v3 = vld [vmem:[%s11991_s3 + $0x154] sm:$0xf]  ;;  %v7988_v12 = vld [vmem:[%s11991_s3 + $0x102c] sm:$0xf]  ;;  %v7123_v13 = vld [vmem:[%s11991_s3 + $0x1074] sm:$0xf0] }
 0x162   :  { %v6518_v18 = vor.u32 %v7836_v9, %v6515_v10 }
 0x163   :  { %4323 = vmatpush.bf16.msrb.mxu2 %v6514_v22  ;;  %v6059_v22 = vld [vmem:[%s11991_s3 + $0x824] sm:$0xf0] }
 0x164   :  { %4336 = vmatpush.bf16.msrb.mxu3 %v7122_v26  ;;  %v6743_v26 = vld [vmem:[%s11991_s3 + $0xd7c] sm:$0xf0] }
 0x165   :  { %4299 = vmatpush.bf16.msrb.mxu0 %v5146_v32  ;;  %4312 = vmatpush.bf16.msrb.mxu1 %v5754_v37  ;;  %v6062_v32 = vor.u32 %v7722_v21, %v6059_v22  ;;  %v6746_v36 = vor.u32 %v7893_v25, %v6743_v26  ;;  %v7703_v37 = vld [vmem:[%s11991_s3 + $0x744] sm:$0xf]  ;;  %v7126_v22 = vor.u32 %v7988_v12, %v7123_v13  ;;  %v7580_v12 = vld [vmem:[%s11991_s3 + $0x368] sm:$0xf0] }
 0x167   :  { %4324 = vmatpush.bf16.msrb.mxu2 %v6438_v42  ;;  %v8087_v39 = vpop.eup %8086  ;;  %v6667_v42 = vld [vmem:[%s11991_s3 + $0xce4] sm:$0xf0] }
 0x168   :  { %4337 = vmatpush.bf16.msrb.mxu3 %v7046_v47  ;;  %v4906_v43 = vmul.f32 0.5, %v8087_v39  ;;  %v5986_v47 = vor.u32 %v7703_v37, %v5983_v38  ;;  %v6670_v51 = vor.u32 %v7874_v41, %v6667_v42  ;;  %v5609_v39 = vld [vmem:[%s11991_s3 + $0x450] sm:$0xf] }
 0x169   :  { %4300 = vmatpush.bf16.msrb.mxu0 %v5070_v53  ;;  %4313 = vmatpush.bf16.msrb.mxu1 %v5678_v57  ;;  %v5907_v53 = vld [vmem:[%s11991_s3 + $0x6f4] sm:$0xf0]  ;;  %v4094_v54 = vpop.f32.mrf.mxu0  ;;  %v7855_v57 = vld [vmem:[%s11991_s3 + $0xc04] sm:$0xf]  ;;  %v6217_v41 = vld [vmem:[%s11991_s3 + $0x910] sm:$0xf] }
 0x16a   :  { %v4925_v50 = vadd.f32 0.5, %v4906_v43  ;;  %v5910_v2 = vor.u32 %v7684_v52, %v5907_v53  ;;  %v4095_v17 = vadd.f32 %v4094_v54, %v771_v1  ;;  %v5533_v54 = vld [vmem:[%s11991_s3 + $0x3b8] sm:$0xf]  ;;  %v6287_v1 = vld [vmem:[%s11991_s3 + $0x9ec] sm:$0xf0] }
 0x16b   :  { %4325 = vmatpush.bf16.msrb.mxu2 %v6362_v0  ;;  %v4107_v60 = vpop.f32.mrf.mxu1  ;;  %v7199_v0 = vld [vmem:[%s11991_s3 + $0x110c] sm:$0xf0] }
 0x16c   :  { %4338 = vmatpush.bf16.msrb.mxu3 %v6970_v4  ;;  %4301 = vmatmul.bf16.vlgmr.msrb.gmra.mxu0 %v8607_v28  ;;  %v4944_v59 = vmax.f32 %v4925_v50, 1e-06  ;;  %v5223_v4 = vld [vmem:[%s11991_s3 + $0x19c] sm:$0xf0]  ;;  %v4108_v37 = vadd.f32 %v4107_v60, %v4095_v17  ;;  %v7950_v50 = vld [vmem:[%s11991_s3 + $0xefc] sm:$0xf] }
 0x16d   :  { %4345 = vmatpush.bf16.msra.mxu0 %v5606_v58  ;;  %4358 = vmatpush.bf16.msra.mxu1 %v6214_v63  ;;  %v6591_v58 = vld [vmem:[%s11991_s3 + $0xc4c] sm:$0xf0]  ;;  %v8007_v63 = vld [vmem:[%s11991_s3 + $0x10c4] sm:$0xf]  ;;  %v6141_v60 = vld [vmem:[%s11991_s3 + $0x878] sm:$0xf] }
 0x16e   :  { %4314 = vmatmul.bf16.vlgmr.msrb.gmra.mxu1 %v8615_v33  ;;  %v4963_v5 = vmin.f32 %v4944_v59, 0.999999  ;;  %v6594_v6 = vor.u32 %v7855_v57, %v6591_v58  ;;  %v7202_v8 = vor.u32 %v8007_v63, %v7199_v0  ;;  %v6366_v59 = vor.u32 %v7798_v45, %v6363_v46  ;;  %v7779_v63 = vld [vmem:[%s11991_s3 + $0x9a4] sm:$0xf]  ;;  %v7732_v17 = vld [vmem:[%s11991_s3 + $0x828] sm:$0xf0] }
 0x16f   :  { %4326 = vmatpush.bf16.msrb.mxu2 %v6286_v15  ;;  %v7494_v15 = vld [vmem:[%s11991_s3 + $0xbc] sm:$0xf]  ;;  %v6290_v10 = vor.u32 %v7779_v63, %v6287_v1  ;;  %v5229_v63 = vld [vmem:[%s11991_s3 + $0x158] sm:$0xf] }
 0x170   :  { %4339 = vmatpush.bf16.msrb.mxu3 %v6894_v19  ;;  %4982 = vst [vmem:[#allocation2 + $0x18] sm:$0xff] %v4963_v5  ;;  %v7646_v19 = vld [vmem:[%s11991_s3 + $0x57c] sm:$0xf]  ;;  %v5150_v26 = vor.u32 %v7494_v15, %v5147_v16  ;;  %v6825_v5 = vld [vmem:[%s11991_s3 + $0xdd0] sm:$0xf] }
 0x171   :  { %4346 = vmatpush.bf16.msra.mxu0 %v5530_v11  ;;  %4359 = vmatpush.bf16.msra.mxu1 %v6138_v14  ;;  %v5226_v11 = vor.u32 %v7513_v3, %v5223_v4  ;;  %v5834_v14 = vor.u32 %v7665_v7, %v5831_v29  ;;  %v4096_v21 = vpop.f32.mrf.mxu0  ;;  %v6895_v3 = vld [vmem:[%s11991_s3 + $0xeac] sm:$0xf0]  ;;  %v6065_v16 = vld [vmem:[%s11991_s3 + $0x7e0] sm:$0xf] }
 0x172   :  { %4327 = vmatmul.bf16.vlgmr.msrb.gmra.mxu2 %v8649_v55  ;;  %v7433_v29 = vld [vmem:[%s11991_s3 + $0x1290] sm:$0xf]  ;;  %v7903_v21 = vld [vmem:[%s11991_s3 + $0xd80] sm:$0xf0] }
 0x173   :  { %4371 = vmatpush.bf16.msra.mxu2 %v6822_v20  ;;  %4340 = vmatmul.bf16.vlgmr.msrb.gmra.mxu3 %v8660_v61  ;;  %v5755_v20 = vld [vmem:[%s11991_s3 + $0x5c4] sm:$0xf0]  ;;  %v4109_v25 = vpop.f32.mrf.mxu1 }
 0x174   :  { %4384 = vmatpush.bf16.msra.mxu3 %v7430_v24  ;;  %v6439_v24 = vld [vmem:[%s11991_s3 + $0xb1c] sm:$0xf0]  ;;  %v6066_v25 = vor.u32 %v7732_v17, %v6065_v16  ;;  %v7656_v16 = vld [vmem:[%s11991_s3 + $0x5c8] sm:$0xf0] }
 0x175   :  { %4347 = vmatpush.bf16.msra.mxu0 %v5454_v27  ;;  %4360 = vmatpush.bf16.msra.mxu1 %v6062_v32  ;;  %v7969_v27 = vld [vmem:[%s11991_s3 + $0xf94] sm:$0xf]  ;;  %v5758_v32 = vor.u32 %v7646_v19, %v5755_v20  ;;  %v6442_v38 = vor.u32 %v7817_v23, %v6439_v24  ;;  %v4120_v42 = vpop.f32.mrf.mxu2  ;;  %v6749_v20 = vld [vmem:[%s11991_s3 + $0xd38] sm:$0xf]  ;;  %v8055_v24 = vld [vmem:[%s11991_s3 + $0x1240] sm:$0xf0] }
 0x176   :  { %v7050_v43 = vor.u32 %v7969_v27, %v7047_v30  ;;  %v4133_v48 = vpop.f32.mrf.mxu3  ;;  %v7357_v23 = vld [vmem:[%s11991_s3 + $0x11f8] sm:$0xf]  ;;  %v7561_v27 = vld [vmem:[%s11991_s3 + $0x2d0] sm:$0xf0]  ;;  %v6750_v30 = vor.u32 %v7903_v21, %v6749_v20  ;;  %v7827_v20 = vld [vmem:[%s11991_s3 + $0xb20] sm:$0xf0] }
 0x177   :  { %4372 = vmatpush.bf16.msra.mxu2 %v6746_v36  ;;  %v5679_v36 = vld [vmem:[%s11991_s3 + $0x52c] sm:$0xf0] }
 0x178   :  { %4385 = vmatpush.bf16.msra.mxu3 %v7354_v40  ;;  %v7618_v40 = vld [vmem:[%s11991_s3 + $0x498] sm:$0xf0]  ;;  %v5682_v52 = vor.u32 %v7627_v35, %v5679_v36  ;;  %v7358_v35 = vor.u32 %v8055_v24, %v7357_v23  ;;  %v6673_v36 = vld [vmem:[%s11991_s3 + $0xca0] sm:$0xf]  ;;  %v7053_v23 = vld [vmem:[%s11991_s3 + $0xf98] sm:$0xf] }
 0x179   :  { %4348 = vmatpush.bf16.msra.mxu0 %v5378_v44  ;;  %4361 = vmatpush.bf16.msra.mxu1 %v5986_v47  ;;  %v7770_v44 = vld [vmem:[%s11991_s3 + $0x958] sm:$0xf0]  ;;  %v4121_v47 = vadd.f32 %v4120_v42, %v4108_v37  ;;  %v5610_v53 = vor.u32 %v7618_v40, %v5609_v39  ;;  %v7884_v37 = vld [vmem:[%s11991_s3 + $0xce8] sm:$0xf0]  ;;  %v7281_v40 = vld [vmem:[%s11991_s3 + $0x1160] sm:$0xf] }
 0x17a   :  { %v6218_v58 = vor.u32 %v7770_v44, %v6217_v41  ;;  %v8036_v41 = vld [vmem:[%s11991_s3 + $0x11a8] sm:$0xf0]  ;;  %v7542_v44 = vld [vmem:[%s11991_s3 + $0x238] sm:$0xf0]  ;;  %v6674_v46 = vor.u32 %v7884_v37, %v6673_v36  ;;  %v7979_v24 = vld [vmem:[%s11991_s3 + $0xfe0] sm:$0xf0] }
 0x17b   :  { %4373 = vmatpush.bf16.msra.mxu2 %v6670_v51  ;;  %v6971_v51 = vld [vmem:[%s11991_s3 + $0xf44] sm:$0xf0]  ;;  %v4134_v57 = vadd.f32 %v4133_v48, %v4121_v47  ;;  %v5913_v47 = vld [vmem:[%s11991_s3 + $0x6b0] sm:$0xf]  ;;  %v7694_v48 = vld [vmem:[%s11991_s3 + $0x6f8] sm:$0xf0] }
 0x17c   :  { %4386 = vmatpush.bf16.msra.mxu3 %v7278_v56  ;;  %v7599_v56 = vld [vmem:[%s11991_s3 + $0x400] sm:$0xf0]  ;;  %v6974_v0 = vor.u32 %v7950_v50, %v6971_v51  ;;  %v7282_v50 = vor.u32 %v8036_v41, %v7281_v40  ;;  %v6597_v51 = vld [vmem:[%s11991_s3 + $0xc08] sm:$0xf]  ;;  %v5611_v36 = vld [vmem:[%s11991_s3 + $0x49c] sm:$0xf0] }
 0x17d   :  { %4349 = vmatpush.bf16.msra.mxu0 %v5302_v62  ;;  %4362 = vmatpush.bf16.msra.mxu1 %v5910_v2  ;;  %v7751_v62 = vld [vmem:[%s11991_s3 + $0x8c0] sm:$0xf0]  ;;  %v4869_v4 = vmul.f32 0.5, %v4134_v57  ;;  %v5534_v7 = vor.u32 %v7599_v56, %v5533_v54  ;;  %v4122_v13 = vpop.f32.mrf.mxu2  ;;  %v7205_v57 = vld [vmem:[%s11991_s3 + $0x10c8] sm:$0xf] }
 0x17e   :  { %v7931_v2 = vld [vmem:[%s11991_s3 + $0xe64] sm:$0xf]  ;;  %v6142_v9 = vor.u32 %v7751_v62, %v6141_v60  ;;  %v5914_v62 = vor.u32 %v7694_v48, %v5913_v47  ;;  %v7761_v37 = vld [vmem:[%s11991_s3 + $0x914] sm:$0xf]  ;;  %v6219_v40 = vld [vmem:[%s11991_s3 + $0x95c] sm:$0xf0] }
 0x17f   :  { %4374 = vmatpush.bf16.msra.mxu2 %v6594_v6  ;;  %v7922_v6 = vld [vmem:[%s11991_s3 + $0xe18] sm:$0xf0]  ;;  %8088 = vtanh.f32 %v4869_v4  ;;  %v7675_v4 = vld [vmem:[%s11991_s3 + $0x660] sm:$0xf0]  ;;  %v6369_v41 = vld [vmem:[%s11991_s3 + $0xa40] sm:$0xf] }
 0x180   :  { %4387 = vmatpush.bf16.msra.mxu3 %v7202_v8  ;;  %v8074_v8 = vld [vmem:[%s11991_s3 + $0x12d8] sm:$0xf0]  ;;  %v6826_v15 = vor.u32 %v7922_v6, %v6825_v5  ;;  %v6521_v6 = vld [vmem:[%s11991_s3 + $0xb70] sm:$0xf]  ;;  %v7960_v47 = vld [vmem:[%s11991_s3 + $0xf48] sm:$0xf0] }
 0x181   :  { %4350 = vmatpush.bf16.msra.mxu0 %v5226_v11  ;;  %4363 = vmatpush.bf16.msra.mxu1 %v5834_v14  ;;  %v5457_v11 = vld [vmem:[%s11991_s3 + $0x320] sm:$0xf]  ;;  %v6898_v14 = vor.u32 %v7931_v2, %v6895_v3  ;;  %v7434_v19 = vor.u32 %v8074_v8, %v7433_v29  ;;  %v5837_v3 = vld [vmem:[%s11991_s3 + $0x618] sm:$0xf]  ;;  %v7129_v8 = vld [vmem:[%s11991_s3 + $0x1030] sm:$0xf] }
 0x183   :  { %4375 = vmatpush.bf16.msra.mxu2 %v6518_v18  ;;  %v4135_v18 = vpop.f32.mrf.mxu3 }
 0x184   :  { %4388 = vmatpush.bf16.msra.mxu3 %v7126_v22  ;;  %v5458_v22 = vor.u32 %v7580_v12, %v5457_v11  ;;  %v5153_v11 = vld [vmem:[%s11991_s3 + $0xc0] sm:$0xf]  ;;  %v7504_v12 = vld [vmem:[%s11991_s3 + $0x108] sm:$0xf0] }
 0x185   :  { %4351 = vmatpush.bf16.msra.mxu0 %v5150_v26  ;;  %4364 = vmatpush.bf16.msra.mxu1 %v5758_v32  ;;  %v5381_v26 = vld [vmem:[%s11991_s3 + $0x288] sm:$0xf]  ;;  %v7713_v32 = vld [vmem:[%s11991_s3 + $0x790] sm:$0xf0]  ;;  %v8089_v34 = vpop.eup %8088 }
 0x186   :  { %v5382_v39 = vor.u32 %v7561_v27, %v5381_v26  ;;  %v5990_v42 = vor.u32 %v7713_v32, %v5989_v31  ;;  %v7485_v27 = vld [vmem:[%s11991_s3 + $0x70] sm:$0xf0] }
 0x187   :  { %4376 = vmatpush.bf16.msra.mxu2 %v6442_v38  ;;  %v4907_v38 = vmul.f32 0.5, %v8089_v34  ;;  %v7637_v31 = vld [vmem:[%s11991_s3 + $0x530] sm:$0xf0] }
 0x188   :  { %4389 = vmatpush.bf16.msra.mxu3 %v7050_v43  ;;  %v5305_v43 = vld [vmem:[%s11991_s3 + $0x1f0] sm:$0xf] }
 0x189   :  { %4352 = vmatpush.bf16.msra.mxu0 %v5074_v49  ;;  %4365 = vmatpush.bf16.msra.mxu1 %v5682_v52  ;;  %v4926_v45 = vadd.f32 0.5, %v4907_v38  ;;  %v4146_v49 = vpop.f32.mrf.mxu0  ;;  %v7865_v52 = vld [vmem:[%s11991_s3 + $0xc50] sm:$0xf0]  ;;  %v5306_v56 = vor.u32 %v7542_v44, %v5305_v43 }
 0x18a   :  { %v6598_v2 = vor.u32 %v7865_v52, %v6597_v51  ;;  %v5535_v51 = vld [vmem:[%s11991_s3 + $0x404] sm:$0xf0] }
 0x18b   :  { %4377 = vmatpush.bf16.msra.mxu2 %v6366_v59  ;;  %v4159_v54 = vpop.f32.mrf.mxu1  ;;  %v10303_v59 = vld [vmem:[%s11992_s4] sm:$0xff] }
 0x18c   :  { %4390 = vmatpush.bf16.msra.mxu3 %v6974_v0  ;;  %4353 = vmatmul.bf16.vlgmr.msra.gmra.mxu0 %v8607_v28  ;;  %v772_v60 = vperm.slane %v10303_v59, 5  ;;  %v7523_v0 = vld [vmem:[%s11991_s3 + $0x1a0] sm:$0xf0] }
 0x18d   :  { %4397 = vmatpush.bf16.msrb.mxu0 %v5610_v53  ;;  %4410 = vmatpush.bf16.msrb.mxu1 %v6218_v58  ;;  %v4945_v53 = vmax.f32 %v4926_v45, 1e-06  ;;  %v8017_v58 = vld [vmem:[%s11991_s3 + $0x1110] sm:$0xf0]  ;;  %v5230_v29 = vor.u32 %v7523_v0, %v5229_v63  ;;  %v6901_v63 = vld [vmem:[%s11991_s3 + $0xe68] sm:$0xf] }
 0x18e   :  { %4366 = vmatmul.bf16.vlgmr.msra.gmra.mxu1 %v8615_v33  ;;  %v7206_v5 = vor.u32 %v8017_v58, %v7205_v57  ;;  %v4147_v13 = vadd.f32 %v4146_v49, %v772_v60  ;;  %v6143_v57 = vld [vmem:[%s11991_s3 + $0x8c4] sm:$0xf0]  ;;  %v7941_v0 = vld [vmem:[%s11991_s3 + $0xeb0] sm:$0xf0] }
 0x18f   :  { %4378 = vmatpush.bf16.msra.mxu2 %v6290_v10  ;;  %v4964_v1 = vmin.f32 %v4945_v53, 0.999999  ;;  %v5838_v10 = vor.u32 %v7675_v4, %v5837_v3  ;;  %v6222_v53 = vor.u32 %v7761_v37, %v6219_v40  ;;  %v6293_v58 = vld [vmem:[%s11991_s3 + $0x9a8] sm:$0xf]  ;;  %v6827_v3 = vld [vmem:[%s11991_s3 + $0xe1c] sm:$0xf0] }
 0x190   :  { %4391 = vmatpush.bf16.msra.mxu3 %v6898_v14  ;;  %v4160_v32 = vadd.f32 %v4159_v54, %v4147_v13  ;;  %v7723_v13 = vld [vmem:[%s11991_s3 + $0x7e4] sm:$0xf]  ;;  %v7533_v40 = vld [vmem:[%s11991_s3 + $0x1f4] sm:$0xf] }
 0x191   :  { %4398 = vmatpush.bf16.msrb.mxu0 %v5534_v7  ;;  %4411 = vmatpush.bf16.msrb.mxu1 %v6142_v9  ;;  %v7846_v7 = vld [vmem:[%s11991_s3 + $0xbb8] sm:$0xf0]  ;;  %4983 = vst [vmem:[#allocation2 + $0x20] sm:$0xff] %v4964_v1  ;;  %v4148_v17 = vpop.f32.mrf.mxu0  ;;  %v8027_v37 = vld [vmem:[%s11991_s3 + $0x1164] sm:$0xf] }
 0x192   :  { %4379 = vmatmul.bf16.vlgmr.msra.gmra.mxu2 %v8649_v55  ;;  %v7998_v9 = vld [vmem:[%s11991_s3 + $0x1078] sm:$0xf0]  ;;  %v6522_v14 = vor.u32 %v7846_v7, %v6521_v6  ;;  %v7435_v6 = vld [vmem:[%s11991_s3 + $0x12dc] sm:$0xf0] }
 0x193   :  { %4423 = vmatpush.bf16.msrb.mxu2 %v6826_v15  ;;  %4392 = vmatmul.bf16.vlgmr.msra.gmra.mxu3 %v8660_v61  ;;  %v5761_v15 = vld [vmem:[%s11991_s3 + $0x580] sm:$0xf]  ;;  %v7130_v18 = vor.u32 %v7998_v9, %v7129_v8  ;;  %v4161_v21 = vpop.f32.mrf.mxu1  ;;  %v7571_v8 = vld [vmem:[%s11991_s3 + $0x324] sm:$0xf]  ;;  %v5459_v9 = vld [vmem:[%s11991_s3 + $0x36c] sm:$0xf0] }
 0x194   :  { %4436 = vmatpush.bf16.msrb.mxu3 %v7434_v19  ;;  %v6445_v19 = vld [vmem:[%s11991_s3 + $0xad8] sm:$0xf]  ;;  %v5762_v26 = vor.u32 %v7656_v16, %v5761_v15  ;;  %v7894_v17 = vld [vmem:[%s11991_s3 + $0xd3c] sm:$0xf]  ;;  %v7359_v21 = vld [vmem:[%s11991_s3 + $0x1244] sm:$0xf0] }
 0x195   :  { %4399 = vmatpush.bf16.msrb.mxu0 %v5458_v22  ;;  %4412 = vmatpush.bf16.msrb.mxu1 %v6066_v25  ;;  %v5154_v22 = vor.u32 %v7504_v12, %v5153_v11  ;;  %v5077_v25 = vld [vmem:[%s11991_s3 + $0x28] sm:$0xf]  ;;  %v6446_v34 = vor.u32 %v7827_v20, %v6445_v19  ;;  %v4172_v38 = vpop.f32.mrf.mxu2  ;;  %v6902_v11 = vor.u32 %v7941_v0, %v6901_v63  ;;  %v8046_v20 = vld [vmem:[%s11991_s3 + $0x11fc] sm:$0xf] }
 0x196   :  { %v4173_v43 = vadd.f32 %v4172_v38, %v4160_v32  ;;  %v4185_v44 = vpop.f32.mrf.mxu3  ;;  %v5078_v45 = vor.u32 %v7485_v27, %v5077_v25  ;;  %v5462_v19 = vor.u32 %v7571_v8, %v5459_v9  ;;  %v5991_v27 = vld [vmem:[%s11991_s3 + $0x794] sm:$0xf0]  ;;  %v7875_v32 = vld [vmem:[%s11991_s3 + $0xca4] sm:$0xf]  ;;  %v7283_v38 = vld [vmem:[%s11991_s3 + $0x11ac] sm:$0xf0] }
 0x197   :  { %4424 = vmatpush.bf16.msrb.mxu2 %v6750_v30  ;;  %v5685_v30 = vld [vmem:[%s11991_s3 + $0x4e8] sm:$0xf]  ;;  %v7666_v0 = vld [vmem:[%s11991_s3 + $0x61c] sm:$0xf]  ;;  %v7495_v8 = vld [vmem:[%s11991_s3 + $0xc4] sm:$0xf] }
 0x198   :  { %4437 = vmatpush.bf16.msrb.mxu3 %v7358_v35  ;;  %v7609_v35 = vld [vmem:[%s11991_s3 + $0x454] sm:$0xf]  ;;  %v5686_v48 = vor.u32 %v7637_v31, %v5685_v30  ;;  %v4186_v52 = vadd.f32 %v4185_v44, %v4173_v43  ;;  %v7362_v31 = vor.u32 %v8046_v20, %v7359_v21  ;;  %v5155_v9 = vld [vmem:[%s11991_s3 + $0x10c] sm:$0xf0]  ;;  %v7970_v20 = vld [vmem:[%s11991_s3 + $0xf9c] sm:$0xf] }
 0x199   :  { %4400 = vmatpush.bf16.msrb.mxu0 %v5382_v39  ;;  %4413 = vmatpush.bf16.msrb.mxu1 %v5990_v42  ;;  %v7054_v39 = vor.u32 %v7979_v24, %v7053_v23  ;;  %v7808_v42 = vld [vmem:[%s11991_s3 + $0xa88] sm:$0xf0]  ;;  %v5614_v49 = vor.u32 %v7609_v35, %v5611_v36  ;;  %v5383_v24 = vld [vmem:[%s11991_s3 + $0x2d4] sm:$0xf0]  ;;  %v7685_v44 = vld [vmem:[%s11991_s3 + $0x6b4] sm:$0xf] }
 0x19a   :  { %v6370_v54 = vor.u32 %v7808_v42, %v6369_v41  ;;  %v4870_v1 = vmul.f32 0.5, %v4186_v52  ;;  %v7552_v23 = vld [vmem:[%s11991_s3 + $0x28c] sm:$0xf]  ;;  %v5307_v41 = vld [vmem:[%s11991_s3 + $0x23c] sm:$0xf0] }
 0x19b   :  { %4425 = vmatpush.bf16.msrb.mxu2 %v6674_v46  ;;  %v6977_v46 = vld [vmem:[%s11991_s3 + $0xf00] sm:$0xf]  ;;  %v5386_v36 = vor.u32 %v7552_v23, %v5383_v24  ;;  %v5310_v52 = vor.u32 %v7533_v40, %v5307_v41  ;;  %v7055_v21 = vld [vmem:[%s11991_s3 + $0xfe4] sm:$0xf0]  ;;  %v5079_v24 = vld [vmem:[%s11991_s3 + $0x74] sm:$0xf0] }
 0x19c   :  { %4438 = vmatpush.bf16.msrb.mxu3 %v7282_v50  ;;  %v7590_v50 = vld [vmem:[%s11991_s3 + $0x3bc] sm:$0xf]  ;;  %v6978_v60 = vor.u32 %v7960_v47, %v6977_v46  ;;  %8090 = vtanh.f32 %v4870_v1  ;;  %v7286_v47 = vor.u32 %v8027_v37, %v7283_v38  ;;  %v5839_v1 = vld [vmem:[%s11991_s3 + $0x664] sm:$0xf0]  ;;  %v7771_v37 = vld [vmem:[%s11991_s3 + $0x960] sm:$0xf0] }
 0x19d   :  { %4401 = vmatpush.bf16.msrb.mxu0 %v5306_v56  ;;  %4414 = vmatpush.bf16.msrb.mxu1 %v5914_v62  ;;  %v7742_v56 = vld [vmem:[%s11991_s3 + $0x87c] sm:$0xf]  ;;  %v7789_v62 = vld [vmem:[%s11991_s3 + $0x9f0] sm:$0xf0]  ;;  %v5538_v4 = vor.u32 %v7590_v50, %v5535_v51  ;;  %v7799_v38 = vld [vmem:[%s11991_s3 + $0xa44] sm:$0xf] }
 0x19e   :  { %v6146_v7 = vor.u32 %v7742_v56, %v6143_v57  ;;  %v4187_v15 = vpop.f32.mrf.mxu3  ;;  %v773_v56 = vperm.slane %v10303_v59, 6 }
 0x19f   :  { %4426 = vmatpush.bf16.msrb.mxu2 %v6598_v2  ;;  %v7913_v2 = vld [vmem:[%s11991_s3 + $0xdd4] sm:$0xf] }
 0x1a0   :  { %4439 = vmatpush.bf16.msrb.mxu3 %v7206_v5  ;;  %v8065_v5 = vld [vmem:[%s11991_s3 + $0x1294] sm:$0xf]  ;;  %v6830_v12 = vor.u32 %v7913_v2, %v6827_v3 }
 0x1a1   :  { %4402 = vmatpush.bf16.msrb.mxu0 %v5230_v29  ;;  %4415 = vmatpush.bf16.msrb.mxu1 %v5838_v10  ;;  %v6294_v29 = vor.u32 %v7789_v62, %v6293_v58  ;;  %v4174_v10 = vpop.f32.mrf.mxu2  ;;  %v7438_v16 = vor.u32 %v8065_v5, %v7435_v6  ;;  %v7514_v58 = vld [vmem:[%s11991_s3 + $0x15c] sm:$0xf]  ;;  %v7837_v3 = vld [vmem:[%s11991_s3 + $0xb74] sm:$0xf] }
 0x1a2   :  { %v8091_v30 = vpop.eup %8090  ;;  %v7989_v6 = vld [vmem:[%s11991_s3 + $0x1034] sm:$0xf] }
 0x1a3   :  { %4427 = vmatpush.bf16.msrb.mxu2 %v6522_v14  ;;  %v6067_v14 = vld [vmem:[%s11991_s3 + $0x82c] sm:$0xf0]  ;;  %v4908_v35 = vmul.f32 0.5, %v8091_v30 }
 0x1a4   :  { %4440 = vmatpush.bf16.msrb.mxu3 %v7130_v18  ;;  %v6751_v18 = vld [vmem:[%s11991_s3 + $0xd84] sm:$0xf0] }
 0x1a5   :  { %4403 = vmatpush.bf16.msrb.mxu0 %v5154_v22  ;;  %4416 = vmatpush.bf16.msrb.mxu1 %v5762_v26  ;;  %v6070_v22 = vor.u32 %v7723_v13, %v6067_v14  ;;  %v6754_v25 = vor.u32 %v7894_v17, %v6751_v18  ;;  %v7704_v26 = vld [vmem:[%s11991_s3 + $0x74c] sm:$0xf]  ;;  %v4927_v42 = vadd.f32 0.5, %v4908_v35  ;;  %v5763_v13 = vld [vmem:[%s11991_s3 + $0x5cc] sm:$0xf0] }
 0x1a6   :  { %v6447_v17 = vld [vmem:[%s11991_s3 + $0xb24] sm:$0xf0] }
 0x1a7   :  { %4428 = vmatpush.bf16.msrb.mxu2 %v6446_v34  ;;  %v6675_v34 = vld [vmem:[%s11991_s3 + $0xcec] sm:$0xf0]  ;;  %v4946_v50 = vmax.f32 %v4927_v42, 1e-06 }
 0x1a8   :  { %4441 = vmatpush.bf16.msrb.mxu3 %v7054_v39  ;;  %v5994_v39 = vor.u32 %v7704_v26, %v5991_v27  ;;  %v6678_v43 = vor.u32 %v7875_v32, %v6675_v34  ;;  %v5687_v26 = vld [vmem:[%s11991_s3 + $0x534] sm:$0xf0]  ;;  %v7619_v32 = vld [vmem:[%s11991_s3 + $0x4a0] sm:$0xf0] }
 0x1a9   :  { %4404 = vmatpush.bf16.msrb.mxu0 %v5078_v45  ;;  %4417 = vmatpush.bf16.msrb.mxu1 %v5686_v48  ;;  %v5915_v45 = vld [vmem:[%s11991_s3 + $0x6fc] sm:$0xf0]  ;;  %v4198_v46 = vpop.f32.mrf.mxu0  ;;  %v7856_v48 = vld [vmem:[%s11991_s3 + $0xc0c] sm:$0xf]  ;;  %v4965_v62 = vmin.f32 %v4946_v50, 0.999999 }
 0x1aa   :  { %v5918_v57 = vor.u32 %v7685_v44, %v5915_v45  ;;  %v4199_v10 = vadd.f32 %v4198_v46, %v773_v56  ;;  %v6225_v34 = vld [vmem:[%s11991_s3 + $0x918] sm:$0xf]  ;;  %v6979_v44 = vld [vmem:[%s11991_s3 + $0xf4c] sm:$0xf0] }
 0x1ab   :  { %4429 = vmatpush.bf16.msrb.mxu2 %v6370_v54  ;;  %v4211_v51 = vpop.f32.mrf.mxu1  ;;  %v7207_v54 = vld [vmem:[%s11991_s3 + $0x1114] sm:$0xf0]  ;;  %4984 = vst [vmem:[#allocation2 + $0x28] sm:$0xff] %v4965_v62  ;;  %v6226_v50 = vor.u32 %v7771_v37, %v6225_v34  ;;  %v7289_v34 = vld [vmem:[%s11991_s3 + $0x1168] sm:$0xf] }
 0x1ac   :  { %4442 = vmatpush.bf16.msrb.mxu3 %v6978_v60  ;;  %4405 = vmatmul.bf16.vlgmr.msrb.gmra.mxu0 %v8607_v28  ;;  %v5231_v60 = vld [vmem:[%s11991_s3 + $0x1a4] sm:$0xf0]  ;;  %v4212_v27 = vadd.f32 %v4211_v51, %v4199_v10  ;;  %v5313_v37 = vld [vmem:[%s11991_s3 + $0x1f8] sm:$0xf] }
 0x1ad   :  { %4449 = vmatpush.bf16.msra.mxu0 %v5614_v49  ;;  %4462 = vmatpush.bf16.msra.mxu1 %v6222_v53  ;;  %v6599_v49 = vld [vmem:[%s11991_s3 + $0xc54] sm:$0xf0]  ;;  %v8008_v53 = vld [vmem:[%s11991_s3 + $0x10cc] sm:$0xf]  ;;  %v5234_v5 = vor.u32 %v7514_v58, %v5231_v60  ;;  %v6073_v10 = vld [vmem:[%s11991_s3 + $0x7e8] sm:$0xf] }
 0x1ae   :  { %4418 = vmatmul.bf16.vlgmr.msrb.gmra.mxu1 %v8615_v33  ;;  %v6602_v63 = vor.u32 %v7856_v48, %v6599_v49  ;;  %v7210_v2 = vor.u32 %v8008_v53, %v7207_v54  ;;  %v7600_v48 = vld [vmem:[%s11991_s3 + $0x408] sm:$0xf0]  ;;  %v6903_v60 = vld [vmem:[%s11991_s3 + $0xeb4] sm:$0xf0] }
 0x1af   :  { %4430 = vmatpush.bf16.msrb.mxu2 %v6294_v29  ;;  %v5842_v29 = vor.u32 %v7666_v0, %v5839_v1  ;;  %v7752_v53 = vld [vmem:[%s11991_s3 + $0x8c8] sm:$0xf0]  ;;  %v7923_v0 = vld [vmem:[%s11991_s3 + $0xe20] sm:$0xf0] }
 0x1b0   :  { %4443 = vmatpush.bf16.msrb.mxu3 %v6902_v11  ;;  %v7780_v54 = vld [vmem:[%s11991_s3 + $0x9ac] sm:$0xf] }
 0x1b1   :  { %4450 = vmatpush.bf16.msra.mxu0 %v5538_v4  ;;  %4463 = vmatpush.bf16.msra.mxu1 %v6146_v7  ;;  %v6523_v4 = vld [vmem:[%s11991_s3 + $0xbbc] sm:$0xf0]  ;;  %v4200_v14 = vpop.f32.mrf.mxu0  ;;  %v7932_v58 = vld [vmem:[%s11991_s3 + $0xe6c] sm:$0xf] }
 0x1b2   :  { %4431 = vmatmul.bf16.vlgmr.msrb.gmra.mxu2 %v8649_v55  ;;  %v7131_v7 = vld [vmem:[%s11991_s3 + $0x107c] sm:$0xf0]  ;;  %v6526_v11 = vor.u32 %v7837_v3, %v6523_v4  ;;  %v8075_v3 = vld [vmem:[%s11991_s3 + $0x12e0] sm:$0xf0] }
 0x1b3   :  { %4475 = vmatpush.bf16.msra.mxu2 %v6830_v12  ;;  %4444 = vmatmul.bf16.vlgmr.msrb.gmra.mxu3 %v8660_v61  ;;  %v7647_v12 = vld [vmem:[%s11991_s3 + $0x584] sm:$0xf]  ;;  %v7134_v15 = vor.u32 %v7989_v6, %v7131_v7  ;;  %v4213_v18 = vpop.f32.mrf.mxu1  ;;  %v5465_v6 = vld [vmem:[%s11991_s3 + $0x328] sm:$0xf]  ;;  %v7581_v7 = vld [vmem:[%s11991_s3 + $0x370] sm:$0xf0] }
 0x1b4   :  { %4488 = vmatpush.bf16.msra.mxu3 %v7438_v16  ;;  %v7818_v16 = vld [vmem:[%s11991_s3 + $0xadc] sm:$0xf]  ;;  %v5766_v23 = vor.u32 %v7647_v12, %v5763_v13  ;;  %v6757_v14 = vld [vmem:[%s11991_s3 + $0xd40] sm:$0xf]  ;;  %v8056_v18 = vld [vmem:[%s11991_s3 + $0x1248] sm:$0xf0] }
 0x1b5   :  { %4451 = vmatpush.bf16.msra.mxu0 %v5462_v19  ;;  %4464 = vmatpush.bf16.msra.mxu1 %v6070_v22  ;;  %v5158_v19 = vor.u32 %v7495_v8, %v5155_v9  ;;  %v7476_v22 = vld [vmem:[%s11991_s3 + $0x2c] sm:$0xf]  ;;  %v6450_v30 = vor.u32 %v7818_v16, %v6447_v17  ;;  %v4224_v35 = vpop.f32.mrf.mxu2  ;;  %v6906_v8 = vor.u32 %v7932_v58, %v6903_v60  ;;  %v7365_v17 = vld [vmem:[%s11991_s3 + $0x1200] sm:$0xf] }
 0x1b6   :  { %v4225_v40 = vadd.f32 %v4224_v35, %v4212_v27  ;;  %v4237_v41 = vpop.f32.mrf.mxu3  ;;  %v5082_v42 = vor.u32 %v7476_v22, %v5079_v24  ;;  %v5466_v16 = vor.u32 %v7581_v7, %v5465_v6  ;;  %v7714_v24 = vld [vmem:[%s11991_s3 + $0x798] sm:$0xf0]  ;;  %v6681_v27 = vld [vmem:[%s11991_s3 + $0xca8] sm:$0xf]  ;;  %v8037_v35 = vld [vmem:[%s11991_s3 + $0x11b0] sm:$0xf0] }
 0x1b7   :  { %4476 = vmatpush.bf16.msra.mxu2 %v6754_v25  ;;  %v7628_v25 = vld [vmem:[%s11991_s3 + $0x4ec] sm:$0xf]  ;;  %v5845_v60 = vld [vmem:[%s11991_s3 + $0x620] sm:$0xf]  ;;  %v7505_v6 = vld [vmem:[%s11991_s3 + $0x110] sm:$0xf0] }
 0x1b8   :  { %4489 = vmatpush.bf16.msra.mxu3 %v7362_v31  ;;  %v5617_v31 = vld [vmem:[%s11991_s3 + $0x458] sm:$0xf]  ;;  %v5690_v45 = vor.u32 %v7628_v25, %v5687_v26  ;;  %v4238_v49 = vadd.f32 %v4237_v41, %v4225_v40  ;;  %v7366_v26 = vor.u32 %v8056_v18, %v7365_v17  ;;  %v7980_v17 = vld [vmem:[%s11991_s3 + $0xfe8] sm:$0xf0]  ;;  %v5085_v18 = vld [vmem:[%s11991_s3 + $0x30] sm:$0xf] }
 0x1b9   :  { %4452 = vmatpush.bf16.msra.mxu0 %v5386_v36  ;;  %4465 = vmatpush.bf16.msra.mxu1 %v5994_v39  ;;  %v7058_v36 = vor.u32 %v7970_v20, %v7055_v21  ;;  %v6371_v39 = vld [vmem:[%s11991_s3 + $0xa8c] sm:$0xf0]  ;;  %v5618_v46 = vor.u32 %v7619_v32, %v5617_v31  ;;  %v7562_v21 = vld [vmem:[%s11991_s3 + $0x2d8] sm:$0xf0]  ;;  %v5921_v41 = vld [vmem:[%s11991_s3 + $0x6b8] sm:$0xf] }
 0x1ba   :  { %v6374_v51 = vor.u32 %v7799_v38, %v6371_v39  ;;  %v4871_v62 = vmul.f32 0.5, %v4238_v49  ;;  %v5389_v20 = vld [vmem:[%s11991_s3 + $0x290] sm:$0xf]  ;;  %v7543_v38 = vld [vmem:[%s11991_s3 + $0x240] sm:$0xf0] }
 0x1bb   :  { %4477 = vmatpush.bf16.msra.mxu2 %v6678_v43  ;;  %v7951_v43 = vld [vmem:[%s11991_s3 + $0xf04] sm:$0xf]  ;;  %v5390_v32 = vor.u32 %v7562_v21, %v5389_v20  ;;  %v5314_v49 = vor.u32 %v7543_v38, %v5313_v37  ;;  %v7486_v20 = vld [vmem:[%s11991_s3 + $0x78] sm:$0xf0]  ;;  %v5693_v21 = vld [vmem:[%s11991_s3 + $0x4f0] sm:$0xf] }
 0x1bc   :  { %4490 = vmatpush.bf16.msra.mxu3 %v7286_v47  ;;  %v5541_v47 = vld [vmem:[%s11991_s3 + $0x3c0] sm:$0xf]  ;;  %v6982_v56 = vor.u32 %v7951_v43, %v6979_v44  ;;  %8092 = vtanh.f32 %v4871_v62  ;;  %v7290_v44 = vor.u32 %v8037_v35, %v7289_v34  ;;  %v6377_v34 = vld [vmem:[%s11991_s3 + $0xa48] sm:$0xf]  ;;  %v7809_v35 = vld [vmem:[%s11991_s3 + $0xa90] sm:$0xf0]  ;;  %v5086_v38 = vor.u32 %v7486_v20, %v5085_v18 }
 0x1bd   :  { %4453 = vmatpush.bf16.msra.mxu0 %v5310_v52  ;;  %4466 = vmatpush.bf16.msra.mxu1 %v5918_v57  ;;  %v6149_v52 = vld [vmem:[%s11991_s3 + $0x880] sm:$0xf]  ;;  %v6295_v57 = vld [vmem:[%s11991_s3 + $0x9f4] sm:$0xf0]  ;;  %v5542_v1 = vor.u32 %v7600_v48, %v5541_v47  ;;  %v7705_v18 = vld [vmem:[%s11991_s3 + $0x754] sm:$0xf] }
 0x1be   :  { %v6150_v4 = vor.u32 %v7752_v53, %v6149_v52  ;;  %v4239_v12 = vpop.f32.mrf.mxu3  ;;  %v774_v52 = vperm.slane %v10303_v59, 7  ;;  %v7676_v59 = vld [vmem:[%s11991_s3 + $0x668] sm:$0xf0] }
 0x1bf   :  { %4478 = vmatpush.bf16.msra.mxu2 %v6602_v63  ;;  %v6833_v63 = vld [vmem:[%s11991_s3 + $0xdd8] sm:$0xf]  ;;  %v6453_v12 = vld [vmem:[%s11991_s3 + $0xae0] sm:$0xf] }
 0x1c0   :  { %4491 = vmatpush.bf16.msra.mxu3 %v7210_v2  ;;  %v7441_v2 = vld [vmem:[%s11991_s3 + $0x1298] sm:$0xf]  ;;  %v6834_v9 = vor.u32 %v7923_v0, %v6833_v63  ;;  %v7847_v0 = vld [vmem:[%s11991_s3 + $0xbc0] sm:$0xf0] }
 0x1c1   :  { %4454 = vmatpush.bf16.msra.mxu0 %v5234_v5  ;;  %4467 = vmatpush.bf16.msra.mxu1 %v5842_v29  ;;  %v6298_v5 = vor.u32 %v7780_v54, %v6295_v57  ;;  %v4226_v29 = vpop.f32.mrf.mxu2  ;;  %v7442_v13 = vor.u32 %v8075_v3, %v7441_v2  ;;  %v5237_v54 = vld [vmem:[%s11991_s3 + $0x160] sm:$0xf]  ;;  %v6529_v63 = vld [vmem:[%s11991_s3 + $0xb78] sm:$0xf]  ;;  %v7999_v3 = vld [vmem:[%s11991_s3 + $0x1080] sm:$0xf0] }
 0x1c2   :  { %v8093_v25 = vpop.eup %8092  ;;  %v7137_v2 = vld [vmem:[%s11991_s3 + $0x1038] sm:$0xf]  ;;  %v6530_v29 = vor.u32 %v7847_v0, %v6529_v63 }
 0x1c3   :  { %4479 = vmatpush.bf16.msra.mxu2 %v6526_v11  ;;  %v7733_v11 = vld [vmem:[%s11991_s3 + $0x830] sm:$0xf0]  ;;  %v4909_v31 = vmul.f32 0.5, %v8093_v25  ;;  %v7610_v25 = vld [vmem:[%s11991_s3 + $0x45c] sm:$0xf] }
 0x1c4   :  { %4492 = vmatpush.bf16.msra.mxu3 %v7134_v15  ;;  %v7904_v15 = vld [vmem:[%s11991_s3 + $0xd88] sm:$0xf0] }
 0x1c5   :  { %4455 = vmatpush.bf16.msra.mxu0 %v5158_v19  ;;  %4468 = vmatpush.bf16.msra.mxu1 %v5766_v23  ;;  %v6074_v19 = vor.u32 %v7733_v11, %v6073_v10  ;;  %v6758_v22 = vor.u32 %v7904_v15, %v6757_v14  ;;  %v5997_v23 = vld [vmem:[%s11991_s3 + $0x750] sm:$0xf]  ;;  %v4928_v39 = vadd.f32 0.5, %v4909_v31  ;;  %v7138_v11 = vor.u32 %v7999_v3, %v7137_v2  ;;  %v5467_v2 = vld [vmem:[%s11991_s3 + $0x374] sm:$0xf0] }
 0x1c7   :  { %4480 = vmatpush.bf16.msra.mxu2 %v6450_v30  ;;  %v7885_v30 = vld [vmem:[%s11991_s3 + $0xcf0] sm:$0xf0]  ;;  %v4947_v47 = vmax.f32 %v4928_v39, 1e-06  ;;  %v6985_v39 = vld [vmem:[%s11991_s3 + $0xf08] sm:$0xf] }
 0x1c8   :  { %4493 = vmatpush.bf16.msra.mxu3 %v7058_v36  ;;  %v5998_v36 = vor.u32 %v7714_v24, %v5997_v23  ;;  %v6682_v40 = vor.u32 %v7885_v30, %v6681_v27  ;;  %v7762_v27 = vld [vmem:[%s11991_s3 + $0x91c] sm:$0xf] }
 0x1c9   :  { %4456 = vmatpush.bf16.msra.mxu0 %v5082_v42  ;;  %4469 = vmatpush.bf16.msra.mxu1 %v5690_v45  ;;  %v7695_v42 = vld [vmem:[%s11991_s3 + $0x700] sm:$0xf0]  ;;  %v4250_v43 = vpop.f32.mrf.mxu0  ;;  %v6605_v45 = vld [vmem:[%s11991_s3 + $0xc10] sm:$0xf]  ;;  %v4966_v57 = vmin.f32 %v4947_v47, 0.999999  ;;  %v6378_v47 = vor.u32 %v7809_v35, %v6377_v34 }
 0x1ca   :  { %v5922_v53 = vor.u32 %v7695_v42, %v5921_v41  ;;  %v4251_v7 = vadd.f32 %v4250_v43, %v774_v52  ;;  %v7591_v43 = vld [vmem:[%s11991_s3 + $0x3c4] sm:$0xf]  ;;  %v7790_v52 = vld [vmem:[%s11991_s3 + $0x9f8] sm:$0xf0]  ;;  %v10881_v35 = vld [vmem:[%s11992_s4 + $0x8] sm:$0xff] }
 0x1cb   :  { %4481 = vmatpush.bf16.msra.mxu2 %v6374_v51  ;;  %v4263_v48 = vpop.f32.mrf.mxu1  ;;  %v8018_v51 = vld [vmem:[%s11991_s3 + $0x1118] sm:$0xf0]  ;;  %4985 = vst [vmem:[#allocation2 + $0x30] sm:$0xff] %v4966_v57 }
 0x1cc   :  { %4494 = vmatpush.bf16.msra.mxu3 %v6982_v56  ;;  %4457 = vmatmul.bf16.vlgmr.msra.gmra.mxu0 %v8607_v28  ;;  %v7524_v56 = vld [vmem:[%s11991_s3 + $0x1a8] sm:$0xf0]  ;;  %v4264_v23 = vadd.f32 %v4263_v48, %v4251_v7  ;;  %v7743_v48 = vld [vmem:[%s11991_s3 + $0x884] sm:$0xf]  ;;  %v7914_v57 = vld [vmem:[%s11991_s3 + $0xddc] sm:$0xf] }
 0x1cd   :  { %4501 = vmatpush.bf16.msrb.mxu0 %v5618_v46  ;;  %4514 = vmatpush.bf16.msrb.mxu1 %v6226_v50  ;;  %v7866_v46 = vld [vmem:[%s11991_s3 + $0xc58] sm:$0xf0]  ;;  %v7213_v50 = vld [vmem:[%s11991_s3 + $0x10d0] sm:$0xf]  ;;  %v6075_v7 = vld [vmem:[%s11991_s3 + $0x834] sm:$0xf0] }
 0x1ce   :  { %4470 = vmatmul.bf16.vlgmr.msra.gmra.mxu1 %v8615_v33  ;;  %v6606_v58 = vor.u32 %v7866_v46, %v6605_v45  ;;  %v7214_v62 = vor.u32 %v8018_v51, %v7213_v50  ;;  %v6301_v50 = vld [vmem:[%s11991_s3 + $0x9b0] sm:$0xf] }
 0x1cf   :  { %4482 = vmatpush.bf16.msra.mxu2 %v6298_v5  ;;  %v5161_v5 = vld [vmem:[%s11991_s3 + $0xc8] sm:$0xf]  ;;  %v6302_v0 = vor.u32 %v7790_v52, %v6301_v50  ;;  %v7515_v50 = vld [vmem:[%s11991_s3 + $0x164] sm:$0xf] }
 0x1d0   :  { %4495 = vmatpush.bf16.msra.mxu3 %v6906_v8  ;;  %v5769_v8 = vld [vmem:[%s11991_s3 + $0x588] sm:$0xf]  ;;  %v5162_v15 = vor.u32 %v7505_v6, %v5161_v5  ;;  %v7724_v6 = vld [vmem:[%s11991_s3 + $0x7ec] sm:$0xf] }
 0x1d1   :  { %4502 = vmatpush.bf16.msrb.mxu0 %v5542_v1  ;;  %4515 = vmatpush.bf16.msrb.mxu1 %v6150_v4  ;;  %v5238_v1 = vor.u32 %v7524_v56, %v5237_v54  ;;  %v5846_v4 = vor.u32 %v7676_v59, %v5845_v60  ;;  %v4252_v10 = vpop.f32.mrf.mxu0  ;;  %v7942_v54 = vld [vmem:[%s11991_s3 + $0xeb8] sm:$0xf0] }
 0x1d2   :  { %4483 = vmatmul.bf16.vlgmr.msra.gmra.mxu2 %v8649_v55  ;;  %v8066_v59 = vld [vmem:[%s11991_s3 + $0x129c] sm:$0xf]  ;;  %v6759_v10 = vld [vmem:[%s11991_s3 + $0xd8c] sm:$0xf0] }
 0x1d3   :  { %4527 = vmatpush.bf16.msrb.mxu2 %v6834_v9  ;;  %4496 = vmatmul.bf16.vlgmr.msra.gmra.mxu3 %v8660_v61  ;;  %v7657_v9 = vld [vmem:[%s11991_s3 + $0x5d0] sm:$0xf0]  ;;  %v4265_v14 = vpop.f32.mrf.mxu1 }
 0x1d4   :  { %4540 = vmatpush.bf16.msrb.mxu3 %v7442_v13  ;;  %v7828_v13 = vld [vmem:[%s11991_s3 + $0xb28] sm:$0xf0]  ;;  %v6078_v14 = vor.u32 %v7724_v6, %v6075_v7  ;;  %v5771_v6 = vld [vmem:[%s11991_s3 + $0x5d4] sm:$0xf0] }
 0x1d5   :  { %4503 = vmatpush.bf16.msrb.mxu0 %v5466_v16  ;;  %4516 = vmatpush.bf16.msrb.mxu1 %v6074_v19  ;;  %v7061_v16 = vld [vmem:[%s11991_s3 + $0xfa0] sm:$0xf]  ;;  %v5770_v19 = vor.u32 %v7657_v9, %v5769_v8  ;;  %v6454_v24 = vor.u32 %v7828_v13, %v6453_v12  ;;  %v4276_v30 = vpop.f32.mrf.mxu2  ;;  %v7895_v9 = vld [vmem:[%s11991_s3 + $0xd44] sm:$0xf]  ;;  %v7367_v13 = vld [vmem:[%s11991_s3 + $0x124c] sm:$0xf0] }
 0x1d6   :  { %v7062_v31 = vor.u32 %v7980_v17, %v7061_v16  ;;  %v4289_v37 = vpop.f32.mrf.mxu3  ;;  %v8047_v12 = vld [vmem:[%s11991_s3 + $0x1204] sm:$0xf]  ;;  %v5391_v16 = vld [vmem:[%s11991_s3 + $0x2dc] sm:$0xf0]  ;;  %v6762_v17 = vor.u32 %v7895_v9, %v6759_v10  ;;  %v6455_v9 = vld [vmem:[%s11991_s3 + $0xb2c] sm:$0xf0] }
 0x1d7   :  { %4528 = vmatpush.bf16.msrb.mxu2 %v6758_v22  ;;  %v7638_v22 = vld [vmem:[%s11991_s3 + $0x538] sm:$0xf0] }
 0x1d8   :  { %4541 = vmatpush.bf16.msrb.mxu3 %v7366_v26  ;;  %v5619_v26 = vld [vmem:[%s11991_s3 + $0x4a4] sm:$0xf0]  ;;  %v5694_v41 = vor.u32 %v7638_v22, %v5693_v21  ;;  %v7370_v21 = vor.u32 %v8047_v12, %v7367_v13  ;;  %v7876_v22 = vld [vmem:[%s11991_s3 + $0xcac] sm:$0xf]  ;;  %v7971_v12 = vld [vmem:[%s11991_s3 + $0xfa4] sm:$0xf] }
 0x1d9   :  { %4504 = vmatpush.bf16.msrb.mxu0 %v5390_v32  ;;  %4517 = vmatpush.bf16.msrb.mxu1 %v5998_v36  ;;  %v6227_v32 = vld [vmem:[%s11991_s3 + $0x964] sm:$0xf0]  ;;  %v4277_v36 = vadd.f32 %v4276_v30, %v4264_v23  ;;  %v5622_v42 = vor.u32 %v7610_v25, %v5619_v26  ;;  %v6683_v23 = vld [vmem:[%s11991_s3 + $0xcf4] sm:$0xf0]  ;;  %v8028_v26 = vld [vmem:[%s11991_s3 + $0x116c] sm:$0xf] }
 0x1da   :  { %v6230_v46 = vor.u32 %v7762_v27, %v6227_v32  ;;  %v7291_v27 = vld [vmem:[%s11991_s3 + $0x11b4] sm:$0xf0]  ;;  %v5315_v32 = vld [vmem:[%s11991_s3 + $0x244] sm:$0xf0]  ;;  %v7063_v13 = vld [vmem:[%s11991_s3 + $0xfec] sm:$0xf0] }
 0x1db   :  { %4529 = vmatpush.bf16.msrb.mxu2 %v6682_v40  ;;  %v7961_v40 = vld [vmem:[%s11991_s3 + $0xf50] sm:$0xf0]  ;;  %v4290_v45 = vadd.f32 %v4289_v37, %v4277_v36  ;;  %v6686_v36 = vor.u32 %v7876_v22, %v6683_v23  ;;  %v7686_v37 = vld [vmem:[%s11991_s3 + $0x6bc] sm:$0xf]  ;;  %v7620_v22 = vld [vmem:[%s11991_s3 + $0x4a8] sm:$0xf0] }
 0x1dc   :  { %4542 = vmatpush.bf16.msrb.mxu3 %v7290_v44  ;;  %v5543_v44 = vld [vmem:[%s11991_s3 + $0x40c] sm:$0xf0]  ;;  %v6986_v51 = vor.u32 %v7961_v40, %v6985_v39  ;;  %v7294_v40 = vor.u32 %v8028_v26, %v7291_v27  ;;  %v6233_v23 = vld [vmem:[%s11991_s3 + $0x920] sm:$0xf]  ;;  %v7772_v26 = vld [vmem:[%s11991_s3 + $0x968] sm:$0xf0] }
 0x1dd   :  { %4505 = vmatpush.bf16.msrb.mxu0 %v5314_v49  ;;  %4518 = vmatpush.bf16.msrb.mxu1 %v5922_v53  ;;  %v6151_v49 = vld [vmem:[%s11991_s3 + $0x8cc] sm:$0xf0]  ;;  %v4872_v56 = vmul.f32 0.5, %v4290_v45  ;;  %v5546_v60 = vor.u32 %v7591_v43, %v5543_v44  ;;  %v4278_v3 = vpop.f32.mrf.mxu2  ;;  %v7800_v27 = vld [vmem:[%s11991_s3 + $0xa4c] sm:$0xf] }
 0x1de   :  { %v6909_v53 = vld [vmem:[%s11991_s3 + $0xe70] sm:$0xf]  ;;  %v6154_v63 = vor.u32 %v7743_v48, %v6151_v49  ;;  %v775_v48 = vperm.slane %v10881_v35, 0 }
 0x1df   :  { %4530 = vmatpush.bf16.msrb.mxu2 %v6606_v58  ;;  %v6835_v58 = vld [vmem:[%s11991_s3 + $0xe24] sm:$0xf0]  ;;  %8094 = vtanh.f32 %v4872_v56  ;;  %v5847_v56 = vld [vmem:[%s11991_s3 + $0x66c] sm:$0xf0] }
 0x1e0   :  { %4543 = vmatpush.bf16.msrb.mxu3 %v7214_v62  ;;  %v7443_v62 = vld [vmem:[%s11991_s3 + $0x12e4] sm:$0xf0]  ;;  %v6838_v5 = vor.u32 %v7914_v57, %v6835_v58  ;;  %v7838_v58 = vld [vmem:[%s11991_s3 + $0xb7c] sm:$0xf] }
 0x1e1   :  { %4506 = vmatpush.bf16.msrb.mxu0 %v5238_v1  ;;  %4519 = vmatpush.bf16.msrb.mxu1 %v5846_v4  ;;  %v7572_v1 = vld [vmem:[%s11991_s3 + $0x32c] sm:$0xf]  ;;  %v6910_v4 = vor.u32 %v7942_v54, %v6909_v53  ;;  %v7446_v8 = vor.u32 %v8066_v59, %v7443_v62  ;;  %v7667_v54 = vld [vmem:[%s11991_s3 + $0x624] sm:$0xf]  ;;  %v7990_v62 = vld [vmem:[%s11991_s3 + $0x103c] sm:$0xf] }
 0x1e3   :  { %4531 = vmatpush.bf16.msrb.mxu2 %v6530_v29  ;;  %v4291_v29 = vpop.f32.mrf.mxu3 }
 0x1e4   :  { %4544 = vmatpush.bf16.msrb.mxu3 %v7138_v11  ;;  %v5470_v11 = vor.u32 %v7572_v1, %v5467_v2  ;;  %v7496_v1 = vld [vmem:[%s11991_s3 + $0xcc] sm:$0xf]  ;;  %v5163_v2 = vld [vmem:[%s11991_s3 + $0x114] sm:$0xf0] }
 0x1e5   :  { %4507 = vmatpush.bf16.msrb.mxu0 %v5162_v15  ;;  %4520 = vmatpush.bf16.msrb.mxu1 %v5770_v19  ;;  %v7553_v15 = vld [vmem:[%s11991_s3 + $0x294] sm:$0xf]  ;;  %v5999_v19 = vld [vmem:[%s11991_s3 + $0x79c] sm:$0xf0]  ;;  %v8095_v20 = vpop.eup %8094 }
 0x1e6   :  { %v5394_v25 = vor.u32 %v7553_v15, %v5391_v16  ;;  %v6002_v30 = vor.u32 %v7705_v18, %v5999_v19  ;;  %v5087_v16 = vld [vmem:[%s11991_s3 + $0x7c] sm:$0xf0] }
 0x1e7   :  { %4532 = vmatpush.bf16.msrb.mxu2 %v6454_v24  ;;  %v4910_v24 = vmul.f32 0.5, %v8095_v20  ;;  %v5695_v18 = vld [vmem:[%s11991_s3 + $0x53c] sm:$0xf0] }
 0x1e8   :  { %4545 = vmatpush.bf16.msrb.mxu3 %v7062_v31  ;;  %v7534_v31 = vld [vmem:[%s11991_s3 + $0x1fc] sm:$0xf] }
 0x1e9   :  { %4508 = vmatpush.bf16.msrb.mxu0 %v5086_v38  ;;  %4521 = vmatpush.bf16.msrb.mxu1 %v5694_v41  ;;  %v4929_v34 = vadd.f32 0.5, %v4910_v24  ;;  %v5923_v38 = vld [vmem:[%s11991_s3 + $0x704] sm:$0xf0]  ;;  %v4302_v39 = vpop.f32.mrf.mxu0  ;;  %v7857_v41 = vld [vmem:[%s11991_s3 + $0xc14] sm:$0xf]  ;;  %v5318_v45 = vor.u32 %v7534_v31, %v5315_v32 }
 0x1ea   :  { %v5926_v49 = vor.u32 %v7686_v37, %v5923_v38  ;;  %v4303_v3 = vadd.f32 %v4302_v39, %v775_v48  ;;  %v6987_v37 = vld [vmem:[%s11991_s3 + $0xf54] sm:$0xf0] }
 0x1eb   :  { %4533 = vmatpush.bf16.msrb.mxu2 %v6378_v47  ;;  %v4948_v43 = vmax.f32 %v4929_v34, 1e-06  ;;  %v4315_v44 = vpop.f32.mrf.mxu1  ;;  %v7215_v47 = vld [vmem:[%s11991_s3 + $0x111c] sm:$0xf0] }
 0x1ec   :  { %4546 = vmatpush.bf16.msrb.mxu3 %v6986_v51  ;;  %4509 = vmatmul.bf16.vlgmr.msrb.gmra.mxu0 %v8607_v28  ;;  %v5239_v51 = vld [vmem:[%s11991_s3 + $0x1ac] sm:$0xf0]  ;;  %v4316_v19 = vadd.f32 %v4315_v44, %v4303_v3 }
 0x1ed   :  { %4553 = vmatpush.bf16.msra.mxu0 %v5622_v42  ;;  %4566 = vmatpush.bf16.msra.mxu1 %v6230_v46  ;;  %v6607_v42 = vld [vmem:[%s11991_s3 + $0xc5c] sm:$0xf0]  ;;  %v8009_v46 = vld [vmem:[%s11991_s3 + $0x10d4] sm:$0xf]  ;;  %v4967_v52 = vmin.f32 %v4948_v43, 0.999999  ;;  %v5242_v59 = vor.u32 %v7515_v50, %v5239_v51  ;;  %v6234_v43 = vor.u32 %v7772_v26, %v6233_v23 }
 0x1ee   :  { %4522 = vmatmul.bf16.vlgmr.msrb.gmra.mxu1 %v8615_v33  ;;  %v6610_v53 = vor.u32 %v7857_v41, %v6607_v42  ;;  %v7218_v57 = vor.u32 %v8009_v46, %v7215_v47  ;;  %v7601_v41 = vld [vmem:[%s11991_s3 + $0x410] sm:$0xf0]  ;;  %v6911_v51 = vld [vmem:[%s11991_s3 + $0xebc] sm:$0xf0]  ;;  %v6081_v3 = vld [vmem:[%s11991_s3 + $0x7f0] sm:$0xf] }
 0x1ef   :  { %4534 = vmatpush.bf16.msrb.mxu2 %v6302_v0  ;;  %4986 = vst [vmem:[#allocation2 + $0x38] sm:$0xff] %v4967_v52  ;;  %v5850_v0 = vor.u32 %v7667_v54, %v5847_v56  ;;  %v7753_v46 = vld [vmem:[%s11991_s3 + $0x8d0] sm:$0xf0]  ;;  %v7924_v54 = vld [vmem:[%s11991_s3 + $0xe28] sm:$0xf0] }
 0x1f0   :  { %4547 = vmatpush.bf16.msrb.mxu3 %v6910_v4  ;;  %v7781_v47 = vld [vmem:[%s11991_s3 + $0x9b4] sm:$0xf]  ;;  %v7297_v23 = vld [vmem:[%s11991_s3 + $0x1170] sm:$0xf]  ;;  %v5321_v26 = vld [vmem:[%s11991_s3 + $0x200] sm:$0xf] }
 0x1f1   :  { %4554 = vmatpush.bf16.msra.mxu0 %v5546_v60  ;;  %4567 = vmatpush.bf16.msra.mxu1 %v6154_v63  ;;  %v6531_v60 = vld [vmem:[%s11991_s3 + $0xbc4] sm:$0xf0]  ;;  %v4304_v7 = vpop.f32.mrf.mxu0  ;;  %v7933_v50 = vld [vmem:[%s11991_s3 + $0xe74] sm:$0xf] }
 0x1f2   :  { %4535 = vmatmul.bf16.vlgmr.msrb.gmra.mxu2 %v8649_v55  ;;  %v7139_v63 = vld [vmem:[%s11991_s3 + $0x1084] sm:$0xf0]  ;;  %v6534_v4 = vor.u32 %v7838_v58, %v6531_v60  ;;  %v8076_v58 = vld [vmem:[%s11991_s3 + $0x12e8] sm:$0xf0] }
 0x1f3   :  { %4579 = vmatpush.bf16.msra.mxu2 %v6838_v5  ;;  %4548 = vmatmul.bf16.vlgmr.msrb.gmra.mxu3 %v8660_v61  ;;  %v7648_v5 = vld [vmem:[%s11991_s3 + $0x58c] sm:$0xf]  ;;  %v7142_v29 = vor.u32 %v7990_v62, %v7139_v63  ;;  %v4317_v10 = vpop.f32.mrf.mxu1  ;;  %v5473_v62 = vld [vmem:[%s11991_s3 + $0x330] sm:$0xf]  ;;  %v7582_v63 = vld [vmem:[%s11991_s3 + $0x378] sm:$0xf0] }
 0x1f4   :  { %4592 = vmatpush.bf16.msra.mxu3 %v7446_v8  ;;  %v7819_v8 = vld [vmem:[%s11991_s3 + $0xae4] sm:$0xf]  ;;  %v5774_v15 = vor.u32 %v7648_v5, %v5771_v6  ;;  %v6765_v7 = vld [vmem:[%s11991_s3 + $0xd48] sm:$0xf]  ;;  %v8057_v10 = vld [vmem:[%s11991_s3 + $0x1250] sm:$0xf0] }
 0x1f5   :  { %4555 = vmatpush.bf16.msra.mxu0 %v5470_v11  ;;  %4568 = vmatpush.bf16.msra.mxu1 %v6078_v14  ;;  %v5166_v11 = vor.u32 %v7496_v1, %v5163_v2  ;;  %v7477_v14 = vld [vmem:[%s11991_s3 + $0x34] sm:$0xf]  ;;  %v6458_v20 = vor.u32 %v7819_v8, %v6455_v9  ;;  %v4328_v24 = vpop.f32.mrf.mxu2  ;;  %v6914_v1 = vor.u32 %v7933_v50, %v6911_v51  ;;  %v7373_v9 = vld [vmem:[%s11991_s3 + $0x1208] sm:$0xf] }
 0x1f6   :  { %v4329_v31 = vadd.f32 %v4328_v24, %v4316_v19  ;;  %v4341_v32 = vpop.f32.mrf.mxu3  ;;  %v5090_v34 = vor.u32 %v7477_v14, %v5087_v16  ;;  %v5474_v8 = vor.u32 %v7582_v63, %v5473_v62  ;;  %v7715_v16 = vld [vmem:[%s11991_s3 + $0x7a0] sm:$0xf0]  ;;  %v6689_v19 = vld [vmem:[%s11991_s3 + $0xcb0] sm:$0xf]  ;;  %v8038_v24 = vld [vmem:[%s11991_s3 + $0x11b8] sm:$0xf0] }
 0x1f7   :  { %4580 = vmatpush.bf16.msra.mxu2 %v6762_v17  ;;  %v7629_v17 = vld [vmem:[%s11991_s3 + $0x4f4] sm:$0xf]  ;;  %v5853_v51 = vld [vmem:[%s11991_s3 + $0x628] sm:$0xf]  ;;  %v5169_v62 = vld [vmem:[%s11991_s3 + $0xd0] sm:$0xf] }
 0x1f8   :  { %4593 = vmatpush.bf16.msra.mxu3 %v7370_v21  ;;  %v5625_v21 = vld [vmem:[%s11991_s3 + $0x460] sm:$0xf]  ;;  %v5698_v38 = vor.u32 %v7629_v17, %v5695_v18  ;;  %v4342_v42 = vadd.f32 %v4341_v32, %v4329_v31  ;;  %v7374_v18 = vor.u32 %v8057_v10, %v7373_v9  ;;  %v7506_v63 = vld [vmem:[%s11991_s3 + $0x118] sm:$0xf0]  ;;  %v7069_v9 = vld [vmem:[%s11991_s3 + $0xfa8] sm:$0xf] }
 0x1f9   :  { %4556 = vmatpush.bf16.msra.mxu0 %v5394_v25  ;;  %4569 = vmatpush.bf16.msra.mxu1 %v6002_v30  ;;  %v7066_v25 = vor.u32 %v7971_v12, %v7063_v13  ;;  %v6379_v30 = vld [vmem:[%s11991_s3 + $0xa94] sm:$0xf0]  ;;  %v5626_v39 = vor.u32 %v7620_v22, %v5625_v21  ;;  %v7563_v13 = vld [vmem:[%s11991_s3 + $0x2e0] sm:$0xf0]  ;;  %v5929_v32 = vld [vmem:[%s11991_s3 + $0x6c0] sm:$0xf] }
 0x1fa   :  { %v6382_v44 = vor.u32 %v7800_v27, %v6379_v30  ;;  %v4873_v52 = vmul.f32 0.5, %v4342_v42  ;;  %v5397_v12 = vld [vmem:[%s11991_s3 + $0x298] sm:$0xf]  ;;  %v7544_v27 = vld [vmem:[%s11991_s3 + $0x248] sm:$0xf0] }
 0x1fb   :  { %4581 = vmatpush.bf16.msra.mxu2 %v6686_v36  ;;  %v7952_v36 = vld [vmem:[%s11991_s3 + $0xf0c] sm:$0xf]  ;;  %v5398_v22 = vor.u32 %v7563_v13, %v5397_v12  ;;  %v5322_v42 = vor.u32 %v7544_v27, %v5321_v26  ;;  %v7981_v10 = vld [vmem:[%s11991_s3 + $0xff0] sm:$0xf0]  ;;  %v7487_v13 = vld [vmem:[%s11991_s3 + $0x80] sm:$0xf0] }
 0x1fc   :  { %4594 = vmatpush.bf16.msra.mxu3 %v7294_v40  ;;  %v5549_v40 = vld [vmem:[%s11991_s3 + $0x3c8] sm:$0xf]  ;;  %v6990_v48 = vor.u32 %v7952_v36, %v6987_v37  ;;  %8096 = vtanh.f32 %v4873_v52  ;;  %v7298_v37 = vor.u32 %v8038_v24, %v7297_v23  ;;  %v7677_v52 = vld [vmem:[%s11991_s3 + $0x670] sm:$0xf0]  ;;  %v6235_v23 = vld [vmem:[%s11991_s3 + $0x96c] sm:$0xf0] }
 0x1fd   :  { %4557 = vmatpush.bf16.msra.mxu0 %v5318_v45  ;;  %4570 = vmatpush.bf16.msra.mxu1 %v5926_v49  ;;  %v6157_v45 = vld [vmem:[%s11991_s3 + $0x888] sm:$0xf]  ;;  %v6303_v49 = vld [vmem:[%s11991_s3 + $0x9fc] sm:$0xf0]  ;;  %v5550_v56 = vor.u32 %v7601_v41, %v5549_v40  ;;  %v6385_v24 = vld [vmem:[%s11991_s3 + $0xa50] sm:$0xf] }
 0x1fe   :  { %v6158_v60 = vor.u32 %v7753_v46, %v6157_v45  ;;  %v4343_v5 = vpop.f32.mrf.mxu3  ;;  %v776_v45 = vperm.slane %v10881_v35, 1 }
 0x1ff   :  { %4582 = vmatpush.bf16.msra.mxu2 %v6610_v53  ;;  %v6841_v53 = vld [vmem:[%s11991_s3 + $0xde0] sm:$0xf] }
 0x200   :  { %4595 = vmatpush.bf16.msra.mxu3 %v7218_v57  ;;  %v7449_v57 = vld [vmem:[%s11991_s3 + $0x12a0] sm:$0xf]  ;;  %v6842_v2 = vor.u32 %v7924_v54, %v6841_v53 }
 0x201   :  { %4558 = vmatpush.bf16.msra.mxu0 %v5242_v59  ;;  %4571 = vmatpush.bf16.msra.mxu1 %v5850_v0  ;;  %v6306_v59 = vor.u32 %v7781_v47, %v6303_v49  ;;  %v4330_v0 = vpop.f32.mrf.mxu2  ;;  %v7450_v6 = vor.u32 %v8076_v58, %v7449_v57  ;;  %v5245_v47 = vld [vmem:[%s11991_s3 + $0x168] sm:$0xf]  ;;  %v6537_v54 = vld [vmem:[%s11991_s3 + $0xb80] sm:$0xf] }
 0x202   :  { %v8097_v17 = vpop.eup %8096  ;;  %v7145_v58 = vld [vmem:[%s11991_s3 + $0x1040] sm:$0xf] }
 0x203   :  { %4583 = vmatpush.bf16.msra.mxu2 %v6534_v4  ;;  %v7734_v4 = vld [vmem:[%s11991_s3 + $0x838] sm:$0xf0]  ;;  %v4911_v21 = vmul.f32 0.5, %v8097_v17 }
 0x204   :  { %4596 = vmatpush.bf16.msra.mxu3 %v7142_v29  ;;  %v7905_v29 = vld [vmem:[%s11991_s3 + $0xd90] sm:$0xf0] }
 0x205   :  { %4559 = vmatpush.bf16.msra.mxu0 %v5166_v11  ;;  %4572 = vmatpush.bf16.msra.mxu1 %v5774_v15  ;;  %v6082_v11 = vor.u32 %v7734_v4, %v6081_v3  ;;  %v6766_v14 = vor.u32 %v7905_v29, %v6765_v7  ;;  %v6005_v15 = vld [vmem:[%s11991_s3 + $0x758] sm:$0xf]  ;;  %v4930_v30 = vadd.f32 0.5, %v4911_v21  ;;  %v7658_v3 = vld [vmem:[%s11991_s3 + $0x5d8] sm:$0xf0] }
 0x206   :  { %v7829_v7 = vld [vmem:[%s11991_s3 + $0xb30] sm:$0xf0] }
 0x207   :  { %4584 = vmatpush.bf16.msra.mxu2 %v6458_v20  ;;  %v7886_v20 = vld [vmem:[%s11991_s3 + $0xcf8] sm:$0xf0]  ;;  %v4949_v40 = vmax.f32 %v4930_v30, 1e-06 }
 0x208   :  { %4597 = vmatpush.bf16.msra.mxu3 %v7066_v25  ;;  %v6006_v25 = vor.u32 %v7715_v16, %v6005_v15  ;;  %v6690_v31 = vor.u32 %v7886_v20, %v6689_v19  ;;  %v7639_v15 = vld [vmem:[%s11991_s3 + $0x540] sm:$0xf0]  ;;  %v5627_v19 = vld [vmem:[%s11991_s3 + $0x4ac] sm:$0xf0] }
 0x209   :  { %4560 = vmatpush.bf16.msra.mxu0 %v5090_v34  ;;  %4573 = vmatpush.bf16.msra.mxu1 %v5698_v38  ;;  %v7696_v34 = vld [vmem:[%s11991_s3 + $0x708] sm:$0xf0]  ;;  %v4354_v36 = vpop.f32.mrf.mxu0  ;;  %v6613_v38 = vld [vmem:[%s11991_s3 + $0xc18] sm:$0xf]  ;;  %v4968_v49 = vmin.f32 %v4949_v40, 0.999999 }
 0x20a   :  { %v5930_v46 = vor.u32 %v7696_v34, %v5929_v32  ;;  %v4355_v0 = vadd.f32 %v4354_v36, %v776_v45  ;;  %v7763_v20 = vld [vmem:[%s11991_s3 + $0x924] sm:$0xf]  ;;  %v7962_v32 = vld [vmem:[%s11991_s3 + $0xf58] sm:$0xf0] }
 0x20b   :  { %4585 = vmatpush.bf16.msra.mxu2 %v6382_v44  ;;  %v4367_v41 = vpop.f32.mrf.mxu1  ;;  %v8019_v44 = vld [vmem:[%s11991_s3 + $0x1120] sm:$0xf0]  ;;  %4987 = vst [vmem:[#allocation2 + $0x40] sm:$0xff] %v4968_v49  ;;  %v6238_v40 = vor.u32 %v7763_v20, %v6235_v23  ;;  %v8029_v20 = vld [vmem:[%s11991_s3 + $0x1174] sm:$0xf] }
 0x20c   :  { %4598 = vmatpush.bf16.msra.mxu3 %v6990_v48  ;;  %4561 = vmatmul.bf16.vlgmr.msra.gmra.mxu0 %v8607_v28  ;;  %v7525_v48 = vld [vmem:[%s11991_s3 + $0x1b0] sm:$0xf0]  ;;  %v4368_v16 = vadd.f32 %v4367_v41, %v4355_v0  ;;  %v7535_v23 = vld [vmem:[%s11991_s3 + $0x204] sm:$0xf] }
 0x20d   :  { %4605 = vmatpush.bf16.msrb.mxu0 %v5626_v39  ;;  %4618 = vmatpush.bf16.msrb.mxu1 %v6234_v43  ;;  %v7867_v39 = vld [vmem:[%s11991_s3 + $0xc60] sm:$0xf0]  ;;  %v7221_v43 = vld [vmem:[%s11991_s3 + $0x10d8] sm:$0xf]  ;;  %v5246_v57 = vor.u32 %v7525_v48, %v5245_v47  ;;  %v7725_v0 = vld [vmem:[%s11991_s3 + $0x7f4] sm:$0xf] }
 0x20e   :  { %4574 = vmatmul.bf16.vlgmr.msra.gmra.mxu1 %v8615_v33  ;;  %v6614_v50 = vor.u32 %v7867_v39, %v6613_v38  ;;  %v7222_v53 = vor.u32 %v8019_v44, %v7221_v43  ;;  %v5551_v38 = vld [vmem:[%s11991_s3 + $0x414] sm:$0xf0]  ;;  %v7943_v48 = vld [vmem:[%s11991_s3 + $0xec0] sm:$0xf0] }
 0x20f   :  { %4586 = vmatpush.bf16.msra.mxu2 %v6306_v59  ;;  %v5854_v59 = vor.u32 %v7677_v52, %v5853_v51  ;;  %v6159_v43 = vld [vmem:[%s11991_s3 + $0x8d4] sm:$0xf0]  ;;  %v6843_v51 = vld [vmem:[%s11991_s3 + $0xe2c] sm:$0xf0] }
 0x210   :  { %4599 = vmatpush.bf16.msra.mxu3 %v6914_v1  ;;  %v6309_v44 = vld [vmem:[%s11991_s3 + $0x9b8] sm:$0xf] }
 0x211   :  { %4606 = vmatpush.bf16.msrb.mxu0 %v5550_v56  ;;  %4619 = vmatpush.bf16.msrb.mxu1 %v6158_v60  ;;  %v7848_v56 = vld [vmem:[%s11991_s3 + $0xbc8] sm:$0xf0]  ;;  %v4356_v4 = vpop.f32.mrf.mxu0  ;;  %v6917_v47 = vld [vmem:[%s11991_s3 + $0xe78] sm:$0xf] }
 0x212   :  { %4587 = vmatmul.bf16.vlgmr.msra.gmra.mxu2 %v8649_v55  ;;  %v8000_v60 = vld [vmem:[%s11991_s3 + $0x1088] sm:$0xf0]  ;;  %v6538_v1 = vor.u32 %v7848_v56, %v6537_v54  ;;  %v7451_v54 = vld [vmem:[%s11991_s3 + $0x12ec] sm:$0xf0] }
 0x213   :  { %4631 = vmatpush.bf16.msrb.mxu2 %v6842_v2  ;;  %4600 = vmatmul.bf16.vlgmr.msra.gmra.mxu3 %v8660_v61  ;;  %v5777_v2 = vld [vmem:[%s11991_s3 + $0x590] sm:$0xf]  ;;  %v7146_v5 = vor.u32 %v8000_v60, %v7145_v58  ;;  %v4369_v29 = vpop.f32.mrf.mxu1  ;;  %v7573_v58 = vld [vmem:[%s11991_s3 + $0x334] sm:$0xf]  ;;  %v5475_v60 = vld [vmem:[%s11991_s3 + $0x37c] sm:$0xf0] }
 0x214   :  { %4644 = vmatpush.bf16.msrb.mxu3 %v7450_v6  ;;  %v6461_v6 = vld [vmem:[%s11991_s3 + $0xae8] sm:$0xf]  ;;  %v5778_v12 = vor.u32 %v7658_v3, %v5777_v2  ;;  %v7896_v4 = vld [vmem:[%s11991_s3 + $0xd4c] sm:$0xf]  ;;  %v7375_v29 = vld [vmem:[%s11991_s3 + $0x1254] sm:$0xf0] }
 0x215   :  { %4607 = vmatpush.bf16.msrb.mxu0 %v5474_v8  ;;  %4620 = vmatpush.bf16.msrb.mxu1 %v6082_v11  ;;  %v5170_v8 = vor.u32 %v7506_v63, %v5169_v62  ;;  %v5093_v11 = vld [vmem:[%s11991_s3 + $0x38] sm:$0xf]  ;;  %v6462_v17 = vor.u32 %v7829_v7, %v6461_v6  ;;  %v4380_v21 = vpop.f32.mrf.mxu2  ;;  %v6918_v62 = vor.u32 %v7943_v48, %v6917_v47  ;;  %v8048_v7 = vld [vmem:[%s11991_s3 + $0x120c] sm:$0xf] }
 0x216   :  { %v4381_v26 = vadd.f32 %v4380_v21, %v4368_v16  ;;  %v4393_v27 = vpop.f32.mrf.mxu3  ;;  %v5094_v30 = vor.u32 %v7487_v13, %v5093_v11  ;;  %v5478_v6 = vor.u32 %v7573_v58, %v5475_v60  ;;  %v6007_v13 = vld [vmem:[%s11991_s3 + $0x7a4] sm:$0xf0]  ;;  %v7877_v16 = vld [vmem:[%s11991_s3 + $0xcb4] sm:$0xf]  ;;  %v7299_v21 = vld [vmem:[%s11991_s3 + $0x11bc] sm:$0xf0] }
 0x217   :  { %4632 = vmatpush.bf16.msrb.mxu2 %v6766_v14  ;;  %v5701_v14 = vld [vmem:[%s11991_s3 + $0x4f8] sm:$0xf]  ;;  %v7668_v48 = vld [vmem:[%s11991_s3 + $0x62c] sm:$0xf]  ;;  %v7497_v58 = vld [vmem:[%s11991_s3 + $0xd4] sm:$0xf] }
 0x218   :  { %4645 = vmatpush.bf16.msrb.mxu3 %v7374_v18  ;;  %v7611_v18 = vld [vmem:[%s11991_s3 + $0x464] sm:$0xf]  ;;  %v5702_v34 = vor.u32 %v7639_v15, %v5701_v14  ;;  %v4394_v39 = vadd.f32 %v4393_v27, %v4381_v26  ;;  %v7378_v15 = vor.u32 %v8048_v7, %v7375_v29  ;;  %v5171_v60 = vld [vmem:[%s11991_s3 + $0x11c] sm:$0xf0]  ;;  %v7972_v7 = vld [vmem:[%s11991_s3 + $0xfac] sm:$0xf] }
 0x219   :  { %4608 = vmatpush.bf16.msrb.mxu0 %v5398_v22  ;;  %4621 = vmatpush.bf16.msrb.mxu1 %v6006_v25  ;;  %v7070_v22 = vor.u32 %v7981_v10, %v7069_v9  ;;  %v7810_v25 = vld [vmem:[%s11991_s3 + $0xa98] sm:$0xf0]  ;;  %v5630_v36 = vor.u32 %v7611_v18, %v5627_v19  ;;  %v5399_v10 = vld [vmem:[%s11991_s3 + $0x2e4] sm:$0xf0]  ;;  %v7687_v27 = vld [vmem:[%s11991_s3 + $0x6c4] sm:$0xf] }
 0x21a   :  { %v6386_v41 = vor.u32 %v7810_v25, %v6385_v24  ;;  %v4874_v49 = vmul.f32 0.5, %v4394_v39  ;;  %v7554_v9 = vld [vmem:[%s11991_s3 + $0x29c] sm:$0xf]  ;;  %v5323_v24 = vld [vmem:[%s11991_s3 + $0x24c] sm:$0xf0] }
 0x21b   :  { %4633 = vmatpush.bf16.msrb.mxu2 %v6690_v31  ;;  %v6993_v31 = vld [vmem:[%s11991_s3 + $0xf10] sm:$0xf]  ;;  %v5402_v19 = vor.u32 %v7554_v9, %v5399_v10  ;;  %v5326_v39 = vor.u32 %v7535_v23, %v5323_v24  ;;  %v7071_v29 = vld [vmem:[%s11991_s3 + $0xff4] sm:$0xf0]  ;;  %v5095_v10 = vld [vmem:[%s11991_s3 + $0x84] sm:$0xf0] }
 0x21c   :  { %4646 = vmatpush.bf16.msrb.mxu3 %v7298_v37  ;;  %v7592_v37 = vld [vmem:[%s11991_s3 + $0x3cc] sm:$0xf]  ;;  %v6994_v45 = vor.u32 %v7962_v32, %v6993_v31  ;;  %8098 = vtanh.f32 %v4874_v49  ;;  %v7302_v32 = vor.u32 %v8029_v20, %v7299_v21  ;;  %v5855_v49 = vld [vmem:[%s11991_s3 + $0x674] sm:$0xf0]  ;;  %v7773_v20 = vld [vmem:[%s11991_s3 + $0x970] sm:$0xf0] }
 0x21d   :  { %4609 = vmatpush.bf16.msrb.mxu0 %v5322_v42  ;;  %4622 = vmatpush.bf16.msrb.mxu1 %v5930_v46  ;;  %v7744_v42 = vld [vmem:[%s11991_s3 + $0x88c] sm:$0xf]  ;;  %v7791_v46 = vld [vmem:[%s11991_s3 + $0xa00] sm:$0xf0]  ;;  %v5554_v52 = vor.u32 %v7592_v37, %v5551_v38  ;;  %v7801_v21 = vld [vmem:[%s11991_s3 + $0xa54] sm:$0xf] }
 0x21e   :  { %v6162_v56 = vor.u32 %v7744_v42, %v6159_v43  ;;  %v4395_v2 = vpop.f32.mrf.mxu3  ;;  %v777_v42 = vperm.slane %v10881_v35, 2 }
 0x21f   :  { %4634 = vmatpush.bf16.msrb.mxu2 %v6614_v50  ;;  %v7915_v50 = vld [vmem:[%s11991_s3 + $0xde4] sm:$0xf] }
 0x220   :  { %4647 = vmatpush.bf16.msrb.mxu3 %v7222_v53  ;;  %v8067_v53 = vld [vmem:[%s11991_s3 + $0x12a4] sm:$0xf]  ;;  %v6846_v63 = vor.u32 %v7915_v50, %v6843_v51 }
 0x221   :  { %4610 = vmatpush.bf16.msrb.mxu0 %v5246_v57  ;;  %4623 = vmatpush.bf16.msrb.mxu1 %v5854_v59  ;;  %v6310_v57 = vor.u32 %v7791_v46, %v6309_v44  ;;  %v4382_v59 = vpop.f32.mrf.mxu2  ;;  %v7454_v3 = vor.u32 %v8067_v53, %v7451_v54  ;;  %v7516_v44 = vld [vmem:[%s11991_s3 + $0x16c] sm:$0xf]  ;;  %v7839_v51 = vld [vmem:[%s11991_s3 + $0xb84] sm:$0xf] }
 0x222   :  { %v8099_v14 = vpop.eup %8098  ;;  %v7991_v54 = vld [vmem:[%s11991_s3 + $0x1044] sm:$0xf] }
 0x223   :  { %4635 = vmatpush.bf16.msrb.mxu2 %v6538_v1  ;;  %v6083_v1 = vld [vmem:[%s11991_s3 + $0x83c] sm:$0xf0]  ;;  %v4912_v18 = vmul.f32 0.5, %v8099_v14 }
 0x224   :  { %4648 = vmatpush.bf16.msrb.mxu3 %v7146_v5  ;;  %v6767_v5 = vld [vmem:[%s11991_s3 + $0xd94] sm:$0xf0] }
 0x225   :  { %4611 = vmatpush.bf16.msrb.mxu0 %v5170_v8  ;;  %4624 = vmatpush.bf16.msrb.mxu1 %v5778_v12  ;;  %v6086_v8 = vor.u32 %v7725_v0, %v6083_v1  ;;  %v6770_v11 = vor.u32 %v7896_v4, %v6767_v5  ;;  %v7706_v12 = vld [vmem:[%s11991_s3 + $0x75c] sm:$0xf]  ;;  %v4931_v25 = vadd.f32 0.5, %v4912_v18  ;;  %v5779_v0 = vld [vmem:[%s11991_s3 + $0x5dc] sm:$0xf0] }
 0x226   :  { %v6463_v4 = vld [vmem:[%s11991_s3 + $0xb34] sm:$0xf0] }
 0x227   :  { %4636 = vmatpush.bf16.msrb.mxu2 %v6462_v17  ;;  %v6691_v17 = vld [vmem:[%s11991_s3 + $0xcfc] sm:$0xf0]  ;;  %v4950_v37 = vmax.f32 %v4931_v25, 1e-06 }
 0x228   :  { %4649 = vmatpush.bf16.msrb.mxu3 %v7070_v22  ;;  %v6010_v22 = vor.u32 %v7706_v12, %v6007_v13  ;;  %v6694_v26 = vor.u32 %v7877_v16, %v6691_v17  ;;  %v5703_v12 = vld [vmem:[%s11991_s3 + $0x544] sm:$0xf0]  ;;  %v7621_v16 = vld [vmem:[%s11991_s3 + $0x4b0] sm:$0xf0] }
 0x229   :  { %4612 = vmatpush.bf16.msrb.mxu0 %v5094_v30  ;;  %4625 = vmatpush.bf16.msrb.mxu1 %v5702_v34  ;;  %v5931_v30 = vld [vmem:[%s11991_s3 + $0x70c] sm:$0xf0]  ;;  %v4406_v31 = vpop.f32.mrf.mxu0  ;;  %v7858_v34 = vld [vmem:[%s11991_s3 + $0xc1c] sm:$0xf]  ;;  %v4969_v46 = vmin.f32 %v4950_v37, 0.999999 }
 0x22a   :  { %v5934_v43 = vor.u32 %v7687_v27, %v5931_v30  ;;  %v4407_v59 = vadd.f32 %v4406_v31, %v777_v42  ;;  %v6241_v17 = vld [vmem:[%s11991_s3 + $0x928] sm:$0xf]  ;;  %v6995_v27 = vld [vmem:[%s11991_s3 + $0xf5c] sm:$0xf0] }
 0x22b   :  { %4637 = vmatpush.bf16.msrb.mxu2 %v6386_v41  ;;  %v4419_v38 = vpop.f32.mrf.mxu1  ;;  %v7223_v41 = vld [vmem:[%s11991_s3 + $0x1124] sm:$0xf0]  ;;  %4988 = vst [vmem:[#allocation2 + $0x48] sm:$0xff] %v4969_v46  ;;  %v6242_v37 = vor.u32 %v7773_v20, %v6241_v17  ;;  %v7305_v17 = vld [vmem:[%s11991_s3 + $0x1178] sm:$0xf] }
 0x22c   :  { %4650 = vmatpush.bf16.msrb.mxu3 %v6994_v45  ;;  %4613 = vmatmul.bf16.vlgmr.msrb.gmra.mxu0 %v8607_v28  ;;  %v5247_v45 = vld [vmem:[%s11991_s3 + $0x1b4] sm:$0xf0]  ;;  %v4420_v13 = vadd.f32 %v4419_v38, %v4407_v59  ;;  %v5329_v20 = vld [vmem:[%s11991_s3 + $0x208] sm:$0xf] }
 0x22d   :  { %4657 = vmatpush.bf16.msra.mxu0 %v5630_v36  ;;  %4670 = vmatpush.bf16.msra.mxu1 %v6238_v40  ;;  %v6615_v36 = vld [vmem:[%s11991_s3 + $0xc64] sm:$0xf0]  ;;  %v8010_v40 = vld [vmem:[%s11991_s3 + $0x10dc] sm:$0xf]  ;;  %v5250_v53 = vor.u32 %v7516_v44, %v5247_v45  ;;  %v6089_v59 = vld [vmem:[%s11991_s3 + $0x7f8] sm:$0xf] }
 0x22e   :  { %4626 = vmatmul.bf16.vlgmr.msrb.gmra.mxu1 %v8615_v33  ;;  %v6618_v47 = vor.u32 %v7858_v34, %v6615_v36  ;;  %v7226_v50 = vor.u32 %v8010_v40, %v7223_v41  ;;  %v7602_v34 = vld [vmem:[%s11991_s3 + $0x418] sm:$0xf0]  ;;  %v6919_v45 = vld [vmem:[%s11991_s3 + $0xec4] sm:$0xf0] }
 0x22f   :  { %4638 = vmatpush.bf16.msrb.mxu2 %v6310_v57  ;;  %v5858_v57 = vor.u32 %v7668_v48, %v5855_v49  ;;  %v7754_v40 = vld [vmem:[%s11991_s3 + $0x8d8] sm:$0xf0]  ;;  %v7925_v48 = vld [vmem:[%s11991_s3 + $0xe30] sm:$0xf0] }
 0x230   :  { %4651 = vmatpush.bf16.msrb.mxu3 %v6918_v62  ;;  %v7782_v41 = vld [vmem:[%s11991_s3 + $0x9bc] sm:$0xf] }
 0x231   :  { %4658 = vmatpush.bf16.msra.mxu0 %v5554_v52  ;;  %4671 = vmatpush.bf16.msra.mxu1 %v6162_v56  ;;  %v6539_v52 = vld [vmem:[%s11991_s3 + $0xbcc] sm:$0xf0]  ;;  %v4408_v1 = vpop.f32.mrf.mxu0  ;;  %v7934_v44 = vld [vmem:[%s11991_s3 + $0xe7c] sm:$0xf] }
 0x232   :  { %4639 = vmatmul.bf16.vlgmr.msrb.gmra.mxu2 %v8649_v55  ;;  %v7147_v56 = vld [vmem:[%s11991_s3 + $0x108c] sm:$0xf0]  ;;  %v6542_v62 = vor.u32 %v7839_v51, %v6539_v52  ;;  %v8077_v51 = vld [vmem:[%s11991_s3 + $0x12f0] sm:$0xf0] }
 0x233   :  { %4683 = vmatpush.bf16.msra.mxu2 %v6846_v63  ;;  %4652 = vmatmul.bf16.vlgmr.msrb.gmra.mxu3 %v8660_v61  ;;  %v7649_v63 = vld [vmem:[%s11991_s3 + $0x594] sm:$0xf]  ;;  %v7150_v2 = vor.u32 %v7991_v54, %v7147_v56  ;;  %v4421_v5 = vpop.f32.mrf.mxu1  ;;  %v5481_v54 = vld [vmem:[%s11991_s3 + $0x338] sm:$0xf]  ;;  %v7583_v56 = vld [vmem:[%s11991_s3 + $0x380] sm:$0xf0] }
 0x234   :  { %4696 = vmatpush.bf16.msra.mxu3 %v7454_v3  ;;  %v7820_v3 = vld [vmem:[%s11991_s3 + $0xaec] sm:$0xf]  ;;  %v5782_v9 = vor.u32 %v7649_v63, %v5779_v0  ;;  %v6773_v1 = vld [vmem:[%s11991_s3 + $0xd50] sm:$0xf]  ;;  %v8058_v5 = vld [vmem:[%s11991_s3 + $0x1258] sm:$0xf0] }
 0x235   :  { %4659 = vmatpush.bf16.msra.mxu0 %v5478_v6  ;;  %4672 = vmatpush.bf16.msra.mxu1 %v6086_v8  ;;  %v5174_v6 = vor.u32 %v7497_v58, %v5171_v60  ;;  %v7478_v8 = vld [vmem:[%s11991_s3 + $0x3c] sm:$0xf]  ;;  %v6466_v14 = vor.u32 %v7820_v3, %v6463_v4  ;;  %v4432_v18 = vpop.f32.mrf.mxu2  ;;  %v6922_v58 = vor.u32 %v7934_v44, %v6919_v45  ;;  %v7381_v4 = vld [vmem:[%s11991_s3 + $0x1210] sm:$0xf] }
 0x236   :  { %v4433_v23 = vadd.f32 %v4432_v18, %v4420_v13  ;;  %v4445_v24 = vpop.f32.mrf.mxu3  ;;  %v5098_v25 = vor.u32 %v7478_v8, %v5095_v10  ;;  %v5482_v3 = vor.u32 %v7583_v56, %v5481_v54  ;;  %v7716_v10 = vld [vmem:[%s11991_s3 + $0x7a8] sm:$0xf0]  ;;  %v6697_v13 = vld [vmem:[%s11991_s3 + $0xcb8] sm:$0xf]  ;;  %v8039_v18 = vld [vmem:[%s11991_s3 + $0x11c0] sm:$0xf0] }
 0x237   :  { %4684 = vmatpush.bf16.msra.mxu2 %v6770_v11  ;;  %v7630_v11 = vld [vmem:[%s11991_s3 + $0x4fc] sm:$0xf]  ;;  %v5861_v45 = vld [vmem:[%s11991_s3 + $0x630] sm:$0xf]  ;;  %v7507_v54 = vld [vmem:[%s11991_s3 + $0x120] sm:$0xf0] }
 0x238   :  { %4697 = vmatpush.bf16.msra.mxu3 %v7378_v15  ;;  %v5633_v15 = vld [vmem:[%s11991_s3 + $0x468] sm:$0xf]  ;;  %v5706_v30 = vor.u32 %v7630_v11, %v5703_v12  ;;  %v4446_v36 = vadd.f32 %v4445_v24, %v4433_v23  ;;  %v7382_v12 = vor.u32 %v8058_v5, %v7381_v4  ;;  %v7982_v4 = vld [vmem:[%s11991_s3 + $0xff8] sm:$0xf0]  ;;  %v5101_v5 = vld [vmem:[%s11991_s3 + $0x40] sm:$0xf] }
 0x239   :  { %4660 = vmatpush.bf16.msra.mxu0 %v5402_v19  ;;  %4673 = vmatpush.bf16.msra.mxu1 %v6010_v22  ;;  %v7074_v19 = vor.u32 %v7972_v7, %v7071_v29  ;;  %v6387_v22 = vld [vmem:[%s11991_s3 + $0xa9c] sm:$0xf0]  ;;  %v5634_v31 = vor.u32 %v7621_v16, %v5633_v15  ;;  %v7564_v29 = vld [vmem:[%s11991_s3 + $0x2e8] sm:$0xf0]  ;;  %v5937_v24 = vld [vmem:[%s11991_s3 + $0x6c8] sm:$0xf] }
 0x23a   :  { %v6390_v38 = vor.u32 %v7801_v21, %v6387_v22  ;;  %v4875_v46 = vmul.f32 0.5, %v4446_v36  ;;  %v5405_v7 = vld [vmem:[%s11991_s3 + $0x2a0] sm:$0xf]  ;;  %v7545_v21 = vld [vmem:[%s11991_s3 + $0x250] sm:$0xf0] }
 0x23b   :  { %4685 = vmatpush.bf16.msra.mxu2 %v6694_v26  ;;  %v7953_v26 = vld [vmem:[%s11991_s3 + $0xf14] sm:$0xf]  ;;  %v5406_v16 = vor.u32 %v7564_v29, %v5405_v7  ;;  %v5330_v36 = vor.u32 %v7545_v21, %v5329_v20  ;;  %v7488_v7 = vld [vmem:[%s11991_s3 + $0x88] sm:$0xf0]  ;;  %v5709_v29 = vld [vmem:[%s11991_s3 + $0x500] sm:$0xf] }
 0x23c   :  { %4698 = vmatpush.bf16.msra.mxu3 %v7302_v32  ;;  %v5557_v32 = vld [vmem:[%s11991_s3 + $0x3d0] sm:$0xf]  ;;  %v6998_v42 = vor.u32 %v7953_v26, %v6995_v27  ;;  %8100 = vtanh.f32 %v4875_v46  ;;  %v7306_v27 = vor.u32 %v8039_v18, %v7305_v17  ;;  %v6393_v17 = vld [vmem:[%s11991_s3 + $0xa58] sm:$0xf]  ;;  %v7811_v18 = vld [vmem:[%s11991_s3 + $0xaa0] sm:$0xf0]  ;;  %v5102_v21 = vor.u32 %v7488_v7, %v5101_v5 }
 0x23d   :  { %4661 = vmatpush.bf16.msra.mxu0 %v5326_v39  ;;  %4674 = vmatpush.bf16.msra.mxu1 %v5934_v43  ;;  %v6165_v39 = vld [vmem:[%s11991_s3 + $0x890] sm:$0xf]  ;;  %v6311_v43 = vld [vmem:[%s11991_s3 + $0xa04] sm:$0xf0]  ;;  %v5558_v49 = vor.u32 %v7602_v34, %v5557_v32  ;;  %v7707_v5 = vld [vmem:[%s11991_s3 + $0x764] sm:$0xf] }
 0x23e   :  { %v6166_v52 = vor.u32 %v7754_v40, %v6165_v39  ;;  %v4447_v63 = vpop.f32.mrf.mxu3  ;;  %v778_v39 = vperm.slane %v10881_v35, 3  ;;  %v7678_v35 = vld [vmem:[%s11991_s3 + $0x678] sm:$0xf0] }
 0x23f   :  { %4686 = vmatpush.bf16.msra.mxu2 %v6618_v47  ;;  %v6849_v47 = vld [vmem:[%s11991_s3 + $0xde8] sm:$0xf]  ;;  %v6469_v63 = vld [vmem:[%s11991_s3 + $0xaf0] sm:$0xf] }
 0x240   :  { %4699 = vmatpush.bf16.msra.mxu3 %v7226_v50  ;;  %v7457_v50 = vld [vmem:[%s11991_s3 + $0x12a8] sm:$0xf]  ;;  %v6850_v60 = vor.u32 %v7925_v48, %v6849_v47  ;;  %v7849_v48 = vld [vmem:[%s11991_s3 + $0xbd0] sm:$0xf0] }
 0x241   :  { %4662 = vmatpush.bf16.msra.mxu0 %v5250_v53  ;;  %4675 = vmatpush.bf16.msra.mxu1 %v5858_v57  ;;  %v6314_v53 = vor.u32 %v7782_v41, %v6311_v43  ;;  %v4434_v57 = vpop.f32.mrf.mxu2  ;;  %v7458_v0 = vor.u32 %v8077_v51, %v7457_v50  ;;  %v5253_v41 = vld [vmem:[%s11991_s3 + $0x170] sm:$0xf]  ;;  %v6545_v47 = vld [vmem:[%s11991_s3 + $0xb88] sm:$0xf]  ;;  %v8001_v51 = vld [vmem:[%s11991_s3 + $0x1090] sm:$0xf0] }
 0x242   :  { %v8101_v11 = vpop.eup %8100  ;;  %v7153_v50 = vld [vmem:[%s11991_s3 + $0x1048] sm:$0xf]  ;;  %v6546_v57 = vor.u32 %v7849_v48, %v6545_v47 }
 0x243   :  { %4687 = vmatpush.bf16.msra.mxu2 %v6542_v62  ;;  %v7735_v62 = vld [vmem:[%s11991_s3 + $0x840] sm:$0xf0]  ;;  %v4913_v15 = vmul.f32 0.5, %v8101_v11  ;;  %v7612_v11 = vld [vmem:[%s11991_s3 + $0x46c] sm:$0xf] }
 0x244   :  { %4700 = vmatpush.bf16.msra.mxu3 %v7150_v2  ;;  %v7906_v2 = vld [vmem:[%s11991_s3 + $0xd98] sm:$0xf0] }
 0x245   :  { %4663 = vmatpush.bf16.msra.mxu0 %v5174_v6  ;;  %4676 = vmatpush.bf16.msra.mxu1 %v5782_v9  ;;  %v6090_v6 = vor.u32 %v7735_v62, %v6089_v59  ;;  %v6774_v8 = vor.u32 %v7906_v2, %v6773_v1  ;;  %v6013_v9 = vld [vmem:[%s11991_s3 + $0x760] sm:$0xf]  ;;  %v4932_v22 = vadd.f32 0.5, %v4913_v15  ;;  %v7154_v62 = vor.u32 %v8001_v51, %v7153_v50  ;;  %v5483_v50 = vld [vmem:[%s11991_s3 + $0x384] sm:$0xf0] }
 0x247   :  { %4688 = vmatpush.bf16.msra.mxu2 %v6466_v14  ;;  %v7887_v14 = vld [vmem:[%s11991_s3 + $0xd00] sm:$0xf0]  ;;  %v4951_v32 = vmax.f32 %v4932_v22, 1e-06  ;;  %v7001_v22 = vld [vmem:[%s11991_s3 + $0xf18] sm:$0xf] }
 0x248   :  { %4701 = vmatpush.bf16.msra.mxu3 %v7074_v19  ;;  %v6014_v19 = vor.u32 %v7716_v10, %v6013_v9  ;;  %v6698_v23 = vor.u32 %v7887_v14, %v6697_v13  ;;  %v7764_v13 = vld [vmem:[%s11991_s3 + $0x92c] sm:$0xf] }
 0x249   :  { %4664 = vmatpush.bf16.msra.mxu0 %v5098_v25  ;;  %4677 = vmatpush.bf16.msra.mxu1 %v5706_v30  ;;  %v7697_v25 = vld [vmem:[%s11991_s3 + $0x710] sm:$0xf0]  ;;  %v4458_v26 = vpop.f32.mrf.mxu0  ;;  %v6621_v30 = vld [vmem:[%s11991_s3 + $0xc20] sm:$0xf]  ;;  %v4970_v43 = vmin.f32 %v4951_v32, 0.999999  ;;  %v6394_v32 = vor.u32 %v7811_v18, %v6393_v17 }
 0x24a   :  { %v5938_v40 = vor.u32 %v7697_v25, %v5937_v24  ;;  %v4459_v56 = vadd.f32 %v4458_v26, %v778_v39  ;;  %v7593_v26 = vld [vmem:[%s11991_s3 + $0x3d4] sm:$0xf]  ;;  %v7792_v39 = vld [vmem:[%s11991_s3 + $0xa08] sm:$0xf0] }
 0x24b   :  { %4689 = vmatpush.bf16.msra.mxu2 %v6390_v38  ;;  %v4471_v34 = vpop.f32.mrf.mxu1  ;;  %v8020_v38 = vld [vmem:[%s11991_s3 + $0x1128] sm:$0xf0]  ;;  %4989 = vst [vmem:[#allocation2 + $0x50] sm:$0xff] %v4970_v43 }
 0x24c   :  { %4702 = vmatpush.bf16.msra.mxu3 %v6998_v42  ;;  %4665 = vmatmul.bf16.vlgmr.msra.gmra.mxu0 %v8607_v28  ;;  %v7526_v42 = vld [vmem:[%s11991_s3 + $0x1b8] sm:$0xf0]  ;;  %v4472_v9 = vadd.f32 %v4471_v34, %v4459_v56  ;;  %v7745_v34 = vld [vmem:[%s11991_s3 + $0x894] sm:$0xf]  ;;  %v7916_v43 = vld [vmem:[%s11991_s3 + $0xdec] sm:$0xf] }
 0x24d   :  { %4709 = vmatpush.bf16.msrb.mxu0 %v5634_v31  ;;  %4722 = vmatpush.bf16.msrb.mxu1 %v6242_v37  ;;  %v7868_v31 = vld [vmem:[%s11991_s3 + $0xc68] sm:$0xf0]  ;;  %v7229_v37 = vld [vmem:[%s11991_s3 + $0x10e0] sm:$0xf]  ;;  %v6091_v56 = vld [vmem:[%s11991_s3 + $0x844] sm:$0xf0] }
 0x24e   :  { %4678 = vmatmul.bf16.vlgmr.msra.gmra.mxu1 %v8615_v33  ;;  %v6622_v44 = vor.u32 %v7868_v31, %v6621_v30  ;;  %v7230_v46 = vor.u32 %v8020_v38, %v7229_v37  ;;  %v6317_v37 = vld [vmem:[%s11991_s3 + $0x9c0] sm:$0xf] }
 0x24f   :  { %4690 = vmatpush.bf16.msra.mxu2 %v6314_v53  ;;  %v5177_v53 = vld [vmem:[%s11991_s3 + $0xd8] sm:$0xf]  ;;  %v6318_v48 = vor.u32 %v7792_v39, %v6317_v37  ;;  %v7517_v37 = vld [vmem:[%s11991_s3 + $0x174] sm:$0xf] }
 0x250   :  { %4703 = vmatpush.bf16.msra.mxu3 %v6922_v58  ;;  %v5785_v58 = vld [vmem:[%s11991_s3 + $0x598] sm:$0xf]  ;;  %v5178_v2 = vor.u32 %v7507_v54, %v5177_v53  ;;  %v7726_v54 = vld [vmem:[%s11991_s3 + $0x7fc] sm:$0xf] }
 0x251   :  { %4710 = vmatpush.bf16.msrb.mxu0 %v5558_v49  ;;  %4723 = vmatpush.bf16.msrb.mxu1 %v6166_v52  ;;  %v5254_v49 = vor.u32 %v7526_v42, %v5253_v41  ;;  %v5862_v52 = vor.u32 %v7678_v35, %v5861_v45  ;;  %v4460_v59 = vpop.f32.mrf.mxu0  ;;  %v7944_v41 = vld [vmem:[%s11991_s3 + $0xec8] sm:$0xf0] }
 0x252   :  { %4691 = vmatmul.bf16.vlgmr.msra.gmra.mxu2 %v8649_v55  ;;  %v8068_v35 = vld [vmem:[%s11991_s3 + $0x12ac] sm:$0xf]  ;;  %v6775_v59 = vld [vmem:[%s11991_s3 + $0xd9c] sm:$0xf0] }
 0x253   :  { %4735 = vmatpush.bf16.msrb.mxu2 %v6850_v60  ;;  %4704 = vmatmul.bf16.vlgmr.msra.gmra.mxu3 %v8660_v61  ;;  %v7659_v60 = vld [vmem:[%s11991_s3 + $0x5e0] sm:$0xf0]  ;;  %v4473_v1 = vpop.f32.mrf.mxu1 }
 0x254   :  { %4748 = vmatpush.bf16.msrb.mxu3 %v7458_v0  ;;  %v7830_v0 = vld [vmem:[%s11991_s3 + $0xb38] sm:$0xf0]  ;;  %v6094_v1 = vor.u32 %v7726_v54, %v6091_v56  ;;  %v5787_v54 = vld [vmem:[%s11991_s3 + $0x5e4] sm:$0xf0] }
 0x255   :  { %4711 = vmatpush.bf16.msrb.mxu0 %v5482_v3  ;;  %4724 = vmatpush.bf16.msrb.mxu1 %v6090_v6  ;;  %v7077_v3 = vld [vmem:[%s11991_s3 + $0xfb0] sm:$0xf]  ;;  %v5786_v6 = vor.u32 %v7659_v60, %v5785_v58  ;;  %v6470_v10 = vor.u32 %v7830_v0, %v6469_v63  ;;  %v4484_v14 = vpop.f32.mrf.mxu2  ;;  %v7897_v60 = vld [vmem:[%s11991_s3 + $0xd54] sm:$0xf]  ;;  %v7383_v0 = vld [vmem:[%s11991_s3 + $0x125c] sm:$0xf0] }
 0x256   :  { %v7078_v15 = vor.u32 %v7982_v4, %v7077_v3  ;;  %v4497_v20 = vpop.f32.mrf.mxu3  ;;  %v8049_v63 = vld [vmem:[%s11991_s3 + $0x1214] sm:$0xf]  ;;  %v5407_v3 = vld [vmem:[%s11991_s3 + $0x2ec] sm:$0xf0]  ;;  %v6778_v4 = vor.u32 %v7897_v60, %v6775_v59  ;;  %v6471_v60 = vld [vmem:[%s11991_s3 + $0xb3c] sm:$0xf0] }
 0x257   :  { %4736 = vmatpush.bf16.msrb.mxu2 %v6774_v8  ;;  %v7640_v8 = vld [vmem:[%s11991_s3 + $0x548] sm:$0xf0] }
 0x258   :  { %4749 = vmatpush.bf16.msrb.mxu3 %v7382_v12  ;;  %v5635_v12 = vld [vmem:[%s11991_s3 + $0x4b4] sm:$0xf0]  ;;  %v5710_v24 = vor.u32 %v7640_v8, %v5709_v29  ;;  %v7386_v29 = vor.u32 %v8049_v63, %v7383_v0  ;;  %v7878_v8 = vld [vmem:[%s11991_s3 + $0xcbc] sm:$0xf]  ;;  %v7973_v63 = vld [vmem:[%s11991_s3 + $0xfb4] sm:$0xf] }
 0x259   :  { %4712 = vmatpush.bf16.msrb.mxu0 %v5406_v16  ;;  %4725 = vmatpush.bf16.msrb.mxu1 %v6014_v19  ;;  %v6243_v16 = vld [vmem:[%s11991_s3 + $0x974] sm:$0xf0]  ;;  %v4485_v19 = vadd.f32 %v4484_v14, %v4472_v9  ;;  %v5638_v25 = vor.u32 %v7612_v11, %v5635_v12  ;;  %v6699_v9 = vld [vmem:[%s11991_s3 + $0xd04] sm:$0xf0]  ;;  %v8030_v12 = vld [vmem:[%s11991_s3 + $0x117c] sm:$0xf] }
 0x25a   :  { %v6246_v31 = vor.u32 %v7764_v13, %v6243_v16  ;;  %v7307_v13 = vld [vmem:[%s11991_s3 + $0x11c4] sm:$0xf0]  ;;  %v5331_v16 = vld [vmem:[%s11991_s3 + $0x254] sm:$0xf0]  ;;  %v6702_v18 = vor.u32 %v7878_v8, %v6699_v9  ;;  %v7079_v0 = vld [vmem:[%s11991_s3 + $0xffc] sm:$0xf0] }
 0x25b   :  { %4737 = vmatpush.bf16.msrb.mxu2 %v6698_v23  ;;  %v7963_v23 = vld [vmem:[%s11991_s3 + $0xf60] sm:$0xf0]  ;;  %v4498_v30 = vadd.f32 %v4497_v20, %v4485_v19  ;;  %v7688_v19 = vld [vmem:[%s11991_s3 + $0x6cc] sm:$0xf]  ;;  %v5939_v20 = vld [vmem:[%s11991_s3 + $0x714] sm:$0xf0] }
 0x25c   :  { %4750 = vmatpush.bf16.msrb.mxu3 %v7306_v27  ;;  %v5559_v27 = vld [vmem:[%s11991_s3 + $0x41c] sm:$0xf0]  ;;  %v7002_v38 = vor.u32 %v7963_v23, %v7001_v22  ;;  %v7310_v22 = vor.u32 %v8030_v12, %v7307_v13  ;;  %v7859_v23 = vld [vmem:[%s11991_s3 + $0xc24] sm:$0xf]  ;;  %v7622_v8 = vld [vmem:[%s11991_s3 + $0x4b8] sm:$0xf0] }
 0x25d   :  { %4713 = vmatpush.bf16.msrb.mxu0 %v5330_v36  ;;  %4726 = vmatpush.bf16.msrb.mxu1 %v5938_v40  ;;  %v6167_v36 = vld [vmem:[%s11991_s3 + $0x8dc] sm:$0xf0]  ;;  %v4876_v42 = vmul.f32 0.5, %v4498_v30  ;;  %v5562_v45 = vor.u32 %v7593_v26, %v5559_v27  ;;  %v4486_v51 = vpop.f32.mrf.mxu2  ;;  %v8011_v30 = vld [vmem:[%s11991_s3 + $0x10e4] sm:$0xf] }
 0x25e   :  { %v6925_v40 = vld [vmem:[%s11991_s3 + $0xe80] sm:$0xf]  ;;  %v6170_v47 = vor.u32 %v7745_v34, %v6167_v36  ;;  %v5942_v36 = vor.u32 %v7688_v19, %v5939_v20  ;;  %v6249_v9 = vld [vmem:[%s11991_s3 + $0x930] sm:$0xf]  ;;  %v7774_v12 = vld [vmem:[%s11991_s3 + $0x978] sm:$0xf0] }
 0x25f   :  { %4738 = vmatpush.bf16.msrb.mxu2 %v6622_v44  ;;  %v6851_v44 = vld [vmem:[%s11991_s3 + $0xe34] sm:$0xf0]  ;;  %8102 = vtanh.f32 %v4876_v42  ;;  %v5863_v42 = vld [vmem:[%s11991_s3 + $0x67c] sm:$0xf0]  ;;  %v7802_v13 = vld [vmem:[%s11991_s3 + $0xa5c] sm:$0xf] }
 0x260   :  { %4751 = vmatpush.bf16.msrb.mxu3 %v7230_v46  ;;  %v7459_v46 = vld [vmem:[%s11991_s3 + $0x12f4] sm:$0xf0]  ;;  %v6854_v53 = vor.u32 %v7916_v43, %v6851_v44  ;;  %v7840_v44 = vld [vmem:[%s11991_s3 + $0xb8c] sm:$0xf]  ;;  %v7003_v19 = vld [vmem:[%s11991_s3 + $0xf64] sm:$0xf0] }
 0x261   :  { %4714 = vmatpush.bf16.msrb.mxu0 %v5254_v49  ;;  %4727 = vmatpush.bf16.msrb.mxu1 %v5862_v52  ;;  %v7574_v49 = vld [vmem:[%s11991_s3 + $0x33c] sm:$0xf]  ;;  %v6926_v52 = vor.u32 %v7944_v41, %v6925_v40  ;;  %v7462_v58 = vor.u32 %v8068_v35, %v7459_v46  ;;  %v7669_v41 = vld [vmem:[%s11991_s3 + $0x634] sm:$0xf]  ;;  %v7992_v46 = vld [vmem:[%s11991_s3 + $0x104c] sm:$0xf] }
 0x263   :  { %4739 = vmatpush.bf16.msrb.mxu2 %v6546_v57  ;;  %v4499_v57 = vpop.f32.mrf.mxu3 }
 0x264   :  { %4752 = vmatpush.bf16.msrb.mxu3 %v7154_v62  ;;  %v5486_v62 = vor.u32 %v7574_v49, %v5483_v50  ;;  %v7498_v49 = vld [vmem:[%s11991_s3 + $0xdc] sm:$0xf]  ;;  %v5179_v50 = vld [vmem:[%s11991_s3 + $0x124] sm:$0xf0] }
 0x265   :  { %4715 = vmatpush.bf16.msrb.mxu0 %v5178_v2  ;;  %4728 = vmatpush.bf16.msrb.mxu1 %v5786_v6  ;;  %v7555_v2 = vld [vmem:[%s11991_s3 + $0x2a4] sm:$0xf]  ;;  %v6015_v6 = vld [vmem:[%s11991_s3 + $0x7ac] sm:$0xf0]  ;;  %v8103_v7 = vpop.eup %8102 }
 0x266   :  { %v5410_v11 = vor.u32 %v7555_v2, %v5407_v3  ;;  %v6018_v14 = vor.u32 %v7707_v5, %v6015_v6  ;;  %v5103_v3 = vld [vmem:[%s11991_s3 + $0x8c] sm:$0xf0] }
 0x267   :  { %4740 = vmatpush.bf16.msrb.mxu2 %v6470_v10  ;;  %v4914_v10 = vmul.f32 0.5, %v8103_v7  ;;  %v5711_v5 = vld [vmem:[%s11991_s3 + $0x54c] sm:$0xf0] }
 0x268   :  { %4753 = vmatpush.bf16.msrb.mxu3 %v7078_v15  ;;  %v7536_v15 = vld [vmem:[%s11991_s3 + $0x20c] sm:$0xf] }
 0x269   :  { %4716 = vmatpush.bf16.msrb.mxu0 %v5102_v21  ;;  %4729 = vmatpush.bf16.msrb.mxu1 %v5710_v24  ;;  %v4933_v17 = vadd.f32 0.5, %v4914_v10  ;;  %v4510_v21 = vpop.f32.mrf.mxu0  ;;  %v6623_v24 = vld [vmem:[%s11991_s3 + $0xc6c] sm:$0xf0]  ;;  %v5334_v27 = vor.u32 %v7536_v15, %v5331_v16 }
 0x26a   :  { %v6626_v40 = vor.u32 %v7859_v23, %v6623_v24  ;;  %v7603_v23 = vld [vmem:[%s11991_s3 + $0x420] sm:$0xf0] }
 0x26b   :  { %4741 = vmatpush.bf16.msrb.mxu2 %v6394_v32  ;;  %v4523_v26 = vpop.f32.mrf.mxu1  ;;  %v11692_v32 = vld [vmem:[%s11992_s4 + $0x8] sm:$0xff] }
 0x26c   :  { %4754 = vmatpush.bf16.msrb.mxu3 %v7002_v38  ;;  %4717 = vmatmul.bf16.vlgmr.msrb.gmra.mxu0 %v8607_v28  ;;  %v779_v34 = vperm.slane %v11692_v32, 4  ;;  %v5255_v38 = vld [vmem:[%s11991_s3 + $0x1bc] sm:$0xf0] }
 0x26d   :  { %4761 = vmatpush.bf16.msra.mxu0 %v5638_v25  ;;  %4774 = vmatpush.bf16.msra.mxu1 %v6246_v31  ;;  %v4952_v25 = vmax.f32 %v4933_v17, 1e-06  ;;  %v7231_v31 = vld [vmem:[%s11991_s3 + $0x112c] sm:$0xf0]  ;;  %v5258_v35 = vor.u32 %v7517_v37, %v5255_v38  ;;  %v7935_v37 = vld [vmem:[%s11991_s3 + $0xe84] sm:$0xf] }
 0x26e   :  { %4730 = vmatmul.bf16.vlgmr.msrb.gmra.mxu1 %v8615_v33  ;;  %v7234_v43 = vor.u32 %v8011_v30, %v7231_v31  ;;  %v4511_v51 = vadd.f32 %v4510_v21, %v779_v34  ;;  %v7755_v30 = vld [vmem:[%s11991_s3 + $0x8e0] sm:$0xf0]  ;;  %v6927_v38 = vld [vmem:[%s11991_s3 + $0xecc] sm:$0xf0] }
 0x26f   :  { %4742 = vmatpush.bf16.msrb.mxu2 %v6318_v48  ;;  %v4971_v39 = vmin.f32 %v4952_v25, 0.999999  ;;  %v5866_v48 = vor.u32 %v7669_v41, %v5863_v42  ;;  %v6250_v25 = vor.u32 %v7774_v12, %v6249_v9  ;;  %v7783_v31 = vld [vmem:[%s11991_s3 + $0x9c4] sm:$0xf]  ;;  %v7926_v41 = vld [vmem:[%s11991_s3 + $0xe38] sm:$0xf0] }
 0x270   :  { %4755 = vmatpush.bf16.msrb.mxu3 %v6926_v52  ;;  %v4524_v6 = vadd.f32 %v4523_v26, %v4511_v51  ;;  %v6097_v51 = vld [vmem:[%s11991_s3 + $0x800] sm:$0xf]  ;;  %v5337_v12 = vld [vmem:[%s11991_s3 + $0x210] sm:$0xf] }
 0x271   :  { %4762 = vmatpush.bf16.msra.mxu0 %v5562_v45  ;;  %4775 = vmatpush.bf16.msra.mxu1 %v6170_v47  ;;  %v6547_v45 = vld [vmem:[%s11991_s3 + $0xbd4] sm:$0xf0]  ;;  %4990 = vst [vmem:[#allocation2 + $0x58] sm:$0xff] %v4971_v39  ;;  %v4512_v56 = vpop.f32.mrf.mxu0  ;;  %v7313_v9 = vld [vmem:[%s11991_s3 + $0x1180] sm:$0xf] }
 0x272   :  { %4743 = vmatmul.bf16.vlgmr.msrb.gmra.mxu2 %v8649_v55  ;;  %v7155_v47 = vld [vmem:[%s11991_s3 + $0x1094] sm:$0xf0]  ;;  %v6550_v52 = vor.u32 %v7840_v44, %v6547_v45  ;;  %v8078_v44 = vld [vmem:[%s11991_s3 + $0x12f8] sm:$0xf0] }
 0x273   :  { %4787 = vmatpush.bf16.msra.mxu2 %v6854_v53  ;;  %4756 = vmatmul.bf16.vlgmr.msrb.gmra.mxu3 %v8660_v61  ;;  %v7650_v53 = vld [vmem:[%s11991_s3 + $0x59c] sm:$0xf]  ;;  %v7158_v57 = vor.u32 %v7992_v46, %v7155_v47  ;;  %v4525_v59 = vpop.f32.mrf.mxu1  ;;  %v5489_v46 = vld [vmem:[%s11991_s3 + $0x340] sm:$0xf]  ;;  %v7584_v47 = vld [vmem:[%s11991_s3 + $0x388] sm:$0xf0] }
 0x274   :  { %4800 = vmatpush.bf16.msra.mxu3 %v7462_v58  ;;  %v7821_v58 = vld [vmem:[%s11991_s3 + $0xaf4] sm:$0xf]  ;;  %v5790_v2 = vor.u32 %v7650_v53, %v5787_v54  ;;  %v6781_v56 = vld [vmem:[%s11991_s3 + $0xd58] sm:$0xf]  ;;  %v8059_v59 = vld [vmem:[%s11991_s3 + $0x1260] sm:$0xf0] }
 0x275   :  { %4763 = vmatpush.bf16.msra.mxu0 %v5486_v62  ;;  %4776 = vmatpush.bf16.msra.mxu1 %v6094_v1  ;;  %v5182_v62 = vor.u32 %v7498_v49, %v5179_v50  ;;  %v7479_v1 = vld [vmem:[%s11991_s3 + $0x44] sm:$0xf]  ;;  %v6474_v7 = vor.u32 %v7821_v58, %v6471_v60  ;;  %v4536_v10 = vpop.f32.mrf.mxu2  ;;  %v6930_v49 = vor.u32 %v7935_v37, %v6927_v38  ;;  %v7389_v60 = vld [vmem:[%s11991_s3 + $0x1218] sm:$0xf] }
 0x276   :  { %v4537_v15 = vadd.f32 %v4536_v10, %v4524_v6  ;;  %v4549_v16 = vpop.f32.mrf.mxu3  ;;  %v5106_v17 = vor.u32 %v7479_v1, %v5103_v3  ;;  %v5490_v58 = vor.u32 %v7584_v47, %v5489_v46  ;;  %v7717_v3 = vld [vmem:[%s11991_s3 + $0x7b0] sm:$0xf0]  ;;  %v6705_v6 = vld [vmem:[%s11991_s3 + $0xcc0] sm:$0xf]  ;;  %v8040_v10 = vld [vmem:[%s11991_s3 + $0x11c8] sm:$0xf0] }
 0x277   :  { %4788 = vmatpush.bf16.msra.mxu2 %v6778_v4  ;;  %v7631_v4 = vld [vmem:[%s11991_s3 + $0x504] sm:$0xf]  ;;  %v5869_v38 = vld [vmem:[%s11991_s3 + $0x638] sm:$0xf]  ;;  %v5185_v46 = vld [vmem:[%s11991_s3 + $0xe0] sm:$0xf] }
 0x278   :  { %4801 = vmatpush.bf16.msra.mxu3 %v7386_v29  ;;  %v5641_v29 = vld [vmem:[%s11991_s3 + $0x470] sm:$0xf]  ;;  %v5714_v20 = vor.u32 %v7631_v4, %v5711_v5  ;;  %v4550_v24 = vadd.f32 %v4549_v16, %v4537_v15  ;;  %v7390_v5 = vor.u32 %v8059_v59, %v7389_v60  ;;  %v7508_v47 = vld [vmem:[%s11991_s3 + $0x128] sm:$0xf0]  ;;  %v7085_v60 = vld [vmem:[%s11991_s3 + $0xfb8] sm:$0xf] }
 0x279   :  { %4764 = vmatpush.bf16.msra.mxu0 %v5410_v11  ;;  %4777 = vmatpush.bf16.msra.mxu1 %v6018_v14  ;;  %v7082_v11 = vor.u32 %v7973_v63, %v7079_v0  ;;  %v6395_v14 = vld [vmem:[%s11991_s3 + $0xaa4] sm:$0xf0]  ;;  %v5642_v21 = vor.u32 %v7622_v8, %v5641_v29  ;;  %v7565_v0 = vld [vmem:[%s11991_s3 + $0x2f0] sm:$0xf0]  ;;  %v5945_v16 = vld [vmem:[%s11991_s3 + $0x6d0] sm:$0xf] }
 0x27a   :  { %v6398_v26 = vor.u32 %v7802_v13, %v6395_v14  ;;  %v4877_v39 = vmul.f32 0.5, %v4550_v24  ;;  %v5413_v63 = vld [vmem:[%s11991_s3 + $0x2a8] sm:$0xf]  ;;  %v7546_v13 = vld [vmem:[%s11991_s3 + $0x258] sm:$0xf0] }
 0x27b   :  { %4789 = vmatpush.bf16.msra.mxu2 %v6702_v18  ;;  %v7954_v18 = vld [vmem:[%s11991_s3 + $0xf1c] sm:$0xf]  ;;  %v5414_v8 = vor.u32 %v7565_v0, %v5413_v63  ;;  %v5338_v24 = vor.u32 %v7546_v13, %v5337_v12  ;;  %v7983_v59 = vld [vmem:[%s11991_s3 + $0x1000] sm:$0xf0]  ;;  %v5109_v63 = vld [vmem:[%s11991_s3 + $0x48] sm:$0xf] }
 0x27c   :  { %4802 = vmatpush.bf16.msra.mxu3 %v7310_v22  ;;  %v5565_v22 = vld [vmem:[%s11991_s3 + $0x3d8] sm:$0xf]  ;;  %v7006_v34 = vor.u32 %v7954_v18, %v7003_v19  ;;  %8104 = vtanh.f32 %v4877_v39  ;;  %v7314_v19 = vor.u32 %v8040_v10, %v7313_v9  ;;  %v7679_v39 = vld [vmem:[%s11991_s3 + $0x680] sm:$0xf0]  ;;  %v7489_v0 = vld [vmem:[%s11991_s3 + $0x90] sm:$0xf0] }
 0x27d   :  { %4765 = vmatpush.bf16.msra.mxu0 %v5334_v27  ;;  %4778 = vmatpush.bf16.msra.mxu1 %v5942_v36  ;;  %v6173_v27 = vld [vmem:[%s11991_s3 + $0x898] sm:$0xf]  ;;  %v6319_v36 = vld [vmem:[%s11991_s3 + $0xa0c] sm:$0xf0]  ;;  %v5566_v42 = vor.u32 %v7603_v23, %v5565_v22  ;;  %v5110_v10 = vor.u32 %v7489_v0, %v5109_v63  ;;  %v7964_v12 = vld [vmem:[%s11991_s3 + $0xf68] sm:$0xf0] }
 0x27e   :  { %v6174_v45 = vor.u32 %v7755_v30, %v6173_v27  ;;  %v4551_v53 = vpop.f32.mrf.mxu3  ;;  %v780_v27 = vperm.slane %v11692_v32, 5 }
 0x27f   :  { %4790 = vmatpush.bf16.msra.mxu2 %v6626_v40  ;;  %v6857_v40 = vld [vmem:[%s11991_s3 + $0xdf0] sm:$0xf] }
 0x280   :  { %4803 = vmatpush.bf16.msra.mxu3 %v7234_v43  ;;  %v7465_v43 = vld [vmem:[%s11991_s3 + $0x12b0] sm:$0xf]  ;;  %v6858_v50 = vor.u32 %v7926_v41, %v6857_v40 }
 0x281   :  { %4766 = vmatpush.bf16.msra.mxu0 %v5258_v35  ;;  %4779 = vmatpush.bf16.msra.mxu1 %v5866_v48  ;;  %v6322_v35 = vor.u32 %v7783_v31, %v6319_v36  ;;  %v4538_v48 = vpop.f32.mrf.mxu2  ;;  %v7466_v54 = vor.u32 %v8078_v44, %v7465_v43  ;;  %v5261_v31 = vld [vmem:[%s11991_s3 + $0x178] sm:$0xf]  ;;  %v6553_v41 = vld [vmem:[%s11991_s3 + $0xb90] sm:$0xf] }
 0x282   :  { %v8105_v4 = vpop.eup %8104  ;;  %v7161_v44 = vld [vmem:[%s11991_s3 + $0x1050] sm:$0xf] }
 0x283   :  { %4791 = vmatpush.bf16.msra.mxu2 %v6550_v52  ;;  %v7736_v52 = vld [vmem:[%s11991_s3 + $0x848] sm:$0xf0]  ;;  %v4915_v29 = vmul.f32 0.5, %v8105_v4  ;;  %v7641_v4 = vld [vmem:[%s11991_s3 + $0x550] sm:$0xf0] }
 0x284   :  { %4804 = vmatpush.bf16.msra.mxu3 %v7158_v57  ;;  %v7907_v57 = vld [vmem:[%s11991_s3 + $0xda0] sm:$0xf0] }
 0x285   :  { %4767 = vmatpush.bf16.msra.mxu0 %v5182_v62  ;;  %4780 = vmatpush.bf16.msra.mxu1 %v5790_v2  ;;  %v6098_v62 = vor.u32 %v7736_v52, %v6097_v51  ;;  %v6782_v1 = vor.u32 %v7907_v57, %v6781_v56  ;;  %v6021_v2 = vld [vmem:[%s11991_s3 + $0x768] sm:$0xf]  ;;  %v4934_v14 = vadd.f32 0.5, %v4915_v29  ;;  %v7660_v51 = vld [vmem:[%s11991_s3 + $0x5e8] sm:$0xf0] }
 0x286   :  { %v7831_v56 = vld [vmem:[%s11991_s3 + $0xb40] sm:$0xf0]  ;;  %v7812_v29 = vld [vmem:[%s11991_s3 + $0xaa8] sm:$0xf0] }
 0x287   :  { %4792 = vmatpush.bf16.msra.mxu2 %v6474_v7  ;;  %v7888_v7 = vld [vmem:[%s11991_s3 + $0xd08] sm:$0xf0]  ;;  %v4953_v22 = vmax.f32 %v4934_v14, 1e-06 }
 0x288   :  { %4805 = vmatpush.bf16.msra.mxu3 %v7082_v11  ;;  %v6022_v11 = vor.u32 %v7717_v3, %v6021_v2  ;;  %v6706_v15 = vor.u32 %v7888_v7, %v6705_v6  ;;  %v5717_v3 = vld [vmem:[%s11991_s3 + $0x508] sm:$0xf]  ;;  %v7086_v6 = vor.u32 %v7983_v59, %v7085_v60  ;;  %v6401_v7 = vld [vmem:[%s11991_s3 + $0xa60] sm:$0xf] }
 0x289   :  { %4768 = vmatpush.bf16.msra.mxu0 %v5106_v17  ;;  %4781 = vmatpush.bf16.msra.mxu1 %v5714_v20  ;;  %v7698_v17 = vld [vmem:[%s11991_s3 + $0x718] sm:$0xf0]  ;;  %v4562_v18 = vpop.f32.mrf.mxu0  ;;  %v6629_v20 = vld [vmem:[%s11991_s3 + $0xc28] sm:$0xf]  ;;  %v4972_v36 = vmin.f32 %v4953_v22, 0.999999  ;;  %v5718_v13 = vor.u32 %v7641_v4, %v5717_v3 }
 0x28a   :  { %v5946_v30 = vor.u32 %v7698_v17, %v5945_v16  ;;  %v4563_v48 = vadd.f32 %v4562_v18, %v780_v27  ;;  %v6325_v17 = vld [vmem:[%s11991_s3 + $0x9c8] sm:$0xf]  ;;  %v7793_v18 = vld [vmem:[%s11991_s3 + $0xa10] sm:$0xf0] }
 0x28b   :  { %4793 = vmatpush.bf16.msra.mxu2 %v6398_v26  ;;  %v4575_v23 = vpop.f32.mrf.mxu1  ;;  %v8021_v26 = vld [vmem:[%s11991_s3 + $0x1130] sm:$0xf0]  ;;  %4991 = vst [vmem:[#allocation2 + $0x60] sm:$0xff] %v4972_v36  ;;  %v6326_v22 = vor.u32 %v7793_v18, %v6325_v17 }
 0x28c   :  { %4806 = vmatpush.bf16.msra.mxu3 %v7006_v34  ;;  %4769 = vmatmul.bf16.vlgmr.msra.gmra.mxu0 %v8607_v28  ;;  %v7527_v34 = vld [vmem:[%s11991_s3 + $0x1c0] sm:$0xf0] }
 0x28d   :  { %4813 = vmatpush.bf16.msrb.mxu0 %v5642_v21  ;;  %4826 = vmatpush.bf16.msrb.mxu1 %v6250_v25  ;;  %v7869_v21 = vld [vmem:[%s11991_s3 + $0xc70] sm:$0xf0]  ;;  %v7237_v25 = vld [vmem:[%s11991_s3 + $0x10e8] sm:$0xf]  ;;  %v5262_v43 = vor.u32 %v7527_v34, %v5261_v31 }
 0x28e   :  { %4782 = vmatmul.bf16.vlgmr.msra.gmra.mxu1 %v8615_v33  ;;  %v6630_v37 = vor.u32 %v7869_v21, %v6629_v20  ;;  %v7238_v40 = vor.u32 %v8021_v26, %v7237_v25  ;;  %v6933_v20 = vld [vmem:[%s11991_s3 + $0xe88] sm:$0xf]  ;;  %v7945_v21 = vld [vmem:[%s11991_s3 + $0xed0] sm:$0xf0] }
 0x28f   :  { %4794 = vmatpush.bf16.msra.mxu2 %v6322_v35  ;;  %v5870_v35 = vor.u32 %v7679_v39, %v5869_v38  ;;  %v781_v38 = vperm.slane %v11692_v32, 6 }
 0x290   :  { %4807 = vmatpush.bf16.msra.mxu3 %v6930_v49 }
 0x291   :  { %4814 = vmatpush.bf16.msrb.mxu0 %v5566_v42  ;;  %4827 = vmatpush.bf16.msrb.mxu1 %v6174_v45  ;;  %v7850_v42 = vld [vmem:[%s11991_s3 + $0xbd8] sm:$0xf0]  ;;  %v4564_v52 = vpop.f32.mrf.mxu0 }
 0x292   :  { %4795 = vmatmul.bf16.vlgmr.msra.gmra.mxu2 %v8649_v55  ;;  %v8002_v45 = vld [vmem:[%s11991_s3 + $0x1098] sm:$0xf0]  ;;  %v6554_v49 = vor.u32 %v7850_v42, %v6553_v41  ;;  %v782_v52 = vperm.slane %v11692_v32, 7  ;;  %v763_v32 = vld [vmem:[%s11992_s4 + $0x10] sm:$0x7]  ;;  %s8146_s4 = smov [#allocation2]  }
 0x293   :  { %4839 = vmatpush.bf16.msrb.mxu2 %v6858_v50  ;;  %4808 = vmatmul.bf16.vlgmr.msra.gmra.mxu3 %v8660_v61  ;;  %v5793_v50 = vld [vmem:[%s11991_s3 + $0x5a0] sm:$0xf]  ;;  %v7162_v53 = vor.u32 %v8002_v45, %v7161_v44  ;;  %v4577_v57 = vpop.f32.mrf.mxu1  ;;  %s5004_s25 = sshll.u32 %s8146_s4, 4  ;;  %s5005_s25 = int_to_ptr.vmem [resolvable:$true] %s5004_s25 }
 0x294   :  { %4852 = vmatpush.bf16.msrb.mxu3 %v7466_v54  ;;  %v6477_v54 = vld [vmem:[%s11991_s3 + $0xaf8] sm:$0xf] }
 0x295   :  { %4815 = vmatpush.bf16.msrb.mxu0 %v5490_v58  ;;  %4828 = vmatpush.bf16.msrb.mxu1 %v6098_v62  ;;  %v5186_v58 = vor.u32 %v7508_v47, %v5185_v46  ;;  %v5794_v62 = vor.u32 %v7660_v51, %v5793_v50  ;;  %v6478_v2 = vor.u32 %v7831_v56, %v6477_v54 }
 0x296   :  { %v4601_v9 = vpop.f32.mrf.mxu3 }
 0x297   :  { %4840 = vmatpush.bf16.msrb.mxu2 %v6782_v1  ;;  %v4576_v1 = vadd.f32 %v4575_v23, %v4563_v48 }
 0x298   :  { %4853 = vmatpush.bf16.msrb.mxu3 %v7390_v5  ;;  %v4588_v5 = vpop.f32.mrf.mxu2 }
 0x299   :  { %4816 = vmatpush.bf16.msrb.mxu0 %v5414_v8  ;;  %4829 = vmatpush.bf16.msrb.mxu1 %v6022_v11  ;;  %v4589_v8 = vadd.f32 %v4588_v5, %v4576_v1  ;;  %v7009_v11 = vld [vmem:[%s11991_s3 + $0xf20] sm:$0xf] }
 0x29a   :  { %v7010_v16 = vor.u32 %v7964_v12, %v7009_v11 }
 0x29b   :  { %4841 = vmatpush.bf16.msrb.mxu2 %v6706_v15  ;;  %v4602_v14 = vadd.f32 %v4601_v9, %v4589_v8  ;;  %v6402_v15 = vor.u32 %v7812_v29, %v6401_v7  ;;  %v783_v8 = vperm.slane %v763_v32, 0 }
 0x29c   :  { %4854 = vmatpush.bf16.msrb.mxu3 %v7314_v19 }
 0x29d   :  { %4817 = vmatpush.bf16.msrb.mxu0 %v5338_v24  ;;  %4830 = vmatpush.bf16.msrb.mxu1 %v5946_v30  ;;  %v4878_v19 = vmul.f32 0.5, %v4602_v14  ;;  %v6934_v24 = vor.u32 %v7945_v21, %v6933_v20 }
 0x29e   :  { %v4603_v25 = vpop.f32.mrf.mxu3 }
 0x29f   :  { %4842 = vmatpush.bf16.msrb.mxu2 %v6630_v37  ;;  %8106 = vtanh.f32 %v4878_v19 }
 0x2a0   :  { %4855 = vmatpush.bf16.msrb.mxu3 %v7238_v40  ;;  %v4590_v23 = vpop.f32.mrf.mxu2 }
 0x2a1   :  { %4818 = vmatpush.bf16.msrb.mxu0 %v5262_v43  ;;  %4831 = vmatpush.bf16.msrb.mxu1 %v5870_v35 }
 0x2a3   :  { %4843 = vmatpush.bf16.msrb.mxu2 %v6554_v49 }
 0x2a4   :  { %4856 = vmatpush.bf16.msrb.mxu3 %v7162_v53 }
 0x2a5   :  { %4819 = vmatpush.bf16.msrb.mxu0 %v5186_v58  ;;  %4832 = vmatpush.bf16.msrb.mxu1 %v5794_v62  ;;  %v8107_v26 = vpop.eup %8106 }
 0x2a6   :  { %v4916_v27 = vmul.f32 0.5, %v8107_v26 }
 0x2a7   :  { %4844 = vmatpush.bf16.msrb.mxu2 %v6478_v2 }
 0x2a8   :  { %4857 = vmatpush.bf16.msrb.mxu3 %v7086_v6  ;;  %v4935_v30 = vadd.f32 0.5, %v4916_v27  ;;  %v784_v27 = vperm.slane %v763_v32, 1 }
 0x2a9   :  { %4820 = vmatpush.bf16.msrb.mxu0 %v5110_v10  ;;  %4833 = vmatpush.bf16.msrb.mxu1 %v5718_v13  ;;  %v4614_v31 = vpop.f32.mrf.mxu0 }
 0x2aa   :  { %v4954_v34 = vmax.f32 %v4935_v30, 1e-06 }
 0x2ab   :  { %4845 = vmatpush.bf16.msrb.mxu2 %v6402_v15  ;;  %v4627_v36 = vpop.f32.mrf.mxu1 }
 0x2ac   :  { %4858 = vmatpush.bf16.msrb.mxu3 %v7010_v16  ;;  %4821 = vmatmul.bf16.vlgmr.msrb.gmra.mxu0 %v8607_v28  ;;  %v4973_v37 = vmin.f32 %v4954_v34, 0.999999  ;;  %v4615_v28 = vadd.f32 %v4614_v31, %v781_v38 }
 0x2ad   :  { %4834 = vmatmul.bf16.vlgmr.msrb.gmra.mxu1 %v8615_v33 }
 0x2ae   :  { %4992 = vst [vmem:[#allocation2 + $0x68] sm:$0xff] %v4973_v37  ;;  %v4628_v33 = vadd.f32 %v4627_v36, %v4615_v28 }
 0x2af   :  { %4846 = vmatpush.bf16.msrb.mxu2 %v6326_v22 }
 0x2b0   :  { %4859 = vmatpush.bf16.msrb.mxu3 %v6934_v24 }
 0x2b1   :  { %v4616_v39 = vpop.f32.mrf.mxu0 }
 0x2b2   :  { %4847 = vmatmul.bf16.vlgmr.msrb.gmra.mxu2 %v8649_v55 }
 0x2b3   :  { %4860 = vmatmul.bf16.vlgmr.msrb.gmra.mxu3 %v8660_v61  ;;  %v4629_v40 = vpop.f32.mrf.mxu1 }
 0x2b5   :  { %v4640_v41 = vpop.f32.mrf.mxu2 }
 0x2b6   :  { %v4641_v42 = vadd.f32 %v4640_v41, %v4628_v33  ;;  %v4653_v43 = vpop.f32.mrf.mxu3 }
 0x2b8   :  { %v4654_v44 = vadd.f32 %v4653_v43, %v4641_v42 }
 0x2ba   :  { %v4879_v45 = vmul.f32 0.5, %v4654_v44 }
 0x2bc   :  { %8108 = vtanh.f32 %v4879_v45 }
 0x2bd   :  { %v4642_v55 = vpop.f32.mrf.mxu2 }
 0x2be   :  { %v4655_v61 = vpop.f32.mrf.mxu3 }
 0x2c2   :  { %v8109_v35 = vpop.eup %8108 }
 0x2c3   :  { %v4917_v46 = vmul.f32 0.5, %v8109_v35 }
 0x2c5   :  { %v4936_v47 = vadd.f32 0.5, %v4917_v46  ;;  %v785_v46 = vperm.slane %v763_v32, 2 }
 0x2c7   :  { %v4955_v49 = vmax.f32 %v4936_v47, 1e-06 }
 0x2c9   :  { %v4666_v48 = vpop.f32.mrf.mxu0  ;;  %v4974_v51 = vmin.f32 %v4955_v49, 0.999999 }
 0x2ca   :  { %v4667_v53 = vadd.f32 %v4666_v48, %v782_v52 }
 0x2cb   :  { %v4679_v50 = vpop.f32.mrf.mxu1  ;;  %4993 = vst [vmem:[#allocation2 + $0x70] sm:$0xff] %v4974_v51 }
 0x2cc   :  { %v4680_v57 = vadd.f32 %v4679_v50, %v4667_v53 }
 0x2d1   :  { %v4668_v54 = vpop.f32.mrf.mxu0 }
 0x2d3   :  { %v4681_v56 = vpop.f32.mrf.mxu1 }
 0x2d5   :  { %v4692_v58 = vpop.f32.mrf.mxu2 }
 0x2d6   :  { %v4693_v60 = vadd.f32 %v4692_v58, %v4680_v57  ;;  %v4705_v59 = vpop.f32.mrf.mxu3 }
 0x2d8   :  { %v4706_v62 = vadd.f32 %v4705_v59, %v4693_v60 }
 0x2da   :  { %v4880_v63 = vmul.f32 0.5, %v4706_v62 }
 0x2dc   :  { %8110 = vtanh.f32 %v4880_v63 }
 0x2dd   :  { %v4694_v0 = vpop.f32.mrf.mxu2 }
 0x2de   :  { %v4707_v1 = vpop.f32.mrf.mxu3 }
 0x2e2   :  { %v8111_v2 = vpop.eup %8110 }
 0x2e3   :  { %v4918_v3 = vmul.f32 0.5, %v8111_v2 }
 0x2e5   :  { %v4937_v4 = vadd.f32 0.5, %v4918_v3 }
 0x2e7   :  { %v4956_v6 = vmax.f32 %v4937_v4, 1e-06 }
 0x2e9   :  { %v4718_v5 = vpop.f32.mrf.mxu0  ;;  %v4975_v29 = vmin.f32 %v4956_v6, 0.999999 }
 0x2ea   :  { %v4719_v9 = vadd.f32 %v4718_v5, %v783_v8 }
 0x2eb   :  { %v4731_v7 = vpop.f32.mrf.mxu1  ;;  %4994 = vst [vmem:[#allocation2 + $0x78] sm:$0xff] %v4975_v29 }
 0x2ec   :  { %v4732_v12 = vadd.f32 %v4731_v7, %v4719_v9 }
 0x2f1   :  { %v4720_v10 = vpop.f32.mrf.mxu0 }
 0x2f3   :  { %v4733_v11 = vpop.f32.mrf.mxu1 }
 0x2f5   :  { %v4744_v13 = vpop.f32.mrf.mxu2 }
 0x2f6   :  { %v4745_v14 = vadd.f32 %v4744_v13, %v4732_v12  ;;  %v4757_v15 = vpop.f32.mrf.mxu3 }
 0x2f8   :  { %v4758_v16 = vadd.f32 %v4757_v15, %v4745_v14 }
 0x2fa   :  { %v4881_v17 = vmul.f32 0.5, %v4758_v16 }
 0x2fc   :  { %8112 = vtanh.f32 %v4881_v17 }
 0x2fd   :  { %v4746_v18 = vpop.f32.mrf.mxu2 }
 0x2fe   :  { %v4759_v19 = vpop.f32.mrf.mxu3 }
 0x302   :  { %v8113_v20 = vpop.eup %8112 }
 0x303   :  { %v4919_v21 = vmul.f32 0.5, %v8113_v20 }
 0x305   :  { %v4938_v22 = vadd.f32 0.5, %v4919_v21 }
 0x307   :  { %v4957_v24 = vmax.f32 %v4938_v22, 1e-06 }
 0x309   :  { %v4770_v23 = vpop.f32.mrf.mxu0  ;;  %v4976_v26 = vmin.f32 %v4957_v24, 0.999999 }
 0x30a   :  { %v4771_v30 = vadd.f32 %v4770_v23, %v784_v27 }
 0x30b   :  { %v4783_v25 = vpop.f32.mrf.mxu1  ;;  %4995 = vst [vmem:[#allocation2 + $0x80] sm:$0xff] %v4976_v26 }
 0x30c   :  { %v4784_v36 = vadd.f32 %v4783_v25, %v4771_v30 }
 0x311   :  { %v4772_v31 = vpop.f32.mrf.mxu0 }
 0x313   :  { %v4785_v34 = vpop.f32.mrf.mxu1 }
 0x315   :  { %v4796_v37 = vpop.f32.mrf.mxu2 }
 0x316   :  { %v4797_v38 = vadd.f32 %v4796_v37, %v4784_v36  ;;  %v4809_v28 = vpop.f32.mrf.mxu3 }
 0x318   :  { %v4810_v39 = vadd.f32 %v4809_v28, %v4797_v38 }
 0x31a   :  { %v4882_v40 = vmul.f32 0.5, %v4810_v39 }
 0x31c   :  { %8114 = vtanh.f32 %v4882_v40 }
 0x31d   :  { %v4798_v33 = vpop.f32.mrf.mxu2 }
 0x31e   :  { %v4811_v41 = vpop.f32.mrf.mxu3 }
 0x322   :  { %v8115_v42 = vpop.eup %8114 }
 0x323   :  { %v4920_v43 = vmul.f32 0.5, %v8115_v42 }
 0x325   :  { %v4939_v44 = vadd.f32 0.5, %v4920_v43 }
 0x327   :  { %v4958_v55 = vmax.f32 %v4939_v44, 1e-06 }
 0x329   :  { %v4822_v45 = vpop.f32.mrf.mxu0  ;;  %v4977_v35 = vmin.f32 %v4958_v55, 0.999999 }
 0x32a   :  { %v4835_v61 = vpop.f32.mrf.mxu1  ;;  %v4823_v47 = vadd.f32 %v4822_v45, %v785_v46 }
 0x32b   :  { %4996 = vst [vmem:[#allocation2 + $0x88] sm:$0xff] %v4977_v35 }
 0x32c   :  { %v4836_v50 = vadd.f32 %v4835_v61, %v4823_v47 }
 0x331   :  { %v4824_v48 = vpop.f32.mrf.mxu0 }
 0x332   :  { %v4837_v49 = vpop.f32.mrf.mxu1 }
 0x335   :  { %v4848_v51 = vpop.f32.mrf.mxu2 }
 0x336   :  { %v4849_v52 = vadd.f32 %v4848_v51, %v4836_v50  ;;  %v4861_v53 = vpop.f32.mrf.mxu3 }
 0x338   :  { %v4862_v54 = vadd.f32 %v4861_v53, %v4849_v52 }
 0x33a   :  { %v4883_v56 = vmul.f32 0.5, %v4862_v54 }
 0x33c   :  { %8116 = vtanh.f32 %v4883_v56 }
 0x33d   :  { %v4850_v57 = vpop.f32.mrf.mxu2 }
 0x33e   :  { %v4863_v58 = vpop.f32.mrf.mxu3 }
 0x342   :  { %v8117_v60 = vpop.eup %8116 }
 0x343   :  { %v4921_v59 = vmul.f32 0.5, %v8117_v60 }
 0x345   :  { %v4940_v62 = vadd.f32 0.5, %v4921_v59 }
 0x347   :  { %v4959_v63 = vmax.f32 %v4940_v62, 1e-06 }
 0x349   :  { %v4978_v0 = vmin.f32 %v4959_v63, 0.999999 }
 0x34b   :  { %4998 = vst.msk [vmem:[#allocation2 + $0x90] sm:$0xff] %vm4997_vm1, %v4978_v0 }
 0x34c   :  { %5009 = dma.vmem_to_hbm [thread:$0]  %s5005_s25, 2432, %s5007_s28, [#allocation3]  }
 0x34d   :  { %8144 = dma.done.wait [#allocation3], 2432  }
 0x34e   :  { %8145 = vsyncadd [#allocation3], 4294964864 }
 0x34f   :  { %5014 = vsyncpa [#allocation3], 1 }

</bundles_post_ra>
